<compile_context>
chip_gen: v5e
topology: v5e:2x2
jax: 0.10.0
libtpu: 0.0.40
codegen_flags: <defaults>
</compile_context>

<pallas_src>
import jax
import jax.numpy as jnp
from jax.experimental import pallas as pl
from jax.experimental.pallas import tpu as pltpu

_LANES = 128
_H1, _H2 = 32, 8
_OFF_W1 = 0
_OFF_B1 = _OFF_W1 + _H1                # 32
_OFF_W2 = _OFF_B1 + _H1                # 64   (flattened [j * 8 + k])
_OFF_B2 = _OFF_W2 + _H1 * _H2          # 320
_OFF_W3 = _OFF_B2 + _H2                # 328
_OFF_B3 = _OFF_W3 + _H2                # 336
_N_PARAMS = _OFF_B3 + 1                # 337


def _mlp_kernel(p_ref, x_ref, o_ref):
    # Hoist every parameter scalar once per grid step (SMEM scalar reads;
    # broadcast directly into VPU ops inside the chunk loop).
    w1 = [p_ref[_OFF_W1 + j] for j in range(_H1)]
    b1 = [p_ref[_OFF_B1 + j] for j in range(_H1)]
    w2 = [[p_ref[_OFF_W2 + j * _H2 + k] for k in range(_H2)] for j in range(_H1)]
    b2 = [p_ref[_OFF_B2 + k] for k in range(_H2)]
    w3 = [p_ref[_OFF_W3 + k] for k in range(_H2)]
    b3 = p_ref[_OFF_B3]

    n_chunks = x_ref.shape[0] // 8  # static

    @pl.loop(0, n_chunks)
    def _(c):
        r = pl.multiple_of(c * 8, 8)
        x = x_ref[pl.ds(r, 8), :]                        # (8, 128) lane-dense batch

        # Layer 2 accumulators initialized with b2 (layer 1 fused into the loop).
        acc = [jnp.full_like(x, b2[k]) for k in range(_H2)]
        for j in range(_H1):
            h1j = jnp.maximum(w1[j] * x + b1[j], 0.0)    # layer-1 channel j (VPU)
            for k in range(_H2):
                acc[k] = acc[k] + w2[j][k] * h1j         # layer-2 accumulate (VPU)

        out = jnp.full_like(x, b3)                       # layer 3
        for k in range(_H2):
            out = out + w3[k] * jnp.maximum(acc[k], 0.0)

        o_ref[pl.ds(r, 8), :] = out                      # unmasked lane-dense store


def pack_params(p):
    """Pack all weights/biases into one flat f32 vector (SMEM-resident)."""
    return jnp.concatenate([
        p["w1"].reshape(-1),   # (32,)  stored [in=1, out=32]
        p["b1"].reshape(-1),   # (32,)
        p["w2"].reshape(-1),   # (256,) stored [in=32, out=8] row-major -> j*8+k
        p["b2"].reshape(-1),   # (8,)
        p["w3"].reshape(-1),   # (8,)
        p["b3"].reshape(-1),   # (1,)
    ]).astype(jnp.float32)


def logreg_forward(x, params, *, block_rows=256):
    """x: [B, 1] float32 -> [B, 1] float32 (eval-mode forward)."""
    B = x.shape[0]
    packed = pack_params(params)

    # Lane-dense layout: 128 batch elements per row; tile rows by `br`.
    rows = -(-B // _LANES)                             # ceil(B / 128)
    br = max(8, min(block_rows, ((rows + 7) // 8) * 8))
    grid_n = -(-rows // br)
    rows_pad = grid_n * br
    b_pad = rows_pad * _LANES

    xf = jnp.zeros((b_pad,), jnp.float32).at[:B].set(
        x.reshape(-1).astype(jnp.float32)).reshape(rows_pad, _LANES)

    out = pl.pallas_call(
        _mlp_kernel,
        out_shape=jax.ShapeDtypeStruct((rows_pad, _LANES), jnp.float32),
        grid=(grid_n,),
        in_specs=[
            pl.BlockSpec(memory_space=pltpu.MemorySpace.SMEM),   # packed params
            pl.BlockSpec((br, _LANES), lambda i: (i, 0)),        # x (lane-dense)
        ],
        out_specs=pl.BlockSpec((br, _LANES), lambda i: (i, 0)),
        compiler_params=pltpu.CompilerParams(
            dimension_semantics=("parallel",)),
    )(packed, xf)

    return out.reshape(-1)[:B].reshape(B, 1)


def init_params(key):
    """Deterministic init matching nn.Linear shapes (stored as [in, out])."""
    def linear_init(k, fan_in, fan_out):
        kw, kb = jax.random.split(k)
        bound = 1.0 / jnp.sqrt(float(fan_in))
        w = jax.random.uniform(kw, (fan_in, fan_out), jnp.float32, -bound, bound)
        b = jax.random.uniform(kb, (1, fan_out), jnp.float32, -bound, bound)
        return w, b

    k1, k2, k3 = jax.random.split(key, 3)
    w1, b1 = linear_init(k1, 1, _H1)
    w2, b2 = linear_init(k2, _H1, _H2)
    w3, b3 = linear_init(k3, _H2, 1)
    return {"w1": w1, "b1": b1, "w2": w2, "b2": b2, "w3": w3, "b3": b3}


def reference_forward(x, p):
    hi = jax.lax.Precision.HIGHEST
    h1 = jnp.maximum(x @ p["w1"] + p["b1"], 0.0)
    h2 = jnp.maximum(
        jnp.einsum("bi,io->bo", h1, p["w2"], precision=hi) + p["b2"], 0.0)
    return jnp.einsum("bi,io->bo", h2, p["w3"], precision=hi) + p["b3"]


if __name__ == "__main__":
    key = jax.random.PRNGKey(0)
    kx, kp, kx2 = jax.random.split(key, 3)
    params = init_params(kp)

    # Small test (single grid step).
    B = 8
    x = jax.random.normal(kx, (B, 1), dtype=jnp.float32)
    out = jax.block_until_ready(logreg_forward(x, params))
    ref = reference_forward(x, params)
    assert out.shape == (B, 1), out.shape
    assert jnp.allclose(out, ref, atol=1e-4, rtol=1e-4), (out, ref)

    # Larger test exercising the batch grid (grid_n > 1) and padding path.
    B2 = 2000
    x2 = jax.random.normal(kx2, (B2, 1), dtype=jnp.float32)
    out2 = jax.block_until_ready(logreg_forward(x2, params, block_rows=8))
    ref2 = reference_forward(x2, params)
    assert out2.shape == (B2, 1), out2.shape
    assert jnp.allclose(out2, ref2, atol=1e-4, rtol=1e-4)

    print("KERNEL_OK")
</pallas_src>

<mosaic_0001>
module attributes {stable_mosaic.version = 11 : i64} {
  func.func @_mlp_kernel(%arg0: i32, %arg1: memref<337xf32, #tpu.memory_space<smem>>, %arg2: memref<8x128xf32, #tpu.memory_space<vmem>>, %arg3: memref<8x128xf32, #tpu.memory_space<vmem>>) attributes {dimension_semantics = [#tpu.dimension_semantics<parallel>], iteration_bounds = array<i64: 1>, scalar_prefetch = 0 : i64, scratch_operands = 0 : i64, tpu.core_type = #tpu.core_type<tc>, window_params = [{transform_indices = @transform_0, window_bounds = array<i64: 337>}, {transform_indices = @transform_1, window_bounds = array<i64: 8, 128>}, {transform_indices = @transform_2, window_bounds = array<i64: 8, 128>}]} {
    %c0 = arith.constant 0 : index
    %0 = memref.load %arg1[%c0] : memref<337xf32, #tpu.memory_space<smem>>
    %c1 = arith.constant 1 : index
    %1 = memref.load %arg1[%c1] : memref<337xf32, #tpu.memory_space<smem>>
    %c2 = arith.constant 2 : index
    %2 = memref.load %arg1[%c2] : memref<337xf32, #tpu.memory_space<smem>>
    %c3 = arith.constant 3 : index
    %3 = memref.load %arg1[%c3] : memref<337xf32, #tpu.memory_space<smem>>
    %c4 = arith.constant 4 : index
    %4 = memref.load %arg1[%c4] : memref<337xf32, #tpu.memory_space<smem>>
    %c5 = arith.constant 5 : index
    %5 = memref.load %arg1[%c5] : memref<337xf32, #tpu.memory_space<smem>>
    %c6 = arith.constant 6 : index
    %6 = memref.load %arg1[%c6] : memref<337xf32, #tpu.memory_space<smem>>
    %c7 = arith.constant 7 : index
    %7 = memref.load %arg1[%c7] : memref<337xf32, #tpu.memory_space<smem>>
    %c8 = arith.constant 8 : index
    %8 = memref.load %arg1[%c8] : memref<337xf32, #tpu.memory_space<smem>>
    %c9 = arith.constant 9 : index
    %9 = memref.load %arg1[%c9] : memref<337xf32, #tpu.memory_space<smem>>
    %c10 = arith.constant 10 : index
    %10 = memref.load %arg1[%c10] : memref<337xf32, #tpu.memory_space<smem>>
    %c11 = arith.constant 11 : index
    %11 = memref.load %arg1[%c11] : memref<337xf32, #tpu.memory_space<smem>>
    %c12 = arith.constant 12 : index
    %12 = memref.load %arg1[%c12] : memref<337xf32, #tpu.memory_space<smem>>
    %c13 = arith.constant 13 : index
    %13 = memref.load %arg1[%c13] : memref<337xf32, #tpu.memory_space<smem>>
    %c14 = arith.constant 14 : index
    %14 = memref.load %arg1[%c14] : memref<337xf32, #tpu.memory_space<smem>>
    %c15 = arith.constant 15 : index
    %15 = memref.load %arg1[%c15] : memref<337xf32, #tpu.memory_space<smem>>
    %c16 = arith.constant 16 : index
    %16 = memref.load %arg1[%c16] : memref<337xf32, #tpu.memory_space<smem>>
    %c17 = arith.constant 17 : index
    %17 = memref.load %arg1[%c17] : memref<337xf32, #tpu.memory_space<smem>>
    %c18 = arith.constant 18 : index
    %18 = memref.load %arg1[%c18] : memref<337xf32, #tpu.memory_space<smem>>
    %c19 = arith.constant 19 : index
    %19 = memref.load %arg1[%c19] : memref<337xf32, #tpu.memory_space<smem>>
    %c20 = arith.constant 20 : index
    %20 = memref.load %arg1[%c20] : memref<337xf32, #tpu.memory_space<smem>>
    %c21 = arith.constant 21 : index
    %21 = memref.load %arg1[%c21] : memref<337xf32, #tpu.memory_space<smem>>
    %c22 = arith.constant 22 : index
    %22 = memref.load %arg1[%c22] : memref<337xf32, #tpu.memory_space<smem>>
    %c23 = arith.constant 23 : index
    %23 = memref.load %arg1[%c23] : memref<337xf32, #tpu.memory_space<smem>>
    %c24 = arith.constant 24 : index
    %24 = memref.load %arg1[%c24] : memref<337xf32, #tpu.memory_space<smem>>
    %c25 = arith.constant 25 : index
    %25 = memref.load %arg1[%c25] : memref<337xf32, #tpu.memory_space<smem>>
    %c26 = arith.constant 26 : index
    %26 = memref.load %arg1[%c26] : memref<337xf32, #tpu.memory_space<smem>>
    %c27 = arith.constant 27 : index
    %27 = memref.load %arg1[%c27] : memref<337xf32, #tpu.memory_space<smem>>
    %c28 = arith.constant 28 : index
    %28 = memref.load %arg1[%c28] : memref<337xf32, #tpu.memory_space<smem>>
    %c29 = arith.constant 29 : index
    %29 = memref.load %arg1[%c29] : memref<337xf32, #tpu.memory_space<smem>>
    %c30 = arith.constant 30 : index
    %30 = memref.load %arg1[%c30] : memref<337xf32, #tpu.memory_space<smem>>
    %c31 = arith.constant 31 : index
    %31 = memref.load %arg1[%c31] : memref<337xf32, #tpu.memory_space<smem>>
    %c32 = arith.constant 32 : index
    %32 = memref.load %arg1[%c32] : memref<337xf32, #tpu.memory_space<smem>>
    %c33 = arith.constant 33 : index
    %33 = memref.load %arg1[%c33] : memref<337xf32, #tpu.memory_space<smem>>
    %c34 = arith.constant 34 : index
    %34 = memref.load %arg1[%c34] : memref<337xf32, #tpu.memory_space<smem>>
    %c35 = arith.constant 35 : index
    %35 = memref.load %arg1[%c35] : memref<337xf32, #tpu.memory_space<smem>>
    %c36 = arith.constant 36 : index
    %36 = memref.load %arg1[%c36] : memref<337xf32, #tpu.memory_space<smem>>
    %c37 = arith.constant 37 : index
    %37 = memref.load %arg1[%c37] : memref<337xf32, #tpu.memory_space<smem>>
    %c38 = arith.constant 38 : index
    %38 = memref.load %arg1[%c38] : memref<337xf32, #tpu.memory_space<smem>>
    %c39 = arith.constant 39 : index
    %39 = memref.load %arg1[%c39] : memref<337xf32, #tpu.memory_space<smem>>
    %c40 = arith.constant 40 : index
    %40 = memref.load %arg1[%c40] : memref<337xf32, #tpu.memory_space<smem>>
    %c41 = arith.constant 41 : index
    %41 = memref.load %arg1[%c41] : memref<337xf32, #tpu.memory_space<smem>>
    %c42 = arith.constant 42 : index
    %42 = memref.load %arg1[%c42] : memref<337xf32, #tpu.memory_space<smem>>
    %c43 = arith.constant 43 : index
    %43 = memref.load %arg1[%c43] : memref<337xf32, #tpu.memory_space<smem>>
    %c44 = arith.constant 44 : index
    %44 = memref.load %arg1[%c44] : memref<337xf32, #tpu.memory_space<smem>>
    %c45 = arith.constant 45 : index
    %45 = memref.load %arg1[%c45] : memref<337xf32, #tpu.memory_space<smem>>
    %c46 = arith.constant 46 : index
    %46 = memref.load %arg1[%c46] : memref<337xf32, #tpu.memory_space<smem>>
    %c47 = arith.constant 47 : index
    %47 = memref.load %arg1[%c47] : memref<337xf32, #tpu.memory_space<smem>>
    %c48 = arith.constant 48 : index
    %48 = memref.load %arg1[%c48] : memref<337xf32, #tpu.memory_space<smem>>
    %c49 = arith.constant 49 : index
    %49 = memref.load %arg1[%c49] : memref<337xf32, #tpu.memory_space<smem>>
    %c50 = arith.constant 50 : index
    %50 = memref.load %arg1[%c50] : memref<337xf32, #tpu.memory_space<smem>>
    %c51 = arith.constant 51 : index
    %51 = memref.load %arg1[%c51] : memref<337xf32, #tpu.memory_space<smem>>
    %c52 = arith.constant 52 : index
    %52 = memref.load %arg1[%c52] : memref<337xf32, #tpu.memory_space<smem>>
    %c53 = arith.constant 53 : index
    %53 = memref.load %arg1[%c53] : memref<337xf32, #tpu.memory_space<smem>>
    %c54 = arith.constant 54 : index
    %54 = memref.load %arg1[%c54] : memref<337xf32, #tpu.memory_space<smem>>
    %c55 = arith.constant 55 : index
    %55 = memref.load %arg1[%c55] : memref<337xf32, #tpu.memory_space<smem>>
    %c56 = arith.constant 56 : index
    %56 = memref.load %arg1[%c56] : memref<337xf32, #tpu.memory_space<smem>>
    %c57 = arith.constant 57 : index
    %57 = memref.load %arg1[%c57] : memref<337xf32, #tpu.memory_space<smem>>
    %c58 = arith.constant 58 : index
    %58 = memref.load %arg1[%c58] : memref<337xf32, #tpu.memory_space<smem>>
    %c59 = arith.constant 59 : index
    %59 = memref.load %arg1[%c59] : memref<337xf32, #tpu.memory_space<smem>>
    %c60 = arith.constant 60 : index
    %60 = memref.load %arg1[%c60] : memref<337xf32, #tpu.memory_space<smem>>
    %c61 = arith.constant 61 : index
    %61 = memref.load %arg1[%c61] : memref<337xf32, #tpu.memory_space<smem>>
    %c62 = arith.constant 62 : index
    %62 = memref.load %arg1[%c62] : memref<337xf32, #tpu.memory_space<smem>>
    %c63 = arith.constant 63 : index
    %63 = memref.load %arg1[%c63] : memref<337xf32, #tpu.memory_space<smem>>
    %c64 = arith.constant 64 : index
    %64 = memref.load %arg1[%c64] : memref<337xf32, #tpu.memory_space<smem>>
    %c65 = arith.constant 65 : index
    %65 = memref.load %arg1[%c65] : memref<337xf32, #tpu.memory_space<smem>>
    %c66 = arith.constant 66 : index
    %66 = memref.load %arg1[%c66] : memref<337xf32, #tpu.memory_space<smem>>
    %c67 = arith.constant 67 : index
    %67 = memref.load %arg1[%c67] : memref<337xf32, #tpu.memory_space<smem>>
    %c68 = arith.constant 68 : index
    %68 = memref.load %arg1[%c68] : memref<337xf32, #tpu.memory_space<smem>>
    %c69 = arith.constant 69 : index
    %69 = memref.load %arg1[%c69] : memref<337xf32, #tpu.memory_space<smem>>
    %c70 = arith.constant 70 : index
    %70 = memref.load %arg1[%c70] : memref<337xf32, #tpu.memory_space<smem>>
    %c71 = arith.constant 71 : index
    %71 = memref.load %arg1[%c71] : memref<337xf32, #tpu.memory_space<smem>>
    %c72 = arith.constant 72 : index
    %72 = memref.load %arg1[%c72] : memref<337xf32, #tpu.memory_space<smem>>
    %c73 = arith.constant 73 : index
    %73 = memref.load %arg1[%c73] : memref<337xf32, #tpu.memory_space<smem>>
    %c74 = arith.constant 74 : index
    %74 = memref.load %arg1[%c74] : memref<337xf32, #tpu.memory_space<smem>>
    %c75 = arith.constant 75 : index
    %75 = memref.load %arg1[%c75] : memref<337xf32, #tpu.memory_space<smem>>
    %c76 = arith.constant 76 : index
    %76 = memref.load %arg1[%c76] : memref<337xf32, #tpu.memory_space<smem>>
    %c77 = arith.constant 77 : index
    %77 = memref.load %arg1[%c77] : memref<337xf32, #tpu.memory_space<smem>>
    %c78 = arith.constant 78 : index
    %78 = memref.load %arg1[%c78] : memref<337xf32, #tpu.memory_space<smem>>
    %c79 = arith.constant 79 : index
    %79 = memref.load %arg1[%c79] : memref<337xf32, #tpu.memory_space<smem>>
    %c80 = arith.constant 80 : index
    %80 = memref.load %arg1[%c80] : memref<337xf32, #tpu.memory_space<smem>>
    %c81 = arith.constant 81 : index
    %81 = memref.load %arg1[%c81] : memref<337xf32, #tpu.memory_space<smem>>
    %c82 = arith.constant 82 : index
    %82 = memref.load %arg1[%c82] : memref<337xf32, #tpu.memory_space<smem>>
    %c83 = arith.constant 83 : index
    %83 = memref.load %arg1[%c83] : memref<337xf32, #tpu.memory_space<smem>>
    %c84 = arith.constant 84 : index
    %84 = memref.load %arg1[%c84] : memref<337xf32, #tpu.memory_space<smem>>
    %c85 = arith.constant 85 : index
    %85 = memref.load %arg1[%c85] : memref<337xf32, #tpu.memory_space<smem>>
    %c86 = arith.constant 86 : index
    %86 = memref.load %arg1[%c86] : memref<337xf32, #tpu.memory_space<smem>>
    %c87 = arith.constant 87 : index
    %87 = memref.load %arg1[%c87] : memref<337xf32, #tpu.memory_space<smem>>
    %c88 = arith.constant 88 : index
    %88 = memref.load %arg1[%c88] : memref<337xf32, #tpu.memory_space<smem>>
    %c89 = arith.constant 89 : index
    %89 = memref.load %arg1[%c89] : memref<337xf32, #tpu.memory_space<smem>>
    %c90 = arith.constant 90 : index
    %90 = memref.load %arg1[%c90] : memref<337xf32, #tpu.memory_space<smem>>
    %c91 = arith.constant 91 : index
    %91 = memref.load %arg1[%c91] : memref<337xf32, #tpu.memory_space<smem>>
    %c92 = arith.constant 92 : index
    %92 = memref.load %arg1[%c92] : memref<337xf32, #tpu.memory_space<smem>>
    %c93 = arith.constant 93 : index
    %93 = memref.load %arg1[%c93] : memref<337xf32, #tpu.memory_space<smem>>
    %c94 = arith.constant 94 : index
    %94 = memref.load %arg1[%c94] : memref<337xf32, #tpu.memory_space<smem>>
    %c95 = arith.constant 95 : index
    %95 = memref.load %arg1[%c95] : memref<337xf32, #tpu.memory_space<smem>>
    %c96 = arith.constant 96 : index
    %96 = memref.load %arg1[%c96] : memref<337xf32, #tpu.memory_space<smem>>
    %c97 = arith.constant 97 : index
    %97 = memref.load %arg1[%c97] : memref<337xf32, #tpu.memory_space<smem>>
    %c98 = arith.constant 98 : index
    %98 = memref.load %arg1[%c98] : memref<337xf32, #tpu.memory_space<smem>>
    %c99 = arith.constant 99 : index
    %99 = memref.load %arg1[%c99] : memref<337xf32, #tpu.memory_space<smem>>
    %c100 = arith.constant 100 : index
    %100 = memref.load %arg1[%c100] : memref<337xf32, #tpu.memory_space<smem>>
    %c101 = arith.constant 101 : index
    %101 = memref.load %arg1[%c101] : memref<337xf32, #tpu.memory_space<smem>>
    %c102 = arith.constant 102 : index
    %102 = memref.load %arg1[%c102] : memref<337xf32, #tpu.memory_space<smem>>
    %c103 = arith.constant 103 : index
    %103 = memref.load %arg1[%c103] : memref<337xf32, #tpu.memory_space<smem>>
    %c104 = arith.constant 104 : index
    %104 = memref.load %arg1[%c104] : memref<337xf32, #tpu.memory_space<smem>>
    %c105 = arith.constant 105 : index
    %105 = memref.load %arg1[%c105] : memref<337xf32, #tpu.memory_space<smem>>
    %c106 = arith.constant 106 : index
    %106 = memref.load %arg1[%c106] : memref<337xf32, #tpu.memory_space<smem>>
    %c107 = arith.constant 107 : index
    %107 = memref.load %arg1[%c107] : memref<337xf32, #tpu.memory_space<smem>>
    %c108 = arith.constant 108 : index
    %108 = memref.load %arg1[%c108] : memref<337xf32, #tpu.memory_space<smem>>
    %c109 = arith.constant 109 : index
    %109 = memref.load %arg1[%c109] : memref<337xf32, #tpu.memory_space<smem>>
    %c110 = arith.constant 110 : index
    %110 = memref.load %arg1[%c110] : memref<337xf32, #tpu.memory_space<smem>>
    %c111 = arith.constant 111 : index
    %111 = memref.load %arg1[%c111] : memref<337xf32, #tpu.memory_space<smem>>
    %c112 = arith.constant 112 : index
    %112 = memref.load %arg1[%c112] : memref<337xf32, #tpu.memory_space<smem>>
    %c113 = arith.constant 113 : index
    %113 = memref.load %arg1[%c113] : memref<337xf32, #tpu.memory_space<smem>>
    %c114 = arith.constant 114 : index
    %114 = memref.load %arg1[%c114] : memref<337xf32, #tpu.memory_space<smem>>
    %c115 = arith.constant 115 : index
    %115 = memref.load %arg1[%c115] : memref<337xf32, #tpu.memory_space<smem>>
    %c116 = arith.constant 116 : index
    %116 = memref.load %arg1[%c116] : memref<337xf32, #tpu.memory_space<smem>>
    %c117 = arith.constant 117 : index
    %117 = memref.load %arg1[%c117] : memref<337xf32, #tpu.memory_space<smem>>
    %c118 = arith.constant 118 : index
    %118 = memref.load %arg1[%c118] : memref<337xf32, #tpu.memory_space<smem>>
    %c119 = arith.constant 119 : index
    %119 = memref.load %arg1[%c119] : memref<337xf32, #tpu.memory_space<smem>>
    %c120 = arith.constant 120 : index
    %120 = memref.load %arg1[%c120] : memref<337xf32, #tpu.memory_space<smem>>
    %c121 = arith.constant 121 : index
    %121 = memref.load %arg1[%c121] : memref<337xf32, #tpu.memory_space<smem>>
    %c122 = arith.constant 122 : index
    %122 = memref.load %arg1[%c122] : memref<337xf32, #tpu.memory_space<smem>>
    %c123 = arith.constant 123 : index
    %123 = memref.load %arg1[%c123] : memref<337xf32, #tpu.memory_space<smem>>
    %c124 = arith.constant 124 : index
    %124 = memref.load %arg1[%c124] : memref<337xf32, #tpu.memory_space<smem>>
    %c125 = arith.constant 125 : index
    %125 = memref.load %arg1[%c125] : memref<337xf32, #tpu.memory_space<smem>>
    %c126 = arith.constant 126 : index
    %126 = memref.load %arg1[%c126] : memref<337xf32, #tpu.memory_space<smem>>
    %c127 = arith.constant 127 : index
    %127 = memref.load %arg1[%c127] : memref<337xf32, #tpu.memory_space<smem>>
    %c128 = arith.constant 128 : index
    %128 = memref.load %arg1[%c128] : memref<337xf32, #tpu.memory_space<smem>>
    %c129 = arith.constant 129 : index
    %129 = memref.load %arg1[%c129] : memref<337xf32, #tpu.memory_space<smem>>
    %c130 = arith.constant 130 : index
    %130 = memref.load %arg1[%c130] : memref<337xf32, #tpu.memory_space<smem>>
    %c131 = arith.constant 131 : index
    %131 = memref.load %arg1[%c131] : memref<337xf32, #tpu.memory_space<smem>>
    %c132 = arith.constant 132 : index
    %132 = memref.load %arg1[%c132] : memref<337xf32, #tpu.memory_space<smem>>
    %c133 = arith.constant 133 : index
    %133 = memref.load %arg1[%c133] : memref<337xf32, #tpu.memory_space<smem>>
    %c134 = arith.constant 134 : index
    %134 = memref.load %arg1[%c134] : memref<337xf32, #tpu.memory_space<smem>>
    %c135 = arith.constant 135 : index
    %135 = memref.load %arg1[%c135] : memref<337xf32, #tpu.memory_space<smem>>
    %c136 = arith.constant 136 : index
    %136 = memref.load %arg1[%c136] : memref<337xf32, #tpu.memory_space<smem>>
    %c137 = arith.constant 137 : index
    %137 = memref.load %arg1[%c137] : memref<337xf32, #tpu.memory_space<smem>>
    %c138 = arith.constant 138 : index
    %138 = memref.load %arg1[%c138] : memref<337xf32, #tpu.memory_space<smem>>
    %c139 = arith.constant 139 : index
    %139 = memref.load %arg1[%c139] : memref<337xf32, #tpu.memory_space<smem>>
    %c140 = arith.constant 140 : index
    %140 = memref.load %arg1[%c140] : memref<337xf32, #tpu.memory_space<smem>>
    %c141 = arith.constant 141 : index
    %141 = memref.load %arg1[%c141] : memref<337xf32, #tpu.memory_space<smem>>
    %c142 = arith.constant 142 : index
    %142 = memref.load %arg1[%c142] : memref<337xf32, #tpu.memory_space<smem>>
    %c143 = arith.constant 143 : index
    %143 = memref.load %arg1[%c143] : memref<337xf32, #tpu.memory_space<smem>>
    %c144 = arith.constant 144 : index
    %144 = memref.load %arg1[%c144] : memref<337xf32, #tpu.memory_space<smem>>
    %c145 = arith.constant 145 : index
    %145 = memref.load %arg1[%c145] : memref<337xf32, #tpu.memory_space<smem>>
    %c146 = arith.constant 146 : index
    %146 = memref.load %arg1[%c146] : memref<337xf32, #tpu.memory_space<smem>>
    %c147 = arith.constant 147 : index
    %147 = memref.load %arg1[%c147] : memref<337xf32, #tpu.memory_space<smem>>
    %c148 = arith.constant 148 : index
    %148 = memref.load %arg1[%c148] : memref<337xf32, #tpu.memory_space<smem>>
    %c149 = arith.constant 149 : index
    %149 = memref.load %arg1[%c149] : memref<337xf32, #tpu.memory_space<smem>>
    %c150 = arith.constant 150 : index
    %150 = memref.load %arg1[%c150] : memref<337xf32, #tpu.memory_space<smem>>
    %c151 = arith.constant 151 : index
    %151 = memref.load %arg1[%c151] : memref<337xf32, #tpu.memory_space<smem>>
    %c152 = arith.constant 152 : index
    %152 = memref.load %arg1[%c152] : memref<337xf32, #tpu.memory_space<smem>>
    %c153 = arith.constant 153 : index
    %153 = memref.load %arg1[%c153] : memref<337xf32, #tpu.memory_space<smem>>
    %c154 = arith.constant 154 : index
    %154 = memref.load %arg1[%c154] : memref<337xf32, #tpu.memory_space<smem>>
    %c155 = arith.constant 155 : index
    %155 = memref.load %arg1[%c155] : memref<337xf32, #tpu.memory_space<smem>>
    %c156 = arith.constant 156 : index
    %156 = memref.load %arg1[%c156] : memref<337xf32, #tpu.memory_space<smem>>
    %c157 = arith.constant 157 : index
    %157 = memref.load %arg1[%c157] : memref<337xf32, #tpu.memory_space<smem>>
    %c158 = arith.constant 158 : index
    %158 = memref.load %arg1[%c158] : memref<337xf32, #tpu.memory_space<smem>>
    %c159 = arith.constant 159 : index
    %159 = memref.load %arg1[%c159] : memref<337xf32, #tpu.memory_space<smem>>
    %c160 = arith.constant 160 : index
    %160 = memref.load %arg1[%c160] : memref<337xf32, #tpu.memory_space<smem>>
    %c161 = arith.constant 161 : index
    %161 = memref.load %arg1[%c161] : memref<337xf32, #tpu.memory_space<smem>>
    %c162 = arith.constant 162 : index
    %162 = memref.load %arg1[%c162] : memref<337xf32, #tpu.memory_space<smem>>
    %c163 = arith.constant 163 : index
    %163 = memref.load %arg1[%c163] : memref<337xf32, #tpu.memory_space<smem>>
    %c164 = arith.constant 164 : index
    %164 = memref.load %arg1[%c164] : memref<337xf32, #tpu.memory_space<smem>>
    %c165 = arith.constant 165 : index
    %165 = memref.load %arg1[%c165] : memref<337xf32, #tpu.memory_space<smem>>
    %c166 = arith.constant 166 : index
    %166 = memref.load %arg1[%c166] : memref<337xf32, #tpu.memory_space<smem>>
    %c167 = arith.constant 167 : index
    %167 = memref.load %arg1[%c167] : memref<337xf32, #tpu.memory_space<smem>>
    %c168 = arith.constant 168 : index
    %168 = memref.load %arg1[%c168] : memref<337xf32, #tpu.memory_space<smem>>
    %c169 = arith.constant 169 : index
    %169 = memref.load %arg1[%c169] : memref<337xf32, #tpu.memory_space<smem>>
    %c170 = arith.constant 170 : index
    %170 = memref.load %arg1[%c170] : memref<337xf32, #tpu.memory_space<smem>>
    %c171 = arith.constant 171 : index
    %171 = memref.load %arg1[%c171] : memref<337xf32, #tpu.memory_space<smem>>
    %c172 = arith.constant 172 : index
    %172 = memref.load %arg1[%c172] : memref<337xf32, #tpu.memory_space<smem>>
    %c173 = arith.constant 173 : index
    %173 = memref.load %arg1[%c173] : memref<337xf32, #tpu.memory_space<smem>>
    %c174 = arith.constant 174 : index
    %174 = memref.load %arg1[%c174] : memref<337xf32, #tpu.memory_space<smem>>
    %c175 = arith.constant 175 : index
    %175 = memref.load %arg1[%c175] : memref<337xf32, #tpu.memory_space<smem>>
    %c176 = arith.constant 176 : index
    %176 = memref.load %arg1[%c176] : memref<337xf32, #tpu.memory_space<smem>>
    %c177 = arith.constant 177 : index
    %177 = memref.load %arg1[%c177] : memref<337xf32, #tpu.memory_space<smem>>
    %c178 = arith.constant 178 : index
    %178 = memref.load %arg1[%c178] : memref<337xf32, #tpu.memory_space<smem>>
    %c179 = arith.constant 179 : index
    %179 = memref.load %arg1[%c179] : memref<337xf32, #tpu.memory_space<smem>>
    %c180 = arith.constant 180 : index
    %180 = memref.load %arg1[%c180] : memref<337xf32, #tpu.memory_space<smem>>
    %c181 = arith.constant 181 : index
    %181 = memref.load %arg1[%c181] : memref<337xf32, #tpu.memory_space<smem>>
    %c182 = arith.constant 182 : index
    %182 = memref.load %arg1[%c182] : memref<337xf32, #tpu.memory_space<smem>>
    %c183 = arith.constant 183 : index
    %183 = memref.load %arg1[%c183] : memref<337xf32, #tpu.memory_space<smem>>
    %c184 = arith.constant 184 : index
    %184 = memref.load %arg1[%c184] : memref<337xf32, #tpu.memory_space<smem>>
    %c185 = arith.constant 185 : index
    %185 = memref.load %arg1[%c185] : memref<337xf32, #tpu.memory_space<smem>>
    %c186 = arith.constant 186 : index
    %186 = memref.load %arg1[%c186] : memref<337xf32, #tpu.memory_space<smem>>
    %c187 = arith.constant 187 : index
    %187 = memref.load %arg1[%c187] : memref<337xf32, #tpu.memory_space<smem>>
    %c188 = arith.constant 188 : index
    %188 = memref.load %arg1[%c188] : memref<337xf32, #tpu.memory_space<smem>>
    %c189 = arith.constant 189 : index
    %189 = memref.load %arg1[%c189] : memref<337xf32, #tpu.memory_space<smem>>
    %c190 = arith.constant 190 : index
    %190 = memref.load %arg1[%c190] : memref<337xf32, #tpu.memory_space<smem>>
    %c191 = arith.constant 191 : index
    %191 = memref.load %arg1[%c191] : memref<337xf32, #tpu.memory_space<smem>>
    %c192 = arith.constant 192 : index
    %192 = memref.load %arg1[%c192] : memref<337xf32, #tpu.memory_space<smem>>
    %c193 = arith.constant 193 : index
    %193 = memref.load %arg1[%c193] : memref<337xf32, #tpu.memory_space<smem>>
    %c194 = arith.constant 194 : index
    %194 = memref.load %arg1[%c194] : memref<337xf32, #tpu.memory_space<smem>>
    %c195 = arith.constant 195 : index
    %195 = memref.load %arg1[%c195] : memref<337xf32, #tpu.memory_space<smem>>
    %c196 = arith.constant 196 : index
    %196 = memref.load %arg1[%c196] : memref<337xf32, #tpu.memory_space<smem>>
    %c197 = arith.constant 197 : index
    %197 = memref.load %arg1[%c197] : memref<337xf32, #tpu.memory_space<smem>>
    %c198 = arith.constant 198 : index
    %198 = memref.load %arg1[%c198] : memref<337xf32, #tpu.memory_space<smem>>
    %c199 = arith.constant 199 : index
    %199 = memref.load %arg1[%c199] : memref<337xf32, #tpu.memory_space<smem>>
    %c200 = arith.constant 200 : index
    %200 = memref.load %arg1[%c200] : memref<337xf32, #tpu.memory_space<smem>>
    %c201 = arith.constant 201 : index
    %201 = memref.load %arg1[%c201] : memref<337xf32, #tpu.memory_space<smem>>
    %c202 = arith.constant 202 : index
    %202 = memref.load %arg1[%c202] : memref<337xf32, #tpu.memory_space<smem>>
    %c203 = arith.constant 203 : index
    %203 = memref.load %arg1[%c203] : memref<337xf32, #tpu.memory_space<smem>>
    %c204 = arith.constant 204 : index
    %204 = memref.load %arg1[%c204] : memref<337xf32, #tpu.memory_space<smem>>
    %c205 = arith.constant 205 : index
    %205 = memref.load %arg1[%c205] : memref<337xf32, #tpu.memory_space<smem>>
    %c206 = arith.constant 206 : index
    %206 = memref.load %arg1[%c206] : memref<337xf32, #tpu.memory_space<smem>>
    %c207 = arith.constant 207 : index
    %207 = memref.load %arg1[%c207] : memref<337xf32, #tpu.memory_space<smem>>
    %c208 = arith.constant 208 : index
    %208 = memref.load %arg1[%c208] : memref<337xf32, #tpu.memory_space<smem>>
    %c209 = arith.constant 209 : index
    %209 = memref.load %arg1[%c209] : memref<337xf32, #tpu.memory_space<smem>>
    %c210 = arith.constant 210 : index
    %210 = memref.load %arg1[%c210] : memref<337xf32, #tpu.memory_space<smem>>
    %c211 = arith.constant 211 : index
    %211 = memref.load %arg1[%c211] : memref<337xf32, #tpu.memory_space<smem>>
    %c212 = arith.constant 212 : index
    %212 = memref.load %arg1[%c212] : memref<337xf32, #tpu.memory_space<smem>>
    %c213 = arith.constant 213 : index
    %213 = memref.load %arg1[%c213] : memref<337xf32, #tpu.memory_space<smem>>
    %c214 = arith.constant 214 : index
    %214 = memref.load %arg1[%c214] : memref<337xf32, #tpu.memory_space<smem>>
    %c215 = arith.constant 215 : index
    %215 = memref.load %arg1[%c215] : memref<337xf32, #tpu.memory_space<smem>>
    %c216 = arith.constant 216 : index
    %216 = memref.load %arg1[%c216] : memref<337xf32, #tpu.memory_space<smem>>
    %c217 = arith.constant 217 : index
    %217 = memref.load %arg1[%c217] : memref<337xf32, #tpu.memory_space<smem>>
    %c218 = arith.constant 218 : index
    %218 = memref.load %arg1[%c218] : memref<337xf32, #tpu.memory_space<smem>>
    %c219 = arith.constant 219 : index
    %219 = memref.load %arg1[%c219] : memref<337xf32, #tpu.memory_space<smem>>
    %c220 = arith.constant 220 : index
    %220 = memref.load %arg1[%c220] : memref<337xf32, #tpu.memory_space<smem>>
    %c221 = arith.constant 221 : index
    %221 = memref.load %arg1[%c221] : memref<337xf32, #tpu.memory_space<smem>>
    %c222 = arith.constant 222 : index
    %222 = memref.load %arg1[%c222] : memref<337xf32, #tpu.memory_space<smem>>
    %c223 = arith.constant 223 : index
    %223 = memref.load %arg1[%c223] : memref<337xf32, #tpu.memory_space<smem>>
    %c224 = arith.constant 224 : index
    %224 = memref.load %arg1[%c224] : memref<337xf32, #tpu.memory_space<smem>>
    %c225 = arith.constant 225 : index
    %225 = memref.load %arg1[%c225] : memref<337xf32, #tpu.memory_space<smem>>
    %c226 = arith.constant 226 : index
    %226 = memref.load %arg1[%c226] : memref<337xf32, #tpu.memory_space<smem>>
    %c227 = arith.constant 227 : index
    %227 = memref.load %arg1[%c227] : memref<337xf32, #tpu.memory_space<smem>>
    %c228 = arith.constant 228 : index
    %228 = memref.load %arg1[%c228] : memref<337xf32, #tpu.memory_space<smem>>
    %c229 = arith.constant 229 : index
    %229 = memref.load %arg1[%c229] : memref<337xf32, #tpu.memory_space<smem>>
    %c230 = arith.constant 230 : index
    %230 = memref.load %arg1[%c230] : memref<337xf32, #tpu.memory_space<smem>>
    %c231 = arith.constant 231 : index
    %231 = memref.load %arg1[%c231] : memref<337xf32, #tpu.memory_space<smem>>
    %c232 = arith.constant 232 : index
    %232 = memref.load %arg1[%c232] : memref<337xf32, #tpu.memory_space<smem>>
    %c233 = arith.constant 233 : index
    %233 = memref.load %arg1[%c233] : memref<337xf32, #tpu.memory_space<smem>>
    %c234 = arith.constant 234 : index
    %234 = memref.load %arg1[%c234] : memref<337xf32, #tpu.memory_space<smem>>
    %c235 = arith.constant 235 : index
    %235 = memref.load %arg1[%c235] : memref<337xf32, #tpu.memory_space<smem>>
    %c236 = arith.constant 236 : index
    %236 = memref.load %arg1[%c236] : memref<337xf32, #tpu.memory_space<smem>>
    %c237 = arith.constant 237 : index
    %237 = memref.load %arg1[%c237] : memref<337xf32, #tpu.memory_space<smem>>
    %c238 = arith.constant 238 : index
    %238 = memref.load %arg1[%c238] : memref<337xf32, #tpu.memory_space<smem>>
    %c239 = arith.constant 239 : index
    %239 = memref.load %arg1[%c239] : memref<337xf32, #tpu.memory_space<smem>>
    %c240 = arith.constant 240 : index
    %240 = memref.load %arg1[%c240] : memref<337xf32, #tpu.memory_space<smem>>
    %c241 = arith.constant 241 : index
    %241 = memref.load %arg1[%c241] : memref<337xf32, #tpu.memory_space<smem>>
    %c242 = arith.constant 242 : index
    %242 = memref.load %arg1[%c242] : memref<337xf32, #tpu.memory_space<smem>>
    %c243 = arith.constant 243 : index
    %243 = memref.load %arg1[%c243] : memref<337xf32, #tpu.memory_space<smem>>
    %c244 = arith.constant 244 : index
    %244 = memref.load %arg1[%c244] : memref<337xf32, #tpu.memory_space<smem>>
    %c245 = arith.constant 245 : index
    %245 = memref.load %arg1[%c245] : memref<337xf32, #tpu.memory_space<smem>>
    %c246 = arith.constant 246 : index
    %246 = memref.load %arg1[%c246] : memref<337xf32, #tpu.memory_space<smem>>
    %c247 = arith.constant 247 : index
    %247 = memref.load %arg1[%c247] : memref<337xf32, #tpu.memory_space<smem>>
    %c248 = arith.constant 248 : index
    %248 = memref.load %arg1[%c248] : memref<337xf32, #tpu.memory_space<smem>>
    %c249 = arith.constant 249 : index
    %249 = memref.load %arg1[%c249] : memref<337xf32, #tpu.memory_space<smem>>
    %c250 = arith.constant 250 : index
    %250 = memref.load %arg1[%c250] : memref<337xf32, #tpu.memory_space<smem>>
    %c251 = arith.constant 251 : index
    %251 = memref.load %arg1[%c251] : memref<337xf32, #tpu.memory_space<smem>>
    %c252 = arith.constant 252 : index
    %252 = memref.load %arg1[%c252] : memref<337xf32, #tpu.memory_space<smem>>
    %c253 = arith.constant 253 : index
    %253 = memref.load %arg1[%c253] : memref<337xf32, #tpu.memory_space<smem>>
    %c254 = arith.constant 254 : index
    %254 = memref.load %arg1[%c254] : memref<337xf32, #tpu.memory_space<smem>>
    %c255 = arith.constant 255 : index
    %255 = memref.load %arg1[%c255] : memref<337xf32, #tpu.memory_space<smem>>
    %c256 = arith.constant 256 : index
    %256 = memref.load %arg1[%c256] : memref<337xf32, #tpu.memory_space<smem>>
    %c257 = arith.constant 257 : index
    %257 = memref.load %arg1[%c257] : memref<337xf32, #tpu.memory_space<smem>>
    %c258 = arith.constant 258 : index
    %258 = memref.load %arg1[%c258] : memref<337xf32, #tpu.memory_space<smem>>
    %c259 = arith.constant 259 : index
    %259 = memref.load %arg1[%c259] : memref<337xf32, #tpu.memory_space<smem>>
    %c260 = arith.constant 260 : index
    %260 = memref.load %arg1[%c260] : memref<337xf32, #tpu.memory_space<smem>>
    %c261 = arith.constant 261 : index
    %261 = memref.load %arg1[%c261] : memref<337xf32, #tpu.memory_space<smem>>
    %c262 = arith.constant 262 : index
    %262 = memref.load %arg1[%c262] : memref<337xf32, #tpu.memory_space<smem>>
    %c263 = arith.constant 263 : index
    %263 = memref.load %arg1[%c263] : memref<337xf32, #tpu.memory_space<smem>>
    %c264 = arith.constant 264 : index
    %264 = memref.load %arg1[%c264] : memref<337xf32, #tpu.memory_space<smem>>
    %c265 = arith.constant 265 : index
    %265 = memref.load %arg1[%c265] : memref<337xf32, #tpu.memory_space<smem>>
    %c266 = arith.constant 266 : index
    %266 = memref.load %arg1[%c266] : memref<337xf32, #tpu.memory_space<smem>>
    %c267 = arith.constant 267 : index
    %267 = memref.load %arg1[%c267] : memref<337xf32, #tpu.memory_space<smem>>
    %c268 = arith.constant 268 : index
    %268 = memref.load %arg1[%c268] : memref<337xf32, #tpu.memory_space<smem>>
    %c269 = arith.constant 269 : index
    %269 = memref.load %arg1[%c269] : memref<337xf32, #tpu.memory_space<smem>>
    %c270 = arith.constant 270 : index
    %270 = memref.load %arg1[%c270] : memref<337xf32, #tpu.memory_space<smem>>
    %c271 = arith.constant 271 : index
    %271 = memref.load %arg1[%c271] : memref<337xf32, #tpu.memory_space<smem>>
    %c272 = arith.constant 272 : index
    %272 = memref.load %arg1[%c272] : memref<337xf32, #tpu.memory_space<smem>>
    %c273 = arith.constant 273 : index
    %273 = memref.load %arg1[%c273] : memref<337xf32, #tpu.memory_space<smem>>
    %c274 = arith.constant 274 : index
    %274 = memref.load %arg1[%c274] : memref<337xf32, #tpu.memory_space<smem>>
    %c275 = arith.constant 275 : index
    %275 = memref.load %arg1[%c275] : memref<337xf32, #tpu.memory_space<smem>>
    %c276 = arith.constant 276 : index
    %276 = memref.load %arg1[%c276] : memref<337xf32, #tpu.memory_space<smem>>
    %c277 = arith.constant 277 : index
    %277 = memref.load %arg1[%c277] : memref<337xf32, #tpu.memory_space<smem>>
    %c278 = arith.constant 278 : index
    %278 = memref.load %arg1[%c278] : memref<337xf32, #tpu.memory_space<smem>>
    %c279 = arith.constant 279 : index
    %279 = memref.load %arg1[%c279] : memref<337xf32, #tpu.memory_space<smem>>
    %c280 = arith.constant 280 : index
    %280 = memref.load %arg1[%c280] : memref<337xf32, #tpu.memory_space<smem>>
    %c281 = arith.constant 281 : index
    %281 = memref.load %arg1[%c281] : memref<337xf32, #tpu.memory_space<smem>>
    %c282 = arith.constant 282 : index
    %282 = memref.load %arg1[%c282] : memref<337xf32, #tpu.memory_space<smem>>
    %c283 = arith.constant 283 : index
    %283 = memref.load %arg1[%c283] : memref<337xf32, #tpu.memory_space<smem>>
    %c284 = arith.constant 284 : index
    %284 = memref.load %arg1[%c284] : memref<337xf32, #tpu.memory_space<smem>>
    %c285 = arith.constant 285 : index
    %285 = memref.load %arg1[%c285] : memref<337xf32, #tpu.memory_space<smem>>
    %c286 = arith.constant 286 : index
    %286 = memref.load %arg1[%c286] : memref<337xf32, #tpu.memory_space<smem>>
    %c287 = arith.constant 287 : index
    %287 = memref.load %arg1[%c287] : memref<337xf32, #tpu.memory_space<smem>>
    %c288 = arith.constant 288 : index
    %288 = memref.load %arg1[%c288] : memref<337xf32, #tpu.memory_space<smem>>
    %c289 = arith.constant 289 : index
    %289 = memref.load %arg1[%c289] : memref<337xf32, #tpu.memory_space<smem>>
    %c290 = arith.constant 290 : index
    %290 = memref.load %arg1[%c290] : memref<337xf32, #tpu.memory_space<smem>>
    %c291 = arith.constant 291 : index
    %291 = memref.load %arg1[%c291] : memref<337xf32, #tpu.memory_space<smem>>
    %c292 = arith.constant 292 : index
    %292 = memref.load %arg1[%c292] : memref<337xf32, #tpu.memory_space<smem>>
    %c293 = arith.constant 293 : index
    %293 = memref.load %arg1[%c293] : memref<337xf32, #tpu.memory_space<smem>>
    %c294 = arith.constant 294 : index
    %294 = memref.load %arg1[%c294] : memref<337xf32, #tpu.memory_space<smem>>
    %c295 = arith.constant 295 : index
    %295 = memref.load %arg1[%c295] : memref<337xf32, #tpu.memory_space<smem>>
    %c296 = arith.constant 296 : index
    %296 = memref.load %arg1[%c296] : memref<337xf32, #tpu.memory_space<smem>>
    %c297 = arith.constant 297 : index
    %297 = memref.load %arg1[%c297] : memref<337xf32, #tpu.memory_space<smem>>
    %c298 = arith.constant 298 : index
    %298 = memref.load %arg1[%c298] : memref<337xf32, #tpu.memory_space<smem>>
    %c299 = arith.constant 299 : index
    %299 = memref.load %arg1[%c299] : memref<337xf32, #tpu.memory_space<smem>>
    %c300 = arith.constant 300 : index
    %300 = memref.load %arg1[%c300] : memref<337xf32, #tpu.memory_space<smem>>
    %c301 = arith.constant 301 : index
    %301 = memref.load %arg1[%c301] : memref<337xf32, #tpu.memory_space<smem>>
    %c302 = arith.constant 302 : index
    %302 = memref.load %arg1[%c302] : memref<337xf32, #tpu.memory_space<smem>>
    %c303 = arith.constant 303 : index
    %303 = memref.load %arg1[%c303] : memref<337xf32, #tpu.memory_space<smem>>
    %c304 = arith.constant 304 : index
    %304 = memref.load %arg1[%c304] : memref<337xf32, #tpu.memory_space<smem>>
    %c305 = arith.constant 305 : index
    %305 = memref.load %arg1[%c305] : memref<337xf32, #tpu.memory_space<smem>>
    %c306 = arith.constant 306 : index
    %306 = memref.load %arg1[%c306] : memref<337xf32, #tpu.memory_space<smem>>
    %c307 = arith.constant 307 : index
    %307 = memref.load %arg1[%c307] : memref<337xf32, #tpu.memory_space<smem>>
    %c308 = arith.constant 308 : index
    %308 = memref.load %arg1[%c308] : memref<337xf32, #tpu.memory_space<smem>>
    %c309 = arith.constant 309 : index
    %309 = memref.load %arg1[%c309] : memref<337xf32, #tpu.memory_space<smem>>
    %c310 = arith.constant 310 : index
    %310 = memref.load %arg1[%c310] : memref<337xf32, #tpu.memory_space<smem>>
    %c311 = arith.constant 311 : index
    %311 = memref.load %arg1[%c311] : memref<337xf32, #tpu.memory_space<smem>>
    %c312 = arith.constant 312 : index
    %312 = memref.load %arg1[%c312] : memref<337xf32, #tpu.memory_space<smem>>
    %c313 = arith.constant 313 : index
    %313 = memref.load %arg1[%c313] : memref<337xf32, #tpu.memory_space<smem>>
    %c314 = arith.constant 314 : index
    %314 = memref.load %arg1[%c314] : memref<337xf32, #tpu.memory_space<smem>>
    %c315 = arith.constant 315 : index
    %315 = memref.load %arg1[%c315] : memref<337xf32, #tpu.memory_space<smem>>
    %c316 = arith.constant 316 : index
    %316 = memref.load %arg1[%c316] : memref<337xf32, #tpu.memory_space<smem>>
    %c317 = arith.constant 317 : index
    %317 = memref.load %arg1[%c317] : memref<337xf32, #tpu.memory_space<smem>>
    %c318 = arith.constant 318 : index
    %318 = memref.load %arg1[%c318] : memref<337xf32, #tpu.memory_space<smem>>
    %c319 = arith.constant 319 : index
    %319 = memref.load %arg1[%c319] : memref<337xf32, #tpu.memory_space<smem>>
    %c320 = arith.constant 320 : index
    %320 = memref.load %arg1[%c320] : memref<337xf32, #tpu.memory_space<smem>>
    %c321 = arith.constant 321 : index
    %321 = memref.load %arg1[%c321] : memref<337xf32, #tpu.memory_space<smem>>
    %c322 = arith.constant 322 : index
    %322 = memref.load %arg1[%c322] : memref<337xf32, #tpu.memory_space<smem>>
    %c323 = arith.constant 323 : index
    %323 = memref.load %arg1[%c323] : memref<337xf32, #tpu.memory_space<smem>>
    %c324 = arith.constant 324 : index
    %324 = memref.load %arg1[%c324] : memref<337xf32, #tpu.memory_space<smem>>
    %c325 = arith.constant 325 : index
    %325 = memref.load %arg1[%c325] : memref<337xf32, #tpu.memory_space<smem>>
    %c326 = arith.constant 326 : index
    %326 = memref.load %arg1[%c326] : memref<337xf32, #tpu.memory_space<smem>>
    %c327 = arith.constant 327 : index
    %327 = memref.load %arg1[%c327] : memref<337xf32, #tpu.memory_space<smem>>
    %c328 = arith.constant 328 : index
    %328 = memref.load %arg1[%c328] : memref<337xf32, #tpu.memory_space<smem>>
    %c329 = arith.constant 329 : index
    %329 = memref.load %arg1[%c329] : memref<337xf32, #tpu.memory_space<smem>>
    %c330 = arith.constant 330 : index
    %330 = memref.load %arg1[%c330] : memref<337xf32, #tpu.memory_space<smem>>
    %c331 = arith.constant 331 : index
    %331 = memref.load %arg1[%c331] : memref<337xf32, #tpu.memory_space<smem>>
    %c332 = arith.constant 332 : index
    %332 = memref.load %arg1[%c332] : memref<337xf32, #tpu.memory_space<smem>>
    %c333 = arith.constant 333 : index
    %333 = memref.load %arg1[%c333] : memref<337xf32, #tpu.memory_space<smem>>
    %c334 = arith.constant 334 : index
    %334 = memref.load %arg1[%c334] : memref<337xf32, #tpu.memory_space<smem>>
    %c335 = arith.constant 335 : index
    %335 = memref.load %arg1[%c335] : memref<337xf32, #tpu.memory_space<smem>>
    %c336 = arith.constant 336 : index
    %336 = memref.load %arg1[%c336] : memref<337xf32, #tpu.memory_space<smem>>
    %c0_i32 = arith.constant 0 : i32
    %c1_i32 = arith.constant 1 : i32
    %337 = arith.muli %c0_i32, %c1_i32 : i32
    %c0_i32_0 = arith.constant 0 : i32
    %338 = arith.addi %c0_i32_0, %337 : i32
    %c8_i32 = arith.constant 8 : i32
    %339 = arith.muli %338, %c8_i32 : i32
    %340 = tpu.assume_multiple %339, 8 : i32
    %341 = arith.index_cast %340 : i32 to index
    %c0_1 = arith.constant 0 : index
    %342 = vector.load %arg2[%341, %c0_1] : memref<8x128xf32, #tpu.memory_space<vmem>>, vector<8x128xf32>
    %343 = vector.broadcast %320 : f32 to vector<8x128xf32>
    %344 = vector.broadcast %321 : f32 to vector<8x128xf32>
    %345 = vector.broadcast %322 : f32 to vector<8x128xf32>
    %346 = vector.broadcast %323 : f32 to vector<8x128xf32>
    %347 = vector.broadcast %324 : f32 to vector<8x128xf32>
    %348 = vector.broadcast %325 : f32 to vector<8x128xf32>
    %349 = vector.broadcast %326 : f32 to vector<8x128xf32>
    %350 = vector.broadcast %327 : f32 to vector<8x128xf32>
    %351 = vector.broadcast %0 : f32 to vector<8x128xf32>
    %352 = arith.mulf %351, %342 : vector<8x128xf32>
    %353 = vector.broadcast %32 : f32 to vector<8x128xf32>
    %354 = arith.addf %352, %353 : vector<8x128xf32>
    %cst = arith.constant 0.000000e+00 : f32
    %355 = vector.broadcast %cst : f32 to vector<8x128xf32>
    %356 = arith.maximumf %354, %355 : vector<8x128xf32>
    %357 = vector.broadcast %64 : f32 to vector<8x128xf32>
    %358 = arith.mulf %357, %356 : vector<8x128xf32>
    %359 = arith.addf %343, %358 : vector<8x128xf32>
    %360 = vector.broadcast %65 : f32 to vector<8x128xf32>
    %361 = arith.mulf %360, %356 : vector<8x128xf32>
    %362 = arith.addf %344, %361 : vector<8x128xf32>
    %363 = vector.broadcast %66 : f32 to vector<8x128xf32>
    %364 = arith.mulf %363, %356 : vector<8x128xf32>
    %365 = arith.addf %345, %364 : vector<8x128xf32>
    %366 = vector.broadcast %67 : f32 to vector<8x128xf32>
    %367 = arith.mulf %366, %356 : vector<8x128xf32>
    %368 = arith.addf %346, %367 : vector<8x128xf32>
    %369 = vector.broadcast %68 : f32 to vector<8x128xf32>
    %370 = arith.mulf %369, %356 : vector<8x128xf32>
    %371 = arith.addf %347, %370 : vector<8x128xf32>
    %372 = vector.broadcast %69 : f32 to vector<8x128xf32>
    %373 = arith.mulf %372, %356 : vector<8x128xf32>
    %374 = arith.addf %348, %373 : vector<8x128xf32>
    %375 = vector.broadcast %70 : f32 to vector<8x128xf32>
    %376 = arith.mulf %375, %356 : vector<8x128xf32>
    %377 = arith.addf %349, %376 : vector<8x128xf32>
    %378 = vector.broadcast %71 : f32 to vector<8x128xf32>
    %379 = arith.mulf %378, %356 : vector<8x128xf32>
    %380 = arith.addf %350, %379 : vector<8x128xf32>
    %381 = vector.broadcast %1 : f32 to vector<8x128xf32>
    %382 = arith.mulf %381, %342 : vector<8x128xf32>
    %383 = vector.broadcast %33 : f32 to vector<8x128xf32>
    %384 = arith.addf %382, %383 : vector<8x128xf32>
    %cst_2 = arith.constant 0.000000e+00 : f32
    %385 = vector.broadcast %cst_2 : f32 to vector<8x128xf32>
    %386 = arith.maximumf %384, %385 : vector<8x128xf32>
    %387 = vector.broadcast %72 : f32 to vector<8x128xf32>
    %388 = arith.mulf %387, %386 : vector<8x128xf32>
    %389 = arith.addf %359, %388 : vector<8x128xf32>
    %390 = vector.broadcast %73 : f32 to vector<8x128xf32>
    %391 = arith.mulf %390, %386 : vector<8x128xf32>
    %392 = arith.addf %362, %391 : vector<8x128xf32>
    %393 = vector.broadcast %74 : f32 to vector<8x128xf32>
    %394 = arith.mulf %393, %386 : vector<8x128xf32>
    %395 = arith.addf %365, %394 : vector<8x128xf32>
    %396 = vector.broadcast %75 : f32 to vector<8x128xf32>
    %397 = arith.mulf %396, %386 : vector<8x128xf32>
    %398 = arith.addf %368, %397 : vector<8x128xf32>
    %399 = vector.broadcast %76 : f32 to vector<8x128xf32>
    %400 = arith.mulf %399, %386 : vector<8x128xf32>
    %401 = arith.addf %371, %400 : vector<8x128xf32>
    %402 = vector.broadcast %77 : f32 to vector<8x128xf32>
    %403 = arith.mulf %402, %386 : vector<8x128xf32>
    %404 = arith.addf %374, %403 : vector<8x128xf32>
    %405 = vector.broadcast %78 : f32 to vector<8x128xf32>
    %406 = arith.mulf %405, %386 : vector<8x128xf32>
    %407 = arith.addf %377, %406 : vector<8x128xf32>
    %408 = vector.broadcast %79 : f32 to vector<8x128xf32>
    %409 = arith.mulf %408, %386 : vector<8x128xf32>
    %410 = arith.addf %380, %409 : vector<8x128xf32>
    %411 = vector.broadcast %2 : f32 to vector<8x128xf32>
    %412 = arith.mulf %411, %342 : vector<8x128xf32>
    %413 = vector.broadcast %34 : f32 to vector<8x128xf32>
    %414 = arith.addf %412, %413 : vector<8x128xf32>
    %cst_3 = arith.constant 0.000000e+00 : f32
    %415 = vector.broadcast %cst_3 : f32 to vector<8x128xf32>
    %416 = arith.maximumf %414, %415 : vector<8x128xf32>
    %417 = vector.broadcast %80 : f32 to vector<8x128xf32>
    %418 = arith.mulf %417, %416 : vector<8x128xf32>
    %419 = arith.addf %389, %418 : vector<8x128xf32>
    %420 = vector.broadcast %81 : f32 to vector<8x128xf32>
    %421 = arith.mulf %420, %416 : vector<8x128xf32>
    %422 = arith.addf %392, %421 : vector<8x128xf32>
    %423 = vector.broadcast %82 : f32 to vector<8x128xf32>
    %424 = arith.mulf %423, %416 : vector<8x128xf32>
    %425 = arith.addf %395, %424 : vector<8x128xf32>
    %426 = vector.broadcast %83 : f32 to vector<8x128xf32>
    %427 = arith.mulf %426, %416 : vector<8x128xf32>
    %428 = arith.addf %398, %427 : vector<8x128xf32>
    %429 = vector.broadcast %84 : f32 to vector<8x128xf32>
    %430 = arith.mulf %429, %416 : vector<8x128xf32>
    %431 = arith.addf %401, %430 : vector<8x128xf32>
    %432 = vector.broadcast %85 : f32 to vector<8x128xf32>
    %433 = arith.mulf %432, %416 : vector<8x128xf32>
    %434 = arith.addf %404, %433 : vector<8x128xf32>
    %435 = vector.broadcast %86 : f32 to vector<8x128xf32>
    %436 = arith.mulf %435, %416 : vector<8x128xf32>
    %437 = arith.addf %407, %436 : vector<8x128xf32>
    %438 = vector.broadcast %87 : f32 to vector<8x128xf32>
    %439 = arith.mulf %438, %416 : vector<8x128xf32>
    %440 = arith.addf %410, %439 : vector<8x128xf32>
    %441 = vector.broadcast %3 : f32 to vector<8x128xf32>
    %442 = arith.mulf %441, %342 : vector<8x128xf32>
    %443 = vector.broadcast %35 : f32 to vector<8x128xf32>
    %444 = arith.addf %442, %443 : vector<8x128xf32>
    %cst_4 = arith.constant 0.000000e+00 : f32
    %445 = vector.broadcast %cst_4 : f32 to vector<8x128xf32>
    %446 = arith.maximumf %444, %445 : vector<8x128xf32>
    %447 = vector.broadcast %88 : f32 to vector<8x128xf32>
    %448 = arith.mulf %447, %446 : vector<8x128xf32>
    %449 = arith.addf %419, %448 : vector<8x128xf32>
    %450 = vector.broadcast %89 : f32 to vector<8x128xf32>
    %451 = arith.mulf %450, %446 : vector<8x128xf32>
    %452 = arith.addf %422, %451 : vector<8x128xf32>
    %453 = vector.broadcast %90 : f32 to vector<8x128xf32>
    %454 = arith.mulf %453, %446 : vector<8x128xf32>
    %455 = arith.addf %425, %454 : vector<8x128xf32>
    %456 = vector.broadcast %91 : f32 to vector<8x128xf32>
    %457 = arith.mulf %456, %446 : vector<8x128xf32>
    %458 = arith.addf %428, %457 : vector<8x128xf32>
    %459 = vector.broadcast %92 : f32 to vector<8x128xf32>
    %460 = arith.mulf %459, %446 : vector<8x128xf32>
    %461 = arith.addf %431, %460 : vector<8x128xf32>
    %462 = vector.broadcast %93 : f32 to vector<8x128xf32>
    %463 = arith.mulf %462, %446 : vector<8x128xf32>
    %464 = arith.addf %434, %463 : vector<8x128xf32>
    %465 = vector.broadcast %94 : f32 to vector<8x128xf32>
    %466 = arith.mulf %465, %446 : vector<8x128xf32>
    %467 = arith.addf %437, %466 : vector<8x128xf32>
    %468 = vector.broadcast %95 : f32 to vector<8x128xf32>
    %469 = arith.mulf %468, %446 : vector<8x128xf32>
    %470 = arith.addf %440, %469 : vector<8x128xf32>
    %471 = vector.broadcast %4 : f32 to vector<8x128xf32>
    %472 = arith.mulf %471, %342 : vector<8x128xf32>
    %473 = vector.broadcast %36 : f32 to vector<8x128xf32>
    %474 = arith.addf %472, %473 : vector<8x128xf32>
    %cst_5 = arith.constant 0.000000e+00 : f32
    %475 = vector.broadcast %cst_5 : f32 to vector<8x128xf32>
    %476 = arith.maximumf %474, %475 : vector<8x128xf32>
    %477 = vector.broadcast %96 : f32 to vector<8x128xf32>
    %478 = arith.mulf %477, %476 : vector<8x128xf32>
    %479 = arith.addf %449, %478 : vector<8x128xf32>
    %480 = vector.broadcast %97 : f32 to vector<8x128xf32>
    %481 = arith.mulf %480, %476 : vector<8x128xf32>
    %482 = arith.addf %452, %481 : vector<8x128xf32>
    %483 = vector.broadcast %98 : f32 to vector<8x128xf32>
    %484 = arith.mulf %483, %476 : vector<8x128xf32>
    %485 = arith.addf %455, %484 : vector<8x128xf32>
    %486 = vector.broadcast %99 : f32 to vector<8x128xf32>
    %487 = arith.mulf %486, %476 : vector<8x128xf32>
    %488 = arith.addf %458, %487 : vector<8x128xf32>
    %489 = vector.broadcast %100 : f32 to vector<8x128xf32>
    %490 = arith.mulf %489, %476 : vector<8x128xf32>
    %491 = arith.addf %461, %490 : vector<8x128xf32>
    %492 = vector.broadcast %101 : f32 to vector<8x128xf32>
    %493 = arith.mulf %492, %476 : vector<8x128xf32>
    %494 = arith.addf %464, %493 : vector<8x128xf32>
    %495 = vector.broadcast %102 : f32 to vector<8x128xf32>
    %496 = arith.mulf %495, %476 : vector<8x128xf32>
    %497 = arith.addf %467, %496 : vector<8x128xf32>
    %498 = vector.broadcast %103 : f32 to vector<8x128xf32>
    %499 = arith.mulf %498, %476 : vector<8x128xf32>
    %500 = arith.addf %470, %499 : vector<8x128xf32>
    %501 = vector.broadcast %5 : f32 to vector<8x128xf32>
    %502 = arith.mulf %501, %342 : vector<8x128xf32>
    %503 = vector.broadcast %37 : f32 to vector<8x128xf32>
    %504 = arith.addf %502, %503 : vector<8x128xf32>
    %cst_6 = arith.constant 0.000000e+00 : f32
    %505 = vector.broadcast %cst_6 : f32 to vector<8x128xf32>
    %506 = arith.maximumf %504, %505 : vector<8x128xf32>
    %507 = vector.broadcast %104 : f32 to vector<8x128xf32>
    %508 = arith.mulf %507, %506 : vector<8x128xf32>
    %509 = arith.addf %479, %508 : vector<8x128xf32>
    %510 = vector.broadcast %105 : f32 to vector<8x128xf32>
    %511 = arith.mulf %510, %506 : vector<8x128xf32>
    %512 = arith.addf %482, %511 : vector<8x128xf32>
    %513 = vector.broadcast %106 : f32 to vector<8x128xf32>
    %514 = arith.mulf %513, %506 : vector<8x128xf32>
    %515 = arith.addf %485, %514 : vector<8x128xf32>
    %516 = vector.broadcast %107 : f32 to vector<8x128xf32>
    %517 = arith.mulf %516, %506 : vector<8x128xf32>
    %518 = arith.addf %488, %517 : vector<8x128xf32>
    %519 = vector.broadcast %108 : f32 to vector<8x128xf32>
    %520 = arith.mulf %519, %506 : vector<8x128xf32>
    %521 = arith.addf %491, %520 : vector<8x128xf32>
    %522 = vector.broadcast %109 : f32 to vector<8x128xf32>
    %523 = arith.mulf %522, %506 : vector<8x128xf32>
    %524 = arith.addf %494, %523 : vector<8x128xf32>
    %525 = vector.broadcast %110 : f32 to vector<8x128xf32>
    %526 = arith.mulf %525, %506 : vector<8x128xf32>
    %527 = arith.addf %497, %526 : vector<8x128xf32>
    %528 = vector.broadcast %111 : f32 to vector<8x128xf32>
    %529 = arith.mulf %528, %506 : vector<8x128xf32>
    %530 = arith.addf %500, %529 : vector<8x128xf32>
    %531 = vector.broadcast %6 : f32 to vector<8x128xf32>
    %532 = arith.mulf %531, %342 : vector<8x128xf32>
    %533 = vector.broadcast %38 : f32 to vector<8x128xf32>
    %534 = arith.addf %532, %533 : vector<8x128xf32>
    %cst_7 = arith.constant 0.000000e+00 : f32
    %535 = vector.broadcast %cst_7 : f32 to vector<8x128xf32>
    %536 = arith.maximumf %534, %535 : vector<8x128xf32>
    %537 = vector.broadcast %112 : f32 to vector<8x128xf32>
    %538 = arith.mulf %537, %536 : vector<8x128xf32>
    %539 = arith.addf %509, %538 : vector<8x128xf32>
    %540 = vector.broadcast %113 : f32 to vector<8x128xf32>
    %541 = arith.mulf %540, %536 : vector<8x128xf32>
    %542 = arith.addf %512, %541 : vector<8x128xf32>
    %543 = vector.broadcast %114 : f32 to vector<8x128xf32>
    %544 = arith.mulf %543, %536 : vector<8x128xf32>
    %545 = arith.addf %515, %544 : vector<8x128xf32>
    %546 = vector.broadcast %115 : f32 to vector<8x128xf32>
    %547 = arith.mulf %546, %536 : vector<8x128xf32>
    %548 = arith.addf %518, %547 : vector<8x128xf32>
    %549 = vector.broadcast %116 : f32 to vector<8x128xf32>
    %550 = arith.mulf %549, %536 : vector<8x128xf32>
    %551 = arith.addf %521, %550 : vector<8x128xf32>
    %552 = vector.broadcast %117 : f32 to vector<8x128xf32>
    %553 = arith.mulf %552, %536 : vector<8x128xf32>
    %554 = arith.addf %524, %553 : vector<8x128xf32>
    %555 = vector.broadcast %118 : f32 to vector<8x128xf32>
    %556 = arith.mulf %555, %536 : vector<8x128xf32>
    %557 = arith.addf %527, %556 : vector<8x128xf32>
    %558 = vector.broadcast %119 : f32 to vector<8x128xf32>
    %559 = arith.mulf %558, %536 : vector<8x128xf32>
    %560 = arith.addf %530, %559 : vector<8x128xf32>
    %561 = vector.broadcast %7 : f32 to vector<8x128xf32>
    %562 = arith.mulf %561, %342 : vector<8x128xf32>
    %563 = vector.broadcast %39 : f32 to vector<8x128xf32>
    %564 = arith.addf %562, %563 : vector<8x128xf32>
    %cst_8 = arith.constant 0.000000e+00 : f32
    %565 = vector.broadcast %cst_8 : f32 to vector<8x128xf32>
    %566 = arith.maximumf %564, %565 : vector<8x128xf32>
    %567 = vector.broadcast %120 : f32 to vector<8x128xf32>
    %568 = arith.mulf %567, %566 : vector<8x128xf32>
    %569 = arith.addf %539, %568 : vector<8x128xf32>
    %570 = vector.broadcast %121 : f32 to vector<8x128xf32>
    %571 = arith.mulf %570, %566 : vector<8x128xf32>
    %572 = arith.addf %542, %571 : vector<8x128xf32>
    %573 = vector.broadcast %122 : f32 to vector<8x128xf32>
    %574 = arith.mulf %573, %566 : vector<8x128xf32>
    %575 = arith.addf %545, %574 : vector<8x128xf32>
    %576 = vector.broadcast %123 : f32 to vector<8x128xf32>
    %577 = arith.mulf %576, %566 : vector<8x128xf32>
    %578 = arith.addf %548, %577 : vector<8x128xf32>
    %579 = vector.broadcast %124 : f32 to vector<8x128xf32>
    %580 = arith.mulf %579, %566 : vector<8x128xf32>
    %581 = arith.addf %551, %580 : vector<8x128xf32>
    %582 = vector.broadcast %125 : f32 to vector<8x128xf32>
    %583 = arith.mulf %582, %566 : vector<8x128xf32>
    %584 = arith.addf %554, %583 : vector<8x128xf32>
    %585 = vector.broadcast %126 : f32 to vector<8x128xf32>
    %586 = arith.mulf %585, %566 : vector<8x128xf32>
    %587 = arith.addf %557, %586 : vector<8x128xf32>
    %588 = vector.broadcast %127 : f32 to vector<8x128xf32>
    %589 = arith.mulf %588, %566 : vector<8x128xf32>
    %590 = arith.addf %560, %589 : vector<8x128xf32>
    %591 = vector.broadcast %8 : f32 to vector<8x128xf32>
    %592 = arith.mulf %591, %342 : vector<8x128xf32>
    %593 = vector.broadcast %40 : f32 to vector<8x128xf32>
    %594 = arith.addf %592, %593 : vector<8x128xf32>
    %cst_9 = arith.constant 0.000000e+00 : f32
    %595 = vector.broadcast %cst_9 : f32 to vector<8x128xf32>
    %596 = arith.maximumf %594, %595 : vector<8x128xf32>
    %597 = vector.broadcast %128 : f32 to vector<8x128xf32>
    %598 = arith.mulf %597, %596 : vector<8x128xf32>
    %599 = arith.addf %569, %598 : vector<8x128xf32>
    %600 = vector.broadcast %129 : f32 to vector<8x128xf32>
    %601 = arith.mulf %600, %596 : vector<8x128xf32>
    %602 = arith.addf %572, %601 : vector<8x128xf32>
    %603 = vector.broadcast %130 : f32 to vector<8x128xf32>
    %604 = arith.mulf %603, %596 : vector<8x128xf32>
    %605 = arith.addf %575, %604 : vector<8x128xf32>
    %606 = vector.broadcast %131 : f32 to vector<8x128xf32>
    %607 = arith.mulf %606, %596 : vector<8x128xf32>
    %608 = arith.addf %578, %607 : vector<8x128xf32>
    %609 = vector.broadcast %132 : f32 to vector<8x128xf32>
    %610 = arith.mulf %609, %596 : vector<8x128xf32>
    %611 = arith.addf %581, %610 : vector<8x128xf32>
    %612 = vector.broadcast %133 : f32 to vector<8x128xf32>
    %613 = arith.mulf %612, %596 : vector<8x128xf32>
    %614 = arith.addf %584, %613 : vector<8x128xf32>
    %615 = vector.broadcast %134 : f32 to vector<8x128xf32>
    %616 = arith.mulf %615, %596 : vector<8x128xf32>
    %617 = arith.addf %587, %616 : vector<8x128xf32>
    %618 = vector.broadcast %135 : f32 to vector<8x128xf32>
    %619 = arith.mulf %618, %596 : vector<8x128xf32>
    %620 = arith.addf %590, %619 : vector<8x128xf32>
    %621 = vector.broadcast %9 : f32 to vector<8x128xf32>
    %622 = arith.mulf %621, %342 : vector<8x128xf32>
    %623 = vector.broadcast %41 : f32 to vector<8x128xf32>
    %624 = arith.addf %622, %623 : vector<8x128xf32>
    %cst_10 = arith.constant 0.000000e+00 : f32
    %625 = vector.broadcast %cst_10 : f32 to vector<8x128xf32>
    %626 = arith.maximumf %624, %625 : vector<8x128xf32>
    %627 = vector.broadcast %136 : f32 to vector<8x128xf32>
    %628 = arith.mulf %627, %626 : vector<8x128xf32>
    %629 = arith.addf %599, %628 : vector<8x128xf32>
    %630 = vector.broadcast %137 : f32 to vector<8x128xf32>
    %631 = arith.mulf %630, %626 : vector<8x128xf32>
    %632 = arith.addf %602, %631 : vector<8x128xf32>
    %633 = vector.broadcast %138 : f32 to vector<8x128xf32>
    %634 = arith.mulf %633, %626 : vector<8x128xf32>
    %635 = arith.addf %605, %634 : vector<8x128xf32>
    %636 = vector.broadcast %139 : f32 to vector<8x128xf32>
    %637 = arith.mulf %636, %626 : vector<8x128xf32>
    %638 = arith.addf %608, %637 : vector<8x128xf32>
    %639 = vector.broadcast %140 : f32 to vector<8x128xf32>
    %640 = arith.mulf %639, %626 : vector<8x128xf32>
    %641 = arith.addf %611, %640 : vector<8x128xf32>
    %642 = vector.broadcast %141 : f32 to vector<8x128xf32>
    %643 = arith.mulf %642, %626 : vector<8x128xf32>
    %644 = arith.addf %614, %643 : vector<8x128xf32>
    %645 = vector.broadcast %142 : f32 to vector<8x128xf32>
    %646 = arith.mulf %645, %626 : vector<8x128xf32>
    %647 = arith.addf %617, %646 : vector<8x128xf32>
    %648 = vector.broadcast %143 : f32 to vector<8x128xf32>
    %649 = arith.mulf %648, %626 : vector<8x128xf32>
    %650 = arith.addf %620, %649 : vector<8x128xf32>
    %651 = vector.broadcast %10 : f32 to vector<8x128xf32>
    %652 = arith.mulf %651, %342 : vector<8x128xf32>
    %653 = vector.broadcast %42 : f32 to vector<8x128xf32>
    %654 = arith.addf %652, %653 : vector<8x128xf32>
    %cst_11 = arith.constant 0.000000e+00 : f32
    %655 = vector.broadcast %cst_11 : f32 to vector<8x128xf32>
    %656 = arith.maximumf %654, %655 : vector<8x128xf32>
    %657 = vector.broadcast %144 : f32 to vector<8x128xf32>
    %658 = arith.mulf %657, %656 : vector<8x128xf32>
    %659 = arith.addf %629, %658 : vector<8x128xf32>
    %660 = vector.broadcast %145 : f32 to vector<8x128xf32>
    %661 = arith.mulf %660, %656 : vector<8x128xf32>
    %662 = arith.addf %632, %661 : vector<8x128xf32>
    %663 = vector.broadcast %146 : f32 to vector<8x128xf32>
    %664 = arith.mulf %663, %656 : vector<8x128xf32>
    %665 = arith.addf %635, %664 : vector<8x128xf32>
    %666 = vector.broadcast %147 : f32 to vector<8x128xf32>
    %667 = arith.mulf %666, %656 : vector<8x128xf32>
    %668 = arith.addf %638, %667 : vector<8x128xf32>
    %669 = vector.broadcast %148 : f32 to vector<8x128xf32>
    %670 = arith.mulf %669, %656 : vector<8x128xf32>
    %671 = arith.addf %641, %670 : vector<8x128xf32>
    %672 = vector.broadcast %149 : f32 to vector<8x128xf32>
    %673 = arith.mulf %672, %656 : vector<8x128xf32>
    %674 = arith.addf %644, %673 : vector<8x128xf32>
    %675 = vector.broadcast %150 : f32 to vector<8x128xf32>
    %676 = arith.mulf %675, %656 : vector<8x128xf32>
    %677 = arith.addf %647, %676 : vector<8x128xf32>
    %678 = vector.broadcast %151 : f32 to vector<8x128xf32>
    %679 = arith.mulf %678, %656 : vector<8x128xf32>
    %680 = arith.addf %650, %679 : vector<8x128xf32>
    %681 = vector.broadcast %11 : f32 to vector<8x128xf32>
    %682 = arith.mulf %681, %342 : vector<8x128xf32>
    %683 = vector.broadcast %43 : f32 to vector<8x128xf32>
    %684 = arith.addf %682, %683 : vector<8x128xf32>
    %cst_12 = arith.constant 0.000000e+00 : f32
    %685 = vector.broadcast %cst_12 : f32 to vector<8x128xf32>
    %686 = arith.maximumf %684, %685 : vector<8x128xf32>
    %687 = vector.broadcast %152 : f32 to vector<8x128xf32>
    %688 = arith.mulf %687, %686 : vector<8x128xf32>
    %689 = arith.addf %659, %688 : vector<8x128xf32>
    %690 = vector.broadcast %153 : f32 to vector<8x128xf32>
    %691 = arith.mulf %690, %686 : vector<8x128xf32>
    %692 = arith.addf %662, %691 : vector<8x128xf32>
    %693 = vector.broadcast %154 : f32 to vector<8x128xf32>
    %694 = arith.mulf %693, %686 : vector<8x128xf32>
    %695 = arith.addf %665, %694 : vector<8x128xf32>
    %696 = vector.broadcast %155 : f32 to vector<8x128xf32>
    %697 = arith.mulf %696, %686 : vector<8x128xf32>
    %698 = arith.addf %668, %697 : vector<8x128xf32>
    %699 = vector.broadcast %156 : f32 to vector<8x128xf32>
    %700 = arith.mulf %699, %686 : vector<8x128xf32>
    %701 = arith.addf %671, %700 : vector<8x128xf32>
    %702 = vector.broadcast %157 : f32 to vector<8x128xf32>
    %703 = arith.mulf %702, %686 : vector<8x128xf32>
    %704 = arith.addf %674, %703 : vector<8x128xf32>
    %705 = vector.broadcast %158 : f32 to vector<8x128xf32>
    %706 = arith.mulf %705, %686 : vector<8x128xf32>
    %707 = arith.addf %677, %706 : vector<8x128xf32>
    %708 = vector.broadcast %159 : f32 to vector<8x128xf32>
    %709 = arith.mulf %708, %686 : vector<8x128xf32>
    %710 = arith.addf %680, %709 : vector<8x128xf32>
    %711 = vector.broadcast %12 : f32 to vector<8x128xf32>
    %712 = arith.mulf %711, %342 : vector<8x128xf32>
    %713 = vector.broadcast %44 : f32 to vector<8x128xf32>
    %714 = arith.addf %712, %713 : vector<8x128xf32>
    %cst_13 = arith.constant 0.000000e+00 : f32
    %715 = vector.broadcast %cst_13 : f32 to vector<8x128xf32>
    %716 = arith.maximumf %714, %715 : vector<8x128xf32>
    %717 = vector.broadcast %160 : f32 to vector<8x128xf32>
    %718 = arith.mulf %717, %716 : vector<8x128xf32>
    %719 = arith.addf %689, %718 : vector<8x128xf32>
    %720 = vector.broadcast %161 : f32 to vector<8x128xf32>
    %721 = arith.mulf %720, %716 : vector<8x128xf32>
    %722 = arith.addf %692, %721 : vector<8x128xf32>
    %723 = vector.broadcast %162 : f32 to vector<8x128xf32>
    %724 = arith.mulf %723, %716 : vector<8x128xf32>
    %725 = arith.addf %695, %724 : vector<8x128xf32>
    %726 = vector.broadcast %163 : f32 to vector<8x128xf32>
    %727 = arith.mulf %726, %716 : vector<8x128xf32>
    %728 = arith.addf %698, %727 : vector<8x128xf32>
    %729 = vector.broadcast %164 : f32 to vector<8x128xf32>
    %730 = arith.mulf %729, %716 : vector<8x128xf32>
    %731 = arith.addf %701, %730 : vector<8x128xf32>
    %732 = vector.broadcast %165 : f32 to vector<8x128xf32>
    %733 = arith.mulf %732, %716 : vector<8x128xf32>
    %734 = arith.addf %704, %733 : vector<8x128xf32>
    %735 = vector.broadcast %166 : f32 to vector<8x128xf32>
    %736 = arith.mulf %735, %716 : vector<8x128xf32>
    %737 = arith.addf %707, %736 : vector<8x128xf32>
    %738 = vector.broadcast %167 : f32 to vector<8x128xf32>
    %739 = arith.mulf %738, %716 : vector<8x128xf32>
    %740 = arith.addf %710, %739 : vector<8x128xf32>
    %741 = vector.broadcast %13 : f32 to vector<8x128xf32>
    %742 = arith.mulf %741, %342 : vector<8x128xf32>
    %743 = vector.broadcast %45 : f32 to vector<8x128xf32>
    %744 = arith.addf %742, %743 : vector<8x128xf32>
    %cst_14 = arith.constant 0.000000e+00 : f32
    %745 = vector.broadcast %cst_14 : f32 to vector<8x128xf32>
    %746 = arith.maximumf %744, %745 : vector<8x128xf32>
    %747 = vector.broadcast %168 : f32 to vector<8x128xf32>
    %748 = arith.mulf %747, %746 : vector<8x128xf32>
    %749 = arith.addf %719, %748 : vector<8x128xf32>
    %750 = vector.broadcast %169 : f32 to vector<8x128xf32>
    %751 = arith.mulf %750, %746 : vector<8x128xf32>
    %752 = arith.addf %722, %751 : vector<8x128xf32>
    %753 = vector.broadcast %170 : f32 to vector<8x128xf32>
    %754 = arith.mulf %753, %746 : vector<8x128xf32>
    %755 = arith.addf %725, %754 : vector<8x128xf32>
    %756 = vector.broadcast %171 : f32 to vector<8x128xf32>
    %757 = arith.mulf %756, %746 : vector<8x128xf32>
    %758 = arith.addf %728, %757 : vector<8x128xf32>
    %759 = vector.broadcast %172 : f32 to vector<8x128xf32>
    %760 = arith.mulf %759, %746 : vector<8x128xf32>
    %761 = arith.addf %731, %760 : vector<8x128xf32>
    %762 = vector.broadcast %173 : f32 to vector<8x128xf32>
    %763 = arith.mulf %762, %746 : vector<8x128xf32>
    %764 = arith.addf %734, %763 : vector<8x128xf32>
    %765 = vector.broadcast %174 : f32 to vector<8x128xf32>
    %766 = arith.mulf %765, %746 : vector<8x128xf32>
    %767 = arith.addf %737, %766 : vector<8x128xf32>
    %768 = vector.broadcast %175 : f32 to vector<8x128xf32>
    %769 = arith.mulf %768, %746 : vector<8x128xf32>
    %770 = arith.addf %740, %769 : vector<8x128xf32>
    %771 = vector.broadcast %14 : f32 to vector<8x128xf32>
    %772 = arith.mulf %771, %342 : vector<8x128xf32>
    %773 = vector.broadcast %46 : f32 to vector<8x128xf32>
    %774 = arith.addf %772, %773 : vector<8x128xf32>
    %cst_15 = arith.constant 0.000000e+00 : f32
    %775 = vector.broadcast %cst_15 : f32 to vector<8x128xf32>
    %776 = arith.maximumf %774, %775 : vector<8x128xf32>
    %777 = vector.broadcast %176 : f32 to vector<8x128xf32>
    %778 = arith.mulf %777, %776 : vector<8x128xf32>
    %779 = arith.addf %749, %778 : vector<8x128xf32>
    %780 = vector.broadcast %177 : f32 to vector<8x128xf32>
    %781 = arith.mulf %780, %776 : vector<8x128xf32>
    %782 = arith.addf %752, %781 : vector<8x128xf32>
    %783 = vector.broadcast %178 : f32 to vector<8x128xf32>
    %784 = arith.mulf %783, %776 : vector<8x128xf32>
    %785 = arith.addf %755, %784 : vector<8x128xf32>
    %786 = vector.broadcast %179 : f32 to vector<8x128xf32>
    %787 = arith.mulf %786, %776 : vector<8x128xf32>
    %788 = arith.addf %758, %787 : vector<8x128xf32>
    %789 = vector.broadcast %180 : f32 to vector<8x128xf32>
    %790 = arith.mulf %789, %776 : vector<8x128xf32>
    %791 = arith.addf %761, %790 : vector<8x128xf32>
    %792 = vector.broadcast %181 : f32 to vector<8x128xf32>
    %793 = arith.mulf %792, %776 : vector<8x128xf32>
    %794 = arith.addf %764, %793 : vector<8x128xf32>
    %795 = vector.broadcast %182 : f32 to vector<8x128xf32>
    %796 = arith.mulf %795, %776 : vector<8x128xf32>
    %797 = arith.addf %767, %796 : vector<8x128xf32>
    %798 = vector.broadcast %183 : f32 to vector<8x128xf32>
    %799 = arith.mulf %798, %776 : vector<8x128xf32>
    %800 = arith.addf %770, %799 : vector<8x128xf32>
    %801 = vector.broadcast %15 : f32 to vector<8x128xf32>
    %802 = arith.mulf %801, %342 : vector<8x128xf32>
    %803 = vector.broadcast %47 : f32 to vector<8x128xf32>
    %804 = arith.addf %802, %803 : vector<8x128xf32>
    %cst_16 = arith.constant 0.000000e+00 : f32
    %805 = vector.broadcast %cst_16 : f32 to vector<8x128xf32>
    %806 = arith.maximumf %804, %805 : vector<8x128xf32>
    %807 = vector.broadcast %184 : f32 to vector<8x128xf32>
    %808 = arith.mulf %807, %806 : vector<8x128xf32>
    %809 = arith.addf %779, %808 : vector<8x128xf32>
    %810 = vector.broadcast %185 : f32 to vector<8x128xf32>
    %811 = arith.mulf %810, %806 : vector<8x128xf32>
    %812 = arith.addf %782, %811 : vector<8x128xf32>
    %813 = vector.broadcast %186 : f32 to vector<8x128xf32>
    %814 = arith.mulf %813, %806 : vector<8x128xf32>
    %815 = arith.addf %785, %814 : vector<8x128xf32>
    %816 = vector.broadcast %187 : f32 to vector<8x128xf32>
    %817 = arith.mulf %816, %806 : vector<8x128xf32>
    %818 = arith.addf %788, %817 : vector<8x128xf32>
    %819 = vector.broadcast %188 : f32 to vector<8x128xf32>
    %820 = arith.mulf %819, %806 : vector<8x128xf32>
    %821 = arith.addf %791, %820 : vector<8x128xf32>
    %822 = vector.broadcast %189 : f32 to vector<8x128xf32>
    %823 = arith.mulf %822, %806 : vector<8x128xf32>
    %824 = arith.addf %794, %823 : vector<8x128xf32>
    %825 = vector.broadcast %190 : f32 to vector<8x128xf32>
    %826 = arith.mulf %825, %806 : vector<8x128xf32>
    %827 = arith.addf %797, %826 : vector<8x128xf32>
    %828 = vector.broadcast %191 : f32 to vector<8x128xf32>
    %829 = arith.mulf %828, %806 : vector<8x128xf32>
    %830 = arith.addf %800, %829 : vector<8x128xf32>
    %831 = vector.broadcast %16 : f32 to vector<8x128xf32>
    %832 = arith.mulf %831, %342 : vector<8x128xf32>
    %833 = vector.broadcast %48 : f32 to vector<8x128xf32>
    %834 = arith.addf %832, %833 : vector<8x128xf32>
    %cst_17 = arith.constant 0.000000e+00 : f32
    %835 = vector.broadcast %cst_17 : f32 to vector<8x128xf32>
    %836 = arith.maximumf %834, %835 : vector<8x128xf32>
    %837 = vector.broadcast %192 : f32 to vector<8x128xf32>
    %838 = arith.mulf %837, %836 : vector<8x128xf32>
    %839 = arith.addf %809, %838 : vector<8x128xf32>
    %840 = vector.broadcast %193 : f32 to vector<8x128xf32>
    %841 = arith.mulf %840, %836 : vector<8x128xf32>
    %842 = arith.addf %812, %841 : vector<8x128xf32>
    %843 = vector.broadcast %194 : f32 to vector<8x128xf32>
    %844 = arith.mulf %843, %836 : vector<8x128xf32>
    %845 = arith.addf %815, %844 : vector<8x128xf32>
    %846 = vector.broadcast %195 : f32 to vector<8x128xf32>
    %847 = arith.mulf %846, %836 : vector<8x128xf32>
    %848 = arith.addf %818, %847 : vector<8x128xf32>
    %849 = vector.broadcast %196 : f32 to vector<8x128xf32>
    %850 = arith.mulf %849, %836 : vector<8x128xf32>
    %851 = arith.addf %821, %850 : vector<8x128xf32>
    %852 = vector.broadcast %197 : f32 to vector<8x128xf32>
    %853 = arith.mulf %852, %836 : vector<8x128xf32>
    %854 = arith.addf %824, %853 : vector<8x128xf32>
    %855 = vector.broadcast %198 : f32 to vector<8x128xf32>
    %856 = arith.mulf %855, %836 : vector<8x128xf32>
    %857 = arith.addf %827, %856 : vector<8x128xf32>
    %858 = vector.broadcast %199 : f32 to vector<8x128xf32>
    %859 = arith.mulf %858, %836 : vector<8x128xf32>
    %860 = arith.addf %830, %859 : vector<8x128xf32>
    %861 = vector.broadcast %17 : f32 to vector<8x128xf32>
    %862 = arith.mulf %861, %342 : vector<8x128xf32>
    %863 = vector.broadcast %49 : f32 to vector<8x128xf32>
    %864 = arith.addf %862, %863 : vector<8x128xf32>
    %cst_18 = arith.constant 0.000000e+00 : f32
    %865 = vector.broadcast %cst_18 : f32 to vector<8x128xf32>
    %866 = arith.maximumf %864, %865 : vector<8x128xf32>
    %867 = vector.broadcast %200 : f32 to vector<8x128xf32>
    %868 = arith.mulf %867, %866 : vector<8x128xf32>
    %869 = arith.addf %839, %868 : vector<8x128xf32>
    %870 = vector.broadcast %201 : f32 to vector<8x128xf32>
    %871 = arith.mulf %870, %866 : vector<8x128xf32>
    %872 = arith.addf %842, %871 : vector<8x128xf32>
    %873 = vector.broadcast %202 : f32 to vector<8x128xf32>
    %874 = arith.mulf %873, %866 : vector<8x128xf32>
    %875 = arith.addf %845, %874 : vector<8x128xf32>
    %876 = vector.broadcast %203 : f32 to vector<8x128xf32>
    %877 = arith.mulf %876, %866 : vector<8x128xf32>
    %878 = arith.addf %848, %877 : vector<8x128xf32>
    %879 = vector.broadcast %204 : f32 to vector<8x128xf32>
    %880 = arith.mulf %879, %866 : vector<8x128xf32>
    %881 = arith.addf %851, %880 : vector<8x128xf32>
    %882 = vector.broadcast %205 : f32 to vector<8x128xf32>
    %883 = arith.mulf %882, %866 : vector<8x128xf32>
    %884 = arith.addf %854, %883 : vector<8x128xf32>
    %885 = vector.broadcast %206 : f32 to vector<8x128xf32>
    %886 = arith.mulf %885, %866 : vector<8x128xf32>
    %887 = arith.addf %857, %886 : vector<8x128xf32>
    %888 = vector.broadcast %207 : f32 to vector<8x128xf32>
    %889 = arith.mulf %888, %866 : vector<8x128xf32>
    %890 = arith.addf %860, %889 : vector<8x128xf32>
    %891 = vector.broadcast %18 : f32 to vector<8x128xf32>
    %892 = arith.mulf %891, %342 : vector<8x128xf32>
    %893 = vector.broadcast %50 : f32 to vector<8x128xf32>
    %894 = arith.addf %892, %893 : vector<8x128xf32>
    %cst_19 = arith.constant 0.000000e+00 : f32
    %895 = vector.broadcast %cst_19 : f32 to vector<8x128xf32>
    %896 = arith.maximumf %894, %895 : vector<8x128xf32>
    %897 = vector.broadcast %208 : f32 to vector<8x128xf32>
    %898 = arith.mulf %897, %896 : vector<8x128xf32>
    %899 = arith.addf %869, %898 : vector<8x128xf32>
    %900 = vector.broadcast %209 : f32 to vector<8x128xf32>
    %901 = arith.mulf %900, %896 : vector<8x128xf32>
    %902 = arith.addf %872, %901 : vector<8x128xf32>
    %903 = vector.broadcast %210 : f32 to vector<8x128xf32>
    %904 = arith.mulf %903, %896 : vector<8x128xf32>
    %905 = arith.addf %875, %904 : vector<8x128xf32>
    %906 = vector.broadcast %211 : f32 to vector<8x128xf32>
    %907 = arith.mulf %906, %896 : vector<8x128xf32>
    %908 = arith.addf %878, %907 : vector<8x128xf32>
    %909 = vector.broadcast %212 : f32 to vector<8x128xf32>
    %910 = arith.mulf %909, %896 : vector<8x128xf32>
    %911 = arith.addf %881, %910 : vector<8x128xf32>
    %912 = vector.broadcast %213 : f32 to vector<8x128xf32>
    %913 = arith.mulf %912, %896 : vector<8x128xf32>
    %914 = arith.addf %884, %913 : vector<8x128xf32>
    %915 = vector.broadcast %214 : f32 to vector<8x128xf32>
    %916 = arith.mulf %915, %896 : vector<8x128xf32>
    %917 = arith.addf %887, %916 : vector<8x128xf32>
    %918 = vector.broadcast %215 : f32 to vector<8x128xf32>
    %919 = arith.mulf %918, %896 : vector<8x128xf32>
    %920 = arith.addf %890, %919 : vector<8x128xf32>
    %921 = vector.broadcast %19 : f32 to vector<8x128xf32>
    %922 = arith.mulf %921, %342 : vector<8x128xf32>
    %923 = vector.broadcast %51 : f32 to vector<8x128xf32>
    %924 = arith.addf %922, %923 : vector<8x128xf32>
    %cst_20 = arith.constant 0.000000e+00 : f32
    %925 = vector.broadcast %cst_20 : f32 to vector<8x128xf32>
    %926 = arith.maximumf %924, %925 : vector<8x128xf32>
    %927 = vector.broadcast %216 : f32 to vector<8x128xf32>
    %928 = arith.mulf %927, %926 : vector<8x128xf32>
    %929 = arith.addf %899, %928 : vector<8x128xf32>
    %930 = vector.broadcast %217 : f32 to vector<8x128xf32>
    %931 = arith.mulf %930, %926 : vector<8x128xf32>
    %932 = arith.addf %902, %931 : vector<8x128xf32>
    %933 = vector.broadcast %218 : f32 to vector<8x128xf32>
    %934 = arith.mulf %933, %926 : vector<8x128xf32>
    %935 = arith.addf %905, %934 : vector<8x128xf32>
    %936 = vector.broadcast %219 : f32 to vector<8x128xf32>
    %937 = arith.mulf %936, %926 : vector<8x128xf32>
    %938 = arith.addf %908, %937 : vector<8x128xf32>
    %939 = vector.broadcast %220 : f32 to vector<8x128xf32>
    %940 = arith.mulf %939, %926 : vector<8x128xf32>
    %941 = arith.addf %911, %940 : vector<8x128xf32>
    %942 = vector.broadcast %221 : f32 to vector<8x128xf32>
    %943 = arith.mulf %942, %926 : vector<8x128xf32>
    %944 = arith.addf %914, %943 : vector<8x128xf32>
    %945 = vector.broadcast %222 : f32 to vector<8x128xf32>
    %946 = arith.mulf %945, %926 : vector<8x128xf32>
    %947 = arith.addf %917, %946 : vector<8x128xf32>
    %948 = vector.broadcast %223 : f32 to vector<8x128xf32>
    %949 = arith.mulf %948, %926 : vector<8x128xf32>
    %950 = arith.addf %920, %949 : vector<8x128xf32>
    %951 = vector.broadcast %20 : f32 to vector<8x128xf32>
    %952 = arith.mulf %951, %342 : vector<8x128xf32>
    %953 = vector.broadcast %52 : f32 to vector<8x128xf32>
    %954 = arith.addf %952, %953 : vector<8x128xf32>
    %cst_21 = arith.constant 0.000000e+00 : f32
    %955 = vector.broadcast %cst_21 : f32 to vector<8x128xf32>
    %956 = arith.maximumf %954, %955 : vector<8x128xf32>
    %957 = vector.broadcast %224 : f32 to vector<8x128xf32>
    %958 = arith.mulf %957, %956 : vector<8x128xf32>
    %959 = arith.addf %929, %958 : vector<8x128xf32>
    %960 = vector.broadcast %225 : f32 to vector<8x128xf32>
    %961 = arith.mulf %960, %956 : vector<8x128xf32>
    %962 = arith.addf %932, %961 : vector<8x128xf32>
    %963 = vector.broadcast %226 : f32 to vector<8x128xf32>
    %964 = arith.mulf %963, %956 : vector<8x128xf32>
    %965 = arith.addf %935, %964 : vector<8x128xf32>
    %966 = vector.broadcast %227 : f32 to vector<8x128xf32>
    %967 = arith.mulf %966, %956 : vector<8x128xf32>
    %968 = arith.addf %938, %967 : vector<8x128xf32>
    %969 = vector.broadcast %228 : f32 to vector<8x128xf32>
    %970 = arith.mulf %969, %956 : vector<8x128xf32>
    %971 = arith.addf %941, %970 : vector<8x128xf32>
    %972 = vector.broadcast %229 : f32 to vector<8x128xf32>
    %973 = arith.mulf %972, %956 : vector<8x128xf32>
    %974 = arith.addf %944, %973 : vector<8x128xf32>
    %975 = vector.broadcast %230 : f32 to vector<8x128xf32>
    %976 = arith.mulf %975, %956 : vector<8x128xf32>
    %977 = arith.addf %947, %976 : vector<8x128xf32>
    %978 = vector.broadcast %231 : f32 to vector<8x128xf32>
    %979 = arith.mulf %978, %956 : vector<8x128xf32>
    %980 = arith.addf %950, %979 : vector<8x128xf32>
    %981 = vector.broadcast %21 : f32 to vector<8x128xf32>
    %982 = arith.mulf %981, %342 : vector<8x128xf32>
    %983 = vector.broadcast %53 : f32 to vector<8x128xf32>
    %984 = arith.addf %982, %983 : vector<8x128xf32>
    %cst_22 = arith.constant 0.000000e+00 : f32
    %985 = vector.broadcast %cst_22 : f32 to vector<8x128xf32>
    %986 = arith.maximumf %984, %985 : vector<8x128xf32>
    %987 = vector.broadcast %232 : f32 to vector<8x128xf32>
    %988 = arith.mulf %987, %986 : vector<8x128xf32>
    %989 = arith.addf %959, %988 : vector<8x128xf32>
    %990 = vector.broadcast %233 : f32 to vector<8x128xf32>
    %991 = arith.mulf %990, %986 : vector<8x128xf32>
    %992 = arith.addf %962, %991 : vector<8x128xf32>
    %993 = vector.broadcast %234 : f32 to vector<8x128xf32>
    %994 = arith.mulf %993, %986 : vector<8x128xf32>
    %995 = arith.addf %965, %994 : vector<8x128xf32>
    %996 = vector.broadcast %235 : f32 to vector<8x128xf32>
    %997 = arith.mulf %996, %986 : vector<8x128xf32>
    %998 = arith.addf %968, %997 : vector<8x128xf32>
    %999 = vector.broadcast %236 : f32 to vector<8x128xf32>
    %1000 = arith.mulf %999, %986 : vector<8x128xf32>
    %1001 = arith.addf %971, %1000 : vector<8x128xf32>
    %1002 = vector.broadcast %237 : f32 to vector<8x128xf32>
    %1003 = arith.mulf %1002, %986 : vector<8x128xf32>
    %1004 = arith.addf %974, %1003 : vector<8x128xf32>
    %1005 = vector.broadcast %238 : f32 to vector<8x128xf32>
    %1006 = arith.mulf %1005, %986 : vector<8x128xf32>
    %1007 = arith.addf %977, %1006 : vector<8x128xf32>
    %1008 = vector.broadcast %239 : f32 to vector<8x128xf32>
    %1009 = arith.mulf %1008, %986 : vector<8x128xf32>
    %1010 = arith.addf %980, %1009 : vector<8x128xf32>
    %1011 = vector.broadcast %22 : f32 to vector<8x128xf32>
    %1012 = arith.mulf %1011, %342 : vector<8x128xf32>
    %1013 = vector.broadcast %54 : f32 to vector<8x128xf32>
    %1014 = arith.addf %1012, %1013 : vector<8x128xf32>
    %cst_23 = arith.constant 0.000000e+00 : f32
    %1015 = vector.broadcast %cst_23 : f32 to vector<8x128xf32>
    %1016 = arith.maximumf %1014, %1015 : vector<8x128xf32>
    %1017 = vector.broadcast %240 : f32 to vector<8x128xf32>
    %1018 = arith.mulf %1017, %1016 : vector<8x128xf32>
    %1019 = arith.addf %989, %1018 : vector<8x128xf32>
    %1020 = vector.broadcast %241 : f32 to vector<8x128xf32>
    %1021 = arith.mulf %1020, %1016 : vector<8x128xf32>
    %1022 = arith.addf %992, %1021 : vector<8x128xf32>
    %1023 = vector.broadcast %242 : f32 to vector<8x128xf32>
    %1024 = arith.mulf %1023, %1016 : vector<8x128xf32>
    %1025 = arith.addf %995, %1024 : vector<8x128xf32>
    %1026 = vector.broadcast %243 : f32 to vector<8x128xf32>
    %1027 = arith.mulf %1026, %1016 : vector<8x128xf32>
    %1028 = arith.addf %998, %1027 : vector<8x128xf32>
    %1029 = vector.broadcast %244 : f32 to vector<8x128xf32>
    %1030 = arith.mulf %1029, %1016 : vector<8x128xf32>
    %1031 = arith.addf %1001, %1030 : vector<8x128xf32>
    %1032 = vector.broadcast %245 : f32 to vector<8x128xf32>
    %1033 = arith.mulf %1032, %1016 : vector<8x128xf32>
    %1034 = arith.addf %1004, %1033 : vector<8x128xf32>
    %1035 = vector.broadcast %246 : f32 to vector<8x128xf32>
    %1036 = arith.mulf %1035, %1016 : vector<8x128xf32>
    %1037 = arith.addf %1007, %1036 : vector<8x128xf32>
    %1038 = vector.broadcast %247 : f32 to vector<8x128xf32>
    %1039 = arith.mulf %1038, %1016 : vector<8x128xf32>
    %1040 = arith.addf %1010, %1039 : vector<8x128xf32>
    %1041 = vector.broadcast %23 : f32 to vector<8x128xf32>
    %1042 = arith.mulf %1041, %342 : vector<8x128xf32>
    %1043 = vector.broadcast %55 : f32 to vector<8x128xf32>
    %1044 = arith.addf %1042, %1043 : vector<8x128xf32>
    %cst_24 = arith.constant 0.000000e+00 : f32
    %1045 = vector.broadcast %cst_24 : f32 to vector<8x128xf32>
    %1046 = arith.maximumf %1044, %1045 : vector<8x128xf32>
    %1047 = vector.broadcast %248 : f32 to vector<8x128xf32>
    %1048 = arith.mulf %1047, %1046 : vector<8x128xf32>
    %1049 = arith.addf %1019, %1048 : vector<8x128xf32>
    %1050 = vector.broadcast %249 : f32 to vector<8x128xf32>
    %1051 = arith.mulf %1050, %1046 : vector<8x128xf32>
    %1052 = arith.addf %1022, %1051 : vector<8x128xf32>
    %1053 = vector.broadcast %250 : f32 to vector<8x128xf32>
    %1054 = arith.mulf %1053, %1046 : vector<8x128xf32>
    %1055 = arith.addf %1025, %1054 : vector<8x128xf32>
    %1056 = vector.broadcast %251 : f32 to vector<8x128xf32>
    %1057 = arith.mulf %1056, %1046 : vector<8x128xf32>
    %1058 = arith.addf %1028, %1057 : vector<8x128xf32>
    %1059 = vector.broadcast %252 : f32 to vector<8x128xf32>
    %1060 = arith.mulf %1059, %1046 : vector<8x128xf32>
    %1061 = arith.addf %1031, %1060 : vector<8x128xf32>
    %1062 = vector.broadcast %253 : f32 to vector<8x128xf32>
    %1063 = arith.mulf %1062, %1046 : vector<8x128xf32>
    %1064 = arith.addf %1034, %1063 : vector<8x128xf32>
    %1065 = vector.broadcast %254 : f32 to vector<8x128xf32>
    %1066 = arith.mulf %1065, %1046 : vector<8x128xf32>
    %1067 = arith.addf %1037, %1066 : vector<8x128xf32>
    %1068 = vector.broadcast %255 : f32 to vector<8x128xf32>
    %1069 = arith.mulf %1068, %1046 : vector<8x128xf32>
    %1070 = arith.addf %1040, %1069 : vector<8x128xf32>
    %1071 = vector.broadcast %24 : f32 to vector<8x128xf32>
    %1072 = arith.mulf %1071, %342 : vector<8x128xf32>
    %1073 = vector.broadcast %56 : f32 to vector<8x128xf32>
    %1074 = arith.addf %1072, %1073 : vector<8x128xf32>
    %cst_25 = arith.constant 0.000000e+00 : f32
    %1075 = vector.broadcast %cst_25 : f32 to vector<8x128xf32>
    %1076 = arith.maximumf %1074, %1075 : vector<8x128xf32>
    %1077 = vector.broadcast %256 : f32 to vector<8x128xf32>
    %1078 = arith.mulf %1077, %1076 : vector<8x128xf32>
    %1079 = arith.addf %1049, %1078 : vector<8x128xf32>
    %1080 = vector.broadcast %257 : f32 to vector<8x128xf32>
    %1081 = arith.mulf %1080, %1076 : vector<8x128xf32>
    %1082 = arith.addf %1052, %1081 : vector<8x128xf32>
    %1083 = vector.broadcast %258 : f32 to vector<8x128xf32>
    %1084 = arith.mulf %1083, %1076 : vector<8x128xf32>
    %1085 = arith.addf %1055, %1084 : vector<8x128xf32>
    %1086 = vector.broadcast %259 : f32 to vector<8x128xf32>
    %1087 = arith.mulf %1086, %1076 : vector<8x128xf32>
    %1088 = arith.addf %1058, %1087 : vector<8x128xf32>
    %1089 = vector.broadcast %260 : f32 to vector<8x128xf32>
    %1090 = arith.mulf %1089, %1076 : vector<8x128xf32>
    %1091 = arith.addf %1061, %1090 : vector<8x128xf32>
    %1092 = vector.broadcast %261 : f32 to vector<8x128xf32>
    %1093 = arith.mulf %1092, %1076 : vector<8x128xf32>
    %1094 = arith.addf %1064, %1093 : vector<8x128xf32>
    %1095 = vector.broadcast %262 : f32 to vector<8x128xf32>
    %1096 = arith.mulf %1095, %1076 : vector<8x128xf32>
    %1097 = arith.addf %1067, %1096 : vector<8x128xf32>
    %1098 = vector.broadcast %263 : f32 to vector<8x128xf32>
    %1099 = arith.mulf %1098, %1076 : vector<8x128xf32>
    %1100 = arith.addf %1070, %1099 : vector<8x128xf32>
    %1101 = vector.broadcast %25 : f32 to vector<8x128xf32>
    %1102 = arith.mulf %1101, %342 : vector<8x128xf32>
    %1103 = vector.broadcast %57 : f32 to vector<8x128xf32>
    %1104 = arith.addf %1102, %1103 : vector<8x128xf32>
    %cst_26 = arith.constant 0.000000e+00 : f32
    %1105 = vector.broadcast %cst_26 : f32 to vector<8x128xf32>
    %1106 = arith.maximumf %1104, %1105 : vector<8x128xf32>
    %1107 = vector.broadcast %264 : f32 to vector<8x128xf32>
    %1108 = arith.mulf %1107, %1106 : vector<8x128xf32>
    %1109 = arith.addf %1079, %1108 : vector<8x128xf32>
    %1110 = vector.broadcast %265 : f32 to vector<8x128xf32>
    %1111 = arith.mulf %1110, %1106 : vector<8x128xf32>
    %1112 = arith.addf %1082, %1111 : vector<8x128xf32>
    %1113 = vector.broadcast %266 : f32 to vector<8x128xf32>
    %1114 = arith.mulf %1113, %1106 : vector<8x128xf32>
    %1115 = arith.addf %1085, %1114 : vector<8x128xf32>
    %1116 = vector.broadcast %267 : f32 to vector<8x128xf32>
    %1117 = arith.mulf %1116, %1106 : vector<8x128xf32>
    %1118 = arith.addf %1088, %1117 : vector<8x128xf32>
    %1119 = vector.broadcast %268 : f32 to vector<8x128xf32>
    %1120 = arith.mulf %1119, %1106 : vector<8x128xf32>
    %1121 = arith.addf %1091, %1120 : vector<8x128xf32>
    %1122 = vector.broadcast %269 : f32 to vector<8x128xf32>
    %1123 = arith.mulf %1122, %1106 : vector<8x128xf32>
    %1124 = arith.addf %1094, %1123 : vector<8x128xf32>
    %1125 = vector.broadcast %270 : f32 to vector<8x128xf32>
    %1126 = arith.mulf %1125, %1106 : vector<8x128xf32>
    %1127 = arith.addf %1097, %1126 : vector<8x128xf32>
    %1128 = vector.broadcast %271 : f32 to vector<8x128xf32>
    %1129 = arith.mulf %1128, %1106 : vector<8x128xf32>
    %1130 = arith.addf %1100, %1129 : vector<8x128xf32>
    %1131 = vector.broadcast %26 : f32 to vector<8x128xf32>
    %1132 = arith.mulf %1131, %342 : vector<8x128xf32>
    %1133 = vector.broadcast %58 : f32 to vector<8x128xf32>
    %1134 = arith.addf %1132, %1133 : vector<8x128xf32>
    %cst_27 = arith.constant 0.000000e+00 : f32
    %1135 = vector.broadcast %cst_27 : f32 to vector<8x128xf32>
    %1136 = arith.maximumf %1134, %1135 : vector<8x128xf32>
    %1137 = vector.broadcast %272 : f32 to vector<8x128xf32>
    %1138 = arith.mulf %1137, %1136 : vector<8x128xf32>
    %1139 = arith.addf %1109, %1138 : vector<8x128xf32>
    %1140 = vector.broadcast %273 : f32 to vector<8x128xf32>
    %1141 = arith.mulf %1140, %1136 : vector<8x128xf32>
    %1142 = arith.addf %1112, %1141 : vector<8x128xf32>
    %1143 = vector.broadcast %274 : f32 to vector<8x128xf32>
    %1144 = arith.mulf %1143, %1136 : vector<8x128xf32>
    %1145 = arith.addf %1115, %1144 : vector<8x128xf32>
    %1146 = vector.broadcast %275 : f32 to vector<8x128xf32>
    %1147 = arith.mulf %1146, %1136 : vector<8x128xf32>
    %1148 = arith.addf %1118, %1147 : vector<8x128xf32>
    %1149 = vector.broadcast %276 : f32 to vector<8x128xf32>
    %1150 = arith.mulf %1149, %1136 : vector<8x128xf32>
    %1151 = arith.addf %1121, %1150 : vector<8x128xf32>
    %1152 = vector.broadcast %277 : f32 to vector<8x128xf32>
    %1153 = arith.mulf %1152, %1136 : vector<8x128xf32>
    %1154 = arith.addf %1124, %1153 : vector<8x128xf32>
    %1155 = vector.broadcast %278 : f32 to vector<8x128xf32>
    %1156 = arith.mulf %1155, %1136 : vector<8x128xf32>
    %1157 = arith.addf %1127, %1156 : vector<8x128xf32>
    %1158 = vector.broadcast %279 : f32 to vector<8x128xf32>
    %1159 = arith.mulf %1158, %1136 : vector<8x128xf32>
    %1160 = arith.addf %1130, %1159 : vector<8x128xf32>
    %1161 = vector.broadcast %27 : f32 to vector<8x128xf32>
    %1162 = arith.mulf %1161, %342 : vector<8x128xf32>
    %1163 = vector.broadcast %59 : f32 to vector<8x128xf32>
    %1164 = arith.addf %1162, %1163 : vector<8x128xf32>
    %cst_28 = arith.constant 0.000000e+00 : f32
    %1165 = vector.broadcast %cst_28 : f32 to vector<8x128xf32>
    %1166 = arith.maximumf %1164, %1165 : vector<8x128xf32>
    %1167 = vector.broadcast %280 : f32 to vector<8x128xf32>
    %1168 = arith.mulf %1167, %1166 : vector<8x128xf32>
    %1169 = arith.addf %1139, %1168 : vector<8x128xf32>
    %1170 = vector.broadcast %281 : f32 to vector<8x128xf32>
    %1171 = arith.mulf %1170, %1166 : vector<8x128xf32>
    %1172 = arith.addf %1142, %1171 : vector<8x128xf32>
    %1173 = vector.broadcast %282 : f32 to vector<8x128xf32>
    %1174 = arith.mulf %1173, %1166 : vector<8x128xf32>
    %1175 = arith.addf %1145, %1174 : vector<8x128xf32>
    %1176 = vector.broadcast %283 : f32 to vector<8x128xf32>
    %1177 = arith.mulf %1176, %1166 : vector<8x128xf32>
    %1178 = arith.addf %1148, %1177 : vector<8x128xf32>
    %1179 = vector.broadcast %284 : f32 to vector<8x128xf32>
    %1180 = arith.mulf %1179, %1166 : vector<8x128xf32>
    %1181 = arith.addf %1151, %1180 : vector<8x128xf32>
    %1182 = vector.broadcast %285 : f32 to vector<8x128xf32>
    %1183 = arith.mulf %1182, %1166 : vector<8x128xf32>
    %1184 = arith.addf %1154, %1183 : vector<8x128xf32>
    %1185 = vector.broadcast %286 : f32 to vector<8x128xf32>
    %1186 = arith.mulf %1185, %1166 : vector<8x128xf32>
    %1187 = arith.addf %1157, %1186 : vector<8x128xf32>
    %1188 = vector.broadcast %287 : f32 to vector<8x128xf32>
    %1189 = arith.mulf %1188, %1166 : vector<8x128xf32>
    %1190 = arith.addf %1160, %1189 : vector<8x128xf32>
    %1191 = vector.broadcast %28 : f32 to vector<8x128xf32>
    %1192 = arith.mulf %1191, %342 : vector<8x128xf32>
    %1193 = vector.broadcast %60 : f32 to vector<8x128xf32>
    %1194 = arith.addf %1192, %1193 : vector<8x128xf32>
    %cst_29 = arith.constant 0.000000e+00 : f32
    %1195 = vector.broadcast %cst_29 : f32 to vector<8x128xf32>
    %1196 = arith.maximumf %1194, %1195 : vector<8x128xf32>
    %1197 = vector.broadcast %288 : f32 to vector<8x128xf32>
    %1198 = arith.mulf %1197, %1196 : vector<8x128xf32>
    %1199 = arith.addf %1169, %1198 : vector<8x128xf32>
    %1200 = vector.broadcast %289 : f32 to vector<8x128xf32>
    %1201 = arith.mulf %1200, %1196 : vector<8x128xf32>
    %1202 = arith.addf %1172, %1201 : vector<8x128xf32>
    %1203 = vector.broadcast %290 : f32 to vector<8x128xf32>
    %1204 = arith.mulf %1203, %1196 : vector<8x128xf32>
    %1205 = arith.addf %1175, %1204 : vector<8x128xf32>
    %1206 = vector.broadcast %291 : f32 to vector<8x128xf32>
    %1207 = arith.mulf %1206, %1196 : vector<8x128xf32>
    %1208 = arith.addf %1178, %1207 : vector<8x128xf32>
    %1209 = vector.broadcast %292 : f32 to vector<8x128xf32>
    %1210 = arith.mulf %1209, %1196 : vector<8x128xf32>
    %1211 = arith.addf %1181, %1210 : vector<8x128xf32>
    %1212 = vector.broadcast %293 : f32 to vector<8x128xf32>
    %1213 = arith.mulf %1212, %1196 : vector<8x128xf32>
    %1214 = arith.addf %1184, %1213 : vector<8x128xf32>
    %1215 = vector.broadcast %294 : f32 to vector<8x128xf32>
    %1216 = arith.mulf %1215, %1196 : vector<8x128xf32>
    %1217 = arith.addf %1187, %1216 : vector<8x128xf32>
    %1218 = vector.broadcast %295 : f32 to vector<8x128xf32>
    %1219 = arith.mulf %1218, %1196 : vector<8x128xf32>
    %1220 = arith.addf %1190, %1219 : vector<8x128xf32>
    %1221 = vector.broadcast %29 : f32 to vector<8x128xf32>
    %1222 = arith.mulf %1221, %342 : vector<8x128xf32>
    %1223 = vector.broadcast %61 : f32 to vector<8x128xf32>
    %1224 = arith.addf %1222, %1223 : vector<8x128xf32>
    %cst_30 = arith.constant 0.000000e+00 : f32
    %1225 = vector.broadcast %cst_30 : f32 to vector<8x128xf32>
    %1226 = arith.maximumf %1224, %1225 : vector<8x128xf32>
    %1227 = vector.broadcast %296 : f32 to vector<8x128xf32>
    %1228 = arith.mulf %1227, %1226 : vector<8x128xf32>
    %1229 = arith.addf %1199, %1228 : vector<8x128xf32>
    %1230 = vector.broadcast %297 : f32 to vector<8x128xf32>
    %1231 = arith.mulf %1230, %1226 : vector<8x128xf32>
    %1232 = arith.addf %1202, %1231 : vector<8x128xf32>
    %1233 = vector.broadcast %298 : f32 to vector<8x128xf32>
    %1234 = arith.mulf %1233, %1226 : vector<8x128xf32>
    %1235 = arith.addf %1205, %1234 : vector<8x128xf32>
    %1236 = vector.broadcast %299 : f32 to vector<8x128xf32>
    %1237 = arith.mulf %1236, %1226 : vector<8x128xf32>
    %1238 = arith.addf %1208, %1237 : vector<8x128xf32>
    %1239 = vector.broadcast %300 : f32 to vector<8x128xf32>
    %1240 = arith.mulf %1239, %1226 : vector<8x128xf32>
    %1241 = arith.addf %1211, %1240 : vector<8x128xf32>
    %1242 = vector.broadcast %301 : f32 to vector<8x128xf32>
    %1243 = arith.mulf %1242, %1226 : vector<8x128xf32>
    %1244 = arith.addf %1214, %1243 : vector<8x128xf32>
    %1245 = vector.broadcast %302 : f32 to vector<8x128xf32>
    %1246 = arith.mulf %1245, %1226 : vector<8x128xf32>
    %1247 = arith.addf %1217, %1246 : vector<8x128xf32>
    %1248 = vector.broadcast %303 : f32 to vector<8x128xf32>
    %1249 = arith.mulf %1248, %1226 : vector<8x128xf32>
    %1250 = arith.addf %1220, %1249 : vector<8x128xf32>
    %1251 = vector.broadcast %30 : f32 to vector<8x128xf32>
    %1252 = arith.mulf %1251, %342 : vector<8x128xf32>
    %1253 = vector.broadcast %62 : f32 to vector<8x128xf32>
    %1254 = arith.addf %1252, %1253 : vector<8x128xf32>
    %cst_31 = arith.constant 0.000000e+00 : f32
    %1255 = vector.broadcast %cst_31 : f32 to vector<8x128xf32>
    %1256 = arith.maximumf %1254, %1255 : vector<8x128xf32>
    %1257 = vector.broadcast %304 : f32 to vector<8x128xf32>
    %1258 = arith.mulf %1257, %1256 : vector<8x128xf32>
    %1259 = arith.addf %1229, %1258 : vector<8x128xf32>
    %1260 = vector.broadcast %305 : f32 to vector<8x128xf32>
    %1261 = arith.mulf %1260, %1256 : vector<8x128xf32>
    %1262 = arith.addf %1232, %1261 : vector<8x128xf32>
    %1263 = vector.broadcast %306 : f32 to vector<8x128xf32>
    %1264 = arith.mulf %1263, %1256 : vector<8x128xf32>
    %1265 = arith.addf %1235, %1264 : vector<8x128xf32>
    %1266 = vector.broadcast %307 : f32 to vector<8x128xf32>
    %1267 = arith.mulf %1266, %1256 : vector<8x128xf32>
    %1268 = arith.addf %1238, %1267 : vector<8x128xf32>
    %1269 = vector.broadcast %308 : f32 to vector<8x128xf32>
    %1270 = arith.mulf %1269, %1256 : vector<8x128xf32>
    %1271 = arith.addf %1241, %1270 : vector<8x128xf32>
    %1272 = vector.broadcast %309 : f32 to vector<8x128xf32>
    %1273 = arith.mulf %1272, %1256 : vector<8x128xf32>
    %1274 = arith.addf %1244, %1273 : vector<8x128xf32>
    %1275 = vector.broadcast %310 : f32 to vector<8x128xf32>
    %1276 = arith.mulf %1275, %1256 : vector<8x128xf32>
    %1277 = arith.addf %1247, %1276 : vector<8x128xf32>
    %1278 = vector.broadcast %311 : f32 to vector<8x128xf32>
    %1279 = arith.mulf %1278, %1256 : vector<8x128xf32>
    %1280 = arith.addf %1250, %1279 : vector<8x128xf32>
    %1281 = vector.broadcast %31 : f32 to vector<8x128xf32>
    %1282 = arith.mulf %1281, %342 : vector<8x128xf32>
    %1283 = vector.broadcast %63 : f32 to vector<8x128xf32>
    %1284 = arith.addf %1282, %1283 : vector<8x128xf32>
    %cst_32 = arith.constant 0.000000e+00 : f32
    %1285 = vector.broadcast %cst_32 : f32 to vector<8x128xf32>
    %1286 = arith.maximumf %1284, %1285 : vector<8x128xf32>
    %1287 = vector.broadcast %312 : f32 to vector<8x128xf32>
    %1288 = arith.mulf %1287, %1286 : vector<8x128xf32>
    %1289 = arith.addf %1259, %1288 : vector<8x128xf32>
    %1290 = vector.broadcast %313 : f32 to vector<8x128xf32>
    %1291 = arith.mulf %1290, %1286 : vector<8x128xf32>
    %1292 = arith.addf %1262, %1291 : vector<8x128xf32>
    %1293 = vector.broadcast %314 : f32 to vector<8x128xf32>
    %1294 = arith.mulf %1293, %1286 : vector<8x128xf32>
    %1295 = arith.addf %1265, %1294 : vector<8x128xf32>
    %1296 = vector.broadcast %315 : f32 to vector<8x128xf32>
    %1297 = arith.mulf %1296, %1286 : vector<8x128xf32>
    %1298 = arith.addf %1268, %1297 : vector<8x128xf32>
    %1299 = vector.broadcast %316 : f32 to vector<8x128xf32>
    %1300 = arith.mulf %1299, %1286 : vector<8x128xf32>
    %1301 = arith.addf %1271, %1300 : vector<8x128xf32>
    %1302 = vector.broadcast %317 : f32 to vector<8x128xf32>
    %1303 = arith.mulf %1302, %1286 : vector<8x128xf32>
    %1304 = arith.addf %1274, %1303 : vector<8x128xf32>
    %1305 = vector.broadcast %318 : f32 to vector<8x128xf32>
    %1306 = arith.mulf %1305, %1286 : vector<8x128xf32>
    %1307 = arith.addf %1277, %1306 : vector<8x128xf32>
    %1308 = vector.broadcast %319 : f32 to vector<8x128xf32>
    %1309 = arith.mulf %1308, %1286 : vector<8x128xf32>
    %1310 = arith.addf %1280, %1309 : vector<8x128xf32>
    %1311 = vector.broadcast %336 : f32 to vector<8x128xf32>
    %cst_33 = arith.constant 0.000000e+00 : f32
    %1312 = vector.broadcast %cst_33 : f32 to vector<8x128xf32>
    %1313 = arith.maximumf %1289, %1312 : vector<8x128xf32>
    %1314 = vector.broadcast %328 : f32 to vector<8x128xf32>
    %1315 = arith.mulf %1314, %1313 : vector<8x128xf32>
    %1316 = arith.addf %1311, %1315 : vector<8x128xf32>
    %cst_34 = arith.constant 0.000000e+00 : f32
    %1317 = vector.broadcast %cst_34 : f32 to vector<8x128xf32>
    %1318 = arith.maximumf %1292, %1317 : vector<8x128xf32>
    %1319 = vector.broadcast %329 : f32 to vector<8x128xf32>
    %1320 = arith.mulf %1319, %1318 : vector<8x128xf32>
    %1321 = arith.addf %1316, %1320 : vector<8x128xf32>
    %cst_35 = arith.constant 0.000000e+00 : f32
    %1322 = vector.broadcast %cst_35 : f32 to vector<8x128xf32>
    %1323 = arith.maximumf %1295, %1322 : vector<8x128xf32>
    %1324 = vector.broadcast %330 : f32 to vector<8x128xf32>
    %1325 = arith.mulf %1324, %1323 : vector<8x128xf32>
    %1326 = arith.addf %1321, %1325 : vector<8x128xf32>
    %cst_36 = arith.constant 0.000000e+00 : f32
    %1327 = vector.broadcast %cst_36 : f32 to vector<8x128xf32>
    %1328 = arith.maximumf %1298, %1327 : vector<8x128xf32>
    %1329 = vector.broadcast %331 : f32 to vector<8x128xf32>
    %1330 = arith.mulf %1329, %1328 : vector<8x128xf32>
    %1331 = arith.addf %1326, %1330 : vector<8x128xf32>
    %cst_37 = arith.constant 0.000000e+00 : f32
    %1332 = vector.broadcast %cst_37 : f32 to vector<8x128xf32>
    %1333 = arith.maximumf %1301, %1332 : vector<8x128xf32>
    %1334 = vector.broadcast %332 : f32 to vector<8x128xf32>
    %1335 = arith.mulf %1334, %1333 : vector<8x128xf32>
    %1336 = arith.addf %1331, %1335 : vector<8x128xf32>
    %cst_38 = arith.constant 0.000000e+00 : f32
    %1337 = vector.broadcast %cst_38 : f32 to vector<8x128xf32>
    %1338 = arith.maximumf %1304, %1337 : vector<8x128xf32>
    %1339 = vector.broadcast %333 : f32 to vector<8x128xf32>
    %1340 = arith.mulf %1339, %1338 : vector<8x128xf32>
    %1341 = arith.addf %1336, %1340 : vector<8x128xf32>
    %cst_39 = arith.constant 0.000000e+00 : f32
    %1342 = vector.broadcast %cst_39 : f32 to vector<8x128xf32>
    %1343 = arith.maximumf %1307, %1342 : vector<8x128xf32>
    %1344 = vector.broadcast %334 : f32 to vector<8x128xf32>
    %1345 = arith.mulf %1344, %1343 : vector<8x128xf32>
    %1346 = arith.addf %1341, %1345 : vector<8x128xf32>
    %cst_40 = arith.constant 0.000000e+00 : f32
    %1347 = vector.broadcast %cst_40 : f32 to vector<8x128xf32>
    %1348 = arith.maximumf %1310, %1347 : vector<8x128xf32>
    %1349 = vector.broadcast %335 : f32 to vector<8x128xf32>
    %1350 = arith.mulf %1349, %1348 : vector<8x128xf32>
    %1351 = arith.addf %1346, %1350 : vector<8x128xf32>
    %1352 = arith.index_cast %340 : i32 to index
    %c0_41 = arith.constant 0 : index
    %1353 = vector.load %arg3[%1352, %c0_41] : memref<8x128xf32, #tpu.memory_space<vmem>>, vector<8x128xf32>
    tpu.vector_store %arg3[%1352, %c0_41], %1351 {strides = array<i32>} : memref<8x128xf32, #tpu.memory_space<vmem>>, vector<8x128xf32>,
    %c1_i32_42 = arith.constant 1 : i32
    return
  }
  func.func @transform_0(%arg0: i32) -> i32 {
    %c0_i32 = arith.constant 0 : i32
    %c0_i32_0 = arith.constant 0 : i32
    return %c0_i32 : i32
  }
  func.func @transform_1(%arg0: i32) -> (i32, i32) {
    %c0_i32 = arith.constant 0 : i32
    %c0_i32_0 = arith.constant 0 : i32
    return %arg0, %c0_i32 : i32, i32
  }
  func.func @transform_2(%arg0: i32) -> (i32, i32) {
    %c0_i32 = arith.constant 0 : i32
    %c0_i32_0 = arith.constant 0 : i32
    return %arg0, %c0_i32 : i32, i32
  }
}

</mosaic_0001>

<bundles_post_ra>
// kernel: tpu_custom_call.1
= control target key start
LH: loop header
LB: loop body
LE: loop exit
PB: predicated region body
PF: predicated region fallthrough
CT: control target
= control target key end

     0   :  { %s3043_s0 = inlined_call_operand.hbm [shape: f32[337], index: 0, kind: input, shape index: {}]   ;;  %s3044_s1 = inlined_call_operand.hbm [shape: f32[8,128], index: 1, kind: input, shape index: {}]   ;;  %s3045_s2 = inlined_call_operand.hbm [shape: f32[8,128], index: 2, kind: output, shape index: {}]  }
   0x1   :  { %3054 = sst [smem:[#allocation87_spill]] %s3045_s2 }
   0x2   :  { %7 = vsyncpa [#allocation5], 0 }
   0x3   :  { %8 = vsyncpa [#allocation3], 0 }
   0x4   :  { %9 = vsyncpa [#allocation4], 0  ;;  %s15_s11 = sshll.u32 %s3043_s0, 4  ;;  %s24_s14 = sshll.u32 %s3044_s1, 4  ;;  %s16_s11 = int_to_ptr.hbm [resolvable:$true] %s15_s11  ;;  %s25_s14 = int_to_ptr.hbm [resolvable:$true] %s24_s14 }
   0x5   :  { %s1772_s15 = smov [#allocation2]   ;;  %s1773_s16 = smov [#allocation6]  }
   0x6   :  { %18 = dma.hbm_to_smem %s16_s11, 48, %s1772_s15, [#allocation5]  }
   0x7   :  { %s26_s17 = sshll.u32 %s1773_s16, 4  ;;  %s27_s17 = int_to_ptr.vmem [resolvable:$true] %s26_s17 }
   0x8   :  { %29 = dma.hbm_to_vmem [thread:$0]  %s25_s14, 128, %s27_s17, [#allocation3]  }
   0x9   :  { %1766 = dma.done.wait [#allocation5], 48  }
   0xa   :  { %1767 = vsyncadd [#allocation5], 4294967248 }
   0xb   :  { %1768 = dma.done.wait [#allocation3], 128  }
   0xc   :  { %1769 = vsyncadd [#allocation3], 4294967168 }
   0xd   :  { %38 = sfence }
   0xe   :  { %s1796_s18 = sld [smem:[#allocation2]]  ;;  %v1996_v0 = vld [vmem:[#allocation6] sm:$0xff] }
   0xf   :  { %s1798_s0 = sld [smem:[#allocation2 + $0x1]] }
  0x10   :  { %s1800_s19 = sld [smem:[#allocation2 + $0x2]] }
  0x11   :  { %s1802_s20 = sld [smem:[#allocation2 + $0x3]] }
  0x12   :  { %s1804_s1 = sld [smem:[#allocation2 + $0x4]] }
  0x13   :  { %s1806_s21 = sld [smem:[#allocation2 + $0x5]] }
  0x14   :  { %s1808_s22 = sld [smem:[#allocation2 + $0x6]]  ;;  %v385_v1 = vstv %s1796_s18 }
  0x15   :  { %s1810_s23 = sld [smem:[#allocation2 + $0x7]]  ;;  %v386_v2 = vmul.f32 %v385_v1, %v1996_v0  ;;  %v414_v3 = vstv %s1798_s0 }
  0x16   :  { %s1812_s24 = sld [smem:[#allocation2 + $0x8]]  ;;  %v415_v5 = vmul.f32 %v414_v3, %v1996_v0  ;;  %v443_v7 = vstv %s1800_s19 }
  0x17   :  { %s1814_s25 = sld [smem:[#allocation2 + $0x9]]  ;;  %v444_v8 = vmul.f32 %v443_v7, %v1996_v0  ;;  %v472_v11 = vstv %s1802_s20 }
  0x18   :  { %s1816_s26 = sld [smem:[#allocation2 + $0xa]]  ;;  %v473_v13 = vmul.f32 %v472_v11, %v1996_v0  ;;  %v501_v36 = vstv %s1804_s1 }
  0x19   :  { %3055 = sst [smem:[#allocation11_spill]] %s1806_s21  ;;  %v502_v52 = vmul.f32 %v501_v36, %v1996_v0 }
  0x1a   :  { %3056 = sst [smem:[#allocation12_spill]] %s1808_s22 }
  0x1b   :  { %3057 = sst [smem:[#allocation13_spill]] %s1810_s23 }
  0x1c   :  { %3058 = sst [smem:[#allocation14_spill]] %s1812_s24 }
  0x1d   :  { %3059 = sst [smem:[#allocation15_spill]] %s1814_s25 }
  0x1e   :  { %3060 = sst [smem:[#allocation16_spill]] %s1816_s26 }
  0x1f   :  { %s1818_s27 = sld [smem:[#allocation2 + $0xb]] }
  0x20   :  { %s1820_s28 = sld [smem:[#allocation2 + $0xc]] }
  0x21   :  { %s1822_s29 = sld [smem:[#allocation2 + $0xd]] }
  0x22   :  { %s1824_s30 = sld [smem:[#allocation2 + $0xe]] }
  0x23   :  { %s1826_s3 = sld [smem:[#allocation2 + $0xf]] }
  0x24   :  { %s1828_s4 = sld [smem:[#allocation2 + $0x10]] }
  0x25   :  { %3061 = sst [smem:[#allocation17_spill]] %s1818_s27 }
  0x26   :  { %3062 = sst [smem:[#allocation18_spill]] %s1820_s28 }
  0x27   :  { %3063 = sst [smem:[#allocation19_spill]] %s1822_s29 }
  0x28   :  { %3064 = sst [smem:[#allocation20_spill]] %s1824_s30 }
  0x29   :  { %3065 = sst [smem:[#allocation21_spill]] %s1826_s3 }
  0x2a   :  { %3066 = sst [smem:[#allocation22_spill]] %s1828_s4 }
  0x2b   :  { %s1830_s5 = sld [smem:[#allocation2 + $0x11]] }
  0x2c   :  { %s1832_s6 = sld [smem:[#allocation2 + $0x12]] }
  0x2d   :  { %s1834_s7 = sld [smem:[#allocation2 + $0x13]] }
  0x2e   :  { %s1836_s8 = sld [smem:[#allocation2 + $0x14]] }
  0x2f   :  { %s1838_s9 = sld [smem:[#allocation2 + $0x15]] }
  0x30   :  { %s1840_s10 = sld [smem:[#allocation2 + $0x16]] }
  0x31   :  { %3067 = sst [smem:[#allocation23_spill]] %s1830_s5 }
  0x32   :  { %3068 = sst [smem:[#allocation24_spill]] %s1832_s6 }
  0x33   :  { %3069 = sst [smem:[#allocation25_spill]] %s1834_s7 }
  0x34   :  { %3070 = sst [smem:[#allocation26_spill]] %s1836_s8 }
  0x35   :  { %3071 = sst [smem:[#allocation27_spill]] %s1838_s9 }
  0x36   :  { %3072 = sst [smem:[#allocation28_spill]] %s1840_s10 }
  0x37   :  { %s1842_s11 = sld [smem:[#allocation2 + $0x17]] }
  0x38   :  { %s1844_s12 = sld [smem:[#allocation2 + $0x18]] }
  0x39   :  { %s1846_s13 = sld [smem:[#allocation2 + $0x19]] }
  0x3a   :  { %s1848_s14 = sld [smem:[#allocation2 + $0x1a]] }
  0x3b   :  { %s1850_s15 = sld [smem:[#allocation2 + $0x1b]] }
  0x3c   :  { %s1852_s16 = sld [smem:[#allocation2 + $0x1c]] }
  0x3d   :  { %3073 = sst [smem:[#allocation29_spill]] %s1842_s11 }
  0x3e   :  { %3074 = sst [smem:[#allocation30_spill]] %s1844_s12 }
  0x3f   :  { %3075 = sst [smem:[#allocation31_spill]] %s1846_s13 }
  0x40   :  { %3076 = sst [smem:[#allocation32_spill]] %s1848_s14 }
  0x41   :  { %3077 = sst [smem:[#allocation33_spill]] %s1850_s15 }
  0x42   :  { %3078 = sst [smem:[#allocation34_spill]] %s1852_s16 }
  0x43   :  { %s1854_s17 = sld [smem:[#allocation2 + $0x1d]] }
  0x44   :  { %s1856_s2 = sld [smem:[#allocation2 + $0x1e]] }
  0x45   :  { %s1858_s8 = sld [smem:[#allocation2 + $0x1f]] }
  0x46   :  { %s1860_s9 = sld [smem:[#allocation2 + $0x20]] }
  0x47   :  { %s1862_s10 = sld [smem:[#allocation2 + $0x21]] }
  0x48   :  { %s1864_s11 = sld [smem:[#allocation2 + $0x22]] }
  0x49   :  { %3079 = sst [smem:[#allocation35_spill]] %s1854_s17 }
  0x4a   :  { %3080 = sst [smem:[#allocation36_spill]] %s1856_s2 }
  0x4b   :  { %3081 = sst [smem:[#allocation37_spill]] %s1858_s8 }
  0x4c   :  { %s1866_s12 = sld [smem:[#allocation2 + $0x23]]  ;;  %v387_v4 = vstv %s1860_s9 }
  0x4d   :  { %s1868_s13 = sld [smem:[#allocation2 + $0x24]]  ;;  %v416_v6 = vstv %s1862_s10  ;;  %v388_v9 = vadd.f32 %v387_v4, %v386_v2 }
  0x4e   :  { %s1870_s14 = sld [smem:[#allocation2 + $0x25]]  ;;  %v445_v10 = vstv %s1864_s11  ;;  %v417_v12 = vadd.f32 %v416_v6, %v415_v5 }
  0x4f   :  { %s1872_s15 = sld [smem:[#allocation2 + $0x26]]  ;;  %v446_v15 = vadd.f32 %v445_v10, %v444_v8  ;;  %v389_v16 = vmax.f32 %v388_v9, 0.0 }
  0x50   :  { %s1874_s16 = sld [smem:[#allocation2 + $0x27]]  ;;  %v2033_v18 = vmax.f32 %v417_v12, 0.0 }
  0x51   :  { %s1876_s17 = sld [smem:[#allocation2 + $0x28]]  ;;  %v2043_v24 = vmax.f32 %v446_v15, 0.0 }
  0x52   :  { %s1878_s2 = sld [smem:[#allocation2 + $0x29]]  ;;  %v474_v14 = vstv %s1866_s12 }
  0x53   :  { %3082 = sst [smem:[#allocation38_spill]] %s1868_s13  ;;  %v475_v19 = vadd.f32 %v474_v14, %v473_v13 }
  0x54   :  { %3083 = sst [smem:[#allocation39_spill]] %s1870_s14 }
  0x55   :  { %3084 = sst [smem:[#allocation40_spill]] %s1872_s15  ;;  %v2060_v32 = vmax.f32 %v475_v19, 0.0 }
  0x56   :  { %3085 = sst [smem:[#allocation41_spill]] %s1874_s16 }
  0x57   :  { %3086 = sst [smem:[#allocation42_spill]] %s1876_s17 }
  0x58   :  { %3087 = sst [smem:[#allocation43_spill]] %s1878_s2 }
  0x59   :  { %s1880_s8 = sld [smem:[#allocation2 + $0x2a]] }
  0x5a   :  { %s1882_s7 = sld [smem:[#allocation2 + $0x2b]] }
  0x5b   :  { %s1884_s6 = sld [smem:[#allocation2 + $0x2c]] }
  0x5c   :  { %s1886_s5 = sld [smem:[#allocation2 + $0x2d]] }
  0x5d   :  { %s1888_s4 = sld [smem:[#allocation2 + $0x2e]] }
  0x5e   :  { %s1890_s3 = sld [smem:[#allocation2 + $0x2f]] }
  0x5f   :  { %3088 = sst [smem:[#allocation44_spill]] %s1880_s8 }
  0x60   :  { %3089 = sst [smem:[#allocation45_spill]] %s1882_s7 }
  0x61   :  { %3090 = sst [smem:[#allocation46_spill]] %s1884_s6 }
  0x62   :  { %3091 = sst [smem:[#allocation47_spill]] %s1886_s5 }
  0x63   :  { %3092 = sst [smem:[#allocation48_spill]] %s1888_s4 }
  0x64   :  { %3093 = sst [smem:[#allocation49_spill]] %s1890_s3 }
  0x65   :  { %s1892_s30 = sld [smem:[#allocation2 + $0x30]] }
  0x66   :  { %s1894_s29 = sld [smem:[#allocation2 + $0x31]] }
  0x67   :  { %s1896_s28 = sld [smem:[#allocation2 + $0x32]] }
  0x68   :  { %s1898_s27 = sld [smem:[#allocation2 + $0x33]] }
  0x69   :  { %s1900_s26 = sld [smem:[#allocation2 + $0x34]] }
  0x6a   :  { %s1902_s8 = sld [smem:[#allocation2 + $0x35]] }
  0x6b   :  { %3094 = sst [smem:[#allocation50_spill]] %s1892_s30 }
  0x6c   :  { %3095 = sst [smem:[#allocation51_spill]] %s1894_s29 }
  0x6d   :  { %3096 = sst [smem:[#allocation52_spill]] %s1896_s28 }
  0x6e   :  { %3097 = sst [smem:[#allocation53_spill]] %s1898_s27 }
  0x6f   :  { %3098 = sst [smem:[#allocation54_spill]] %s1900_s26 }
  0x70   :  { %3099 = sst [smem:[#allocation55_spill]] %s1902_s8 }
  0x71   :  { %s1904_s7 = sld [smem:[#allocation2 + $0x36]] }
  0x72   :  { %s1906_s6 = sld [smem:[#allocation2 + $0x37]] }
  0x73   :  { %s1908_s5 = sld [smem:[#allocation2 + $0x38]] }
  0x74   :  { %s1910_s4 = sld [smem:[#allocation2 + $0x39]] }
  0x75   :  { %s1912_s3 = sld [smem:[#allocation2 + $0x3a]] }
  0x76   :  { %s1914_s30 = sld [smem:[#allocation2 + $0x3b]] }
  0x77   :  { %3100 = sst [smem:[#allocation56_spill]] %s1904_s7 }
  0x78   :  { %3101 = sst [smem:[#allocation57_spill]] %s1906_s6 }
  0x79   :  { %3102 = sst [smem:[#allocation58_spill]] %s1908_s5 }
  0x7a   :  { %3103 = sst [smem:[#allocation59_spill]] %s1910_s4 }
  0x7b   :  { %3104 = sst [smem:[#allocation60_spill]] %s1912_s3 }
  0x7c   :  { %3105 = sst [smem:[#allocation61_spill]] %s1914_s30 }
  0x7d   :  { %s1916_s29 = sld [smem:[#allocation2 + $0x3c]] }
  0x7e   :  { %s1918_s28 = sld [smem:[#allocation2 + $0x3d]] }
  0x7f   :  { %s1920_s27 = sld [smem:[#allocation2 + $0x3e]] }
  0x80   :  { %s1922_s26 = sld [smem:[#allocation2 + $0x3f]] }
  0x81   :  { %s1924_s8 = sld [smem:[#allocation2 + $0x40]] }
  0x82   :  { %s1926_s7 = sld [smem:[#allocation2 + $0x41]] }
  0x83   :  { %3106 = sst [smem:[#allocation62_spill]] %s1916_s29 }
  0x84   :  { %3107 = sst [smem:[#allocation63_spill]] %s1918_s28 }
  0x85   :  { %3108 = sst [smem:[#allocation64_spill]] %s1920_s27 }
  0x86   :  { %3109 = sst [smem:[#allocation65_spill]] %s1922_s26 }
  0x87   :  { %s1928_s6 = sld [smem:[#allocation2 + $0x42]]  ;;  %v390_v17 = vstv %s1924_s8 }
  0x88   :  { %s1930_s5 = sld [smem:[#allocation2 + $0x43]]  ;;  %v393_v20 = vstv %s1926_s7  ;;  %v2047_v25 = vmul.f32 %v390_v17, %v389_v16 }
  0x89   :  { %s1932_s4 = sld [smem:[#allocation2 + $0x44]]  ;;  %v2054_v29 = vmul.f32 %v393_v20, %v389_v16 }
  0x8a   :  { %s1934_s3 = sld [smem:[#allocation2 + $0x45]] }
  0x8b   :  { %s1936_s30 = sld [smem:[#allocation2 + $0x46]] }
  0x8c   :  { %s1938_s29 = sld [smem:[#allocation2 + $0x47]] }
  0x8d   :  { %s1940_s28 = sld [smem:[#allocation2 + $0x48]]  ;;  %v396_v22 = vstv %s1928_s6 }
  0x8e   :  { %s1942_s27 = sld [smem:[#allocation2 + $0x49]]  ;;  %v399_v26 = vstv %s1930_s5  ;;  %v2064_v33 = vmul.f32 %v396_v22, %v389_v16 }
  0x8f   :  { %s1944_s26 = sld [smem:[#allocation2 + $0x4a]]  ;;  %v2073_v37 = vmul.f32 %v399_v26, %v389_v16  ;;  %v402_v38 = vstv %s1932_s4 }
  0x90   :  { %3110 = sst [smem:[#allocation66_spill]] %s1934_s3  ;;  %v2100_v49 = vmul.f32 %v402_v38, %v389_v16 }
  0x91   :  { %3111 = sst [smem:[#allocation67_spill]] %s1936_s30 }
  0x92   :  { %3112 = sst [smem:[#allocation68_spill]] %s1938_s29 }
  0x93   :  { %s1946_s2 = sld [smem:[#allocation2 + $0x4b]]  ;;  %v419_v21 = vstv %s1940_s28 }
  0x94   :  { %s1948_s25 = sld [smem:[#allocation2 + $0x4c]]  ;;  %v422_v23 = vstv %s1942_s27  ;;  %v2057_v30 = vmul.f32 %v419_v21, %v2033_v18 }
  0x95   :  { %s1950_s17 = sld [smem:[#allocation2 + $0x4d]]  ;;  %v425_v27 = vstv %s1944_s26  ;;  %v2067_v34 = vmul.f32 %v422_v23, %v2033_v18 }
  0x96   :  { %s1952_s24 = sld [smem:[#allocation2 + $0x4e]]  ;;  %v2077_v39 = vmul.f32 %v425_v27, %v2033_v18 }
  0x97   :  { %s1954_s16 = sld [smem:[#allocation2 + $0x4f]] }
  0x98   :  { %s1956_s23 = sld [smem:[#allocation2 + $0x50]] }
  0x99   :  { %s1958_s15 = sld [smem:[#allocation2 + $0x51]]  ;;  %v428_v41 = vstv %s1946_s2 }
  0x9a   :  { %3113 = sst [smem:[#allocation69_spill]] %s1948_s25  ;;  %v2108_v53 = vmul.f32 %v428_v41, %v2033_v18 }
  0x9b   :  { %3114 = sst [smem:[#allocation70_spill]] %s1950_s17 }
  0x9c   :  { %3115 = sst [smem:[#allocation71_spill]] %s1952_s24 }
  0x9d   :  { %3116 = sst [smem:[#allocation72_spill]] %s1954_s16 }
  0x9e   :  { %s1960_s22 = sld [smem:[#allocation2 + $0x52]]  ;;  %v448_v28 = vstv %s1956_s23 }
  0x9f   :  { %s1962_s14 = sld [smem:[#allocation2 + $0x53]]  ;;  %v451_v31 = vstv %s1958_s15  ;;  %v2080_v40 = vmul.f32 %v448_v28, %v2043_v24 }
  0xa0   :  { %s1964_s21 = sld [smem:[#allocation2 + $0x54]]  ;;  %v2086_v42 = vmul.f32 %v451_v31, %v2043_v24 }
  0xa1   :  { %s1966_s13 = sld [smem:[#allocation2 + $0x55]] }
  0xa2   :  { %s1968_s29 = sld [smem:[#allocation2 + $0x56]] }
  0xa3   :  { %s1970_s17 = sld [smem:[#allocation2 + $0x57]] }
  0xa4   :  { %s1972_s24 = sld [smem:[#allocation2 + $0x58]]  ;;  %v454_v43 = vstv %s1960_s22 }
  0xa5   :  { %3117 = sst [smem:[#allocation73_spill]] %s1962_s14  ;;  %v2112_v55 = vmul.f32 %v454_v43, %v2043_v24 }
  0xa6   :  { %3118 = sst [smem:[#allocation74_spill]] %s1964_s21 }
  0xa7   :  { %3119 = sst [smem:[#allocation75_spill]] %s1966_s13 }
  0xa8   :  { %3120 = sst [smem:[#allocation76_spill]] %s1968_s29 }
  0xa9   :  { %3121 = sst [smem:[#allocation77_spill]] %s1970_s17 }
  0xaa   :  { %s1974_s16 = sld [smem:[#allocation2 + $0x59]]  ;;  %v477_v35 = vstv %s1972_s24 }
  0xab   :  { %s1976_s30 = sld [smem:[#allocation2 + $0x5a]]  ;;  %v2096_v48 = vmul.f32 %v477_v35, %v2060_v32 }
  0xac   :  { %s1978_s25 = sld [smem:[#allocation2 + $0x5b]] }
  0xad   :  { %s1980_s14 = sld [smem:[#allocation2 + $0x5c]] }
  0xae   :  { %s1982_s21 = sld [smem:[#allocation2 + $0x5d]] }
  0xaf   :  { %s1984_s13 = sld [smem:[#allocation2 + $0x5e]] }
  0xb0   :  { %3122 = sst [smem:[#allocation78_spill]] %s1974_s16 }
  0xb1   :  { %3123 = sst [smem:[#allocation79_spill]] %s1976_s30 }
  0xb2   :  { %s1986_s29 = sld [smem:[#allocation2 + $0x5f]]  ;;  %v486_v11 = vstv %s1978_s25 }
  0xb3   :  { %s1988_s17 = sld [smem:[#allocation2 + $0x60]]  ;;  %v489_v12 = vstv %s1980_s14  ;;  %v2184_v22 = vmul.f32 %v486_v11, %v2060_v32 }
  0xb4   :  { %3124 = sst [smem:[#allocation80_spill]] %s1982_s21  ;;  %v2187_v23 = vmul.f32 %v489_v12, %v2060_v32 }
  0xb5   :  { %3125 = sst [smem:[#allocation81_spill]] %s1984_s13 }
  0xb6   :  { %s1990_s3 = sld [smem:[#allocation2 + $0x61]] }
  0xb7   :  { %s1992_s16 = sld [smem:[#allocation2 + $0x62]] }
  0xb8   :  { %3126 = sst [smem:[#allocation82_spill]] %s1986_s29 }
  0xb9   :  { %s1994_s30 = sld [smem:[#allocation2 + $0x63]]  ;;  %v506_v31 = vstv %s1988_s17 }
  0xba   :  { %s1999_s21 = sld [smem:[#allocation2 + $0x64]] }
  0xbb   :  { %s2001_s13 = sld [smem:[#allocation2 + $0x65]] }
  0xbc   :  { %s2005_s29 = sld [smem:[#allocation2 + $0x66]]  ;;  %v509_v35 = vstv %s1990_s3 }
  0xbd   :  { %3127 = sst [smem:[#allocation83_spill]] %s1992_s16 }
  0xbe   :  { %s2009_s16 = sld [smem:[#allocation2 + $0x67]] }
  0xbf   :  { %3128 = sst [smem:[#allocation84_spill]] %s1994_s30 }
  0xc0   :  { %s2013_s30 = sld [smem:[#allocation2 + $0x68]] }
  0xc1   :  { %s2016_s18 = sld [smem:[#allocation2 + $0x69]] }
  0xc2   :  { %s2020_s0 = sld [smem:[#allocation2 + $0x6a]] }
  0xc3   :  { %s2023_s19 = sld [smem:[#allocation2 + $0x6b]] }
  0xc4   :  { %s2026_s9 = sld [smem:[#allocation2 + $0x6c]] }
  0xc5   :  { %s2028_s10 = sld [smem:[#allocation2 + $0x6d]] }
  0xc6   :  { %s2030_s20 = sld [smem:[#allocation2 + $0x6e]] }
  0xc7   :  { %s2035_s11 = sld [smem:[#allocation2 + $0x6f]] }
  0xc8   :  { %s2039_s12 = sld [smem:[#allocation2 + $0x70]] }
  0xc9   :  { %s2052_s8 = sld [smem:[#allocation2 + $0x72]]  ;;  %v544_v11 = vstv %s2023_s19 }
  0xca   :  { %s3131_s27 = sld [smem:[#allocation78_spill]] }
  0xcb   :  { %3129 = sst [smem:[#allocation85_spill]] %s2028_s10 }
  0xcc   :  { %s2045_s10 = sld [smem:[#allocation2 + $0x71]] }
  0xcd   :  { %s2062_s28 = sld [smem:[#allocation2 + $0x73]] }
  0xce   :  { %s3133_s6 = sld [smem:[#allocation66_spill]] }
  0xcf   :  { %3130 = sst [smem:[#allocation86_spill]] %s2052_s8 }
  0xd0   :  { %s3134_s23 = sld [smem:[#allocation69_spill]]  ;;  %v480_v44 = vstv %s3131_s27 }
  0xd1   :  { %s3135_s26 = sld [smem:[#allocation73_spill]]  ;;  %v2115_v56 = vmul.f32 %v480_v44, %v2060_v32  ;;  %v518_v44 = vstv %s1999_s21 }
  0xd2   :  { %s2071_s5 = sld [smem:[#allocation2 + $0x74]] }
  0xd3   :  { %3132 = sst [smem:[#allocation78_spill]] %s2062_s28 }
  0xd4   :  { %s3136_s7 = sld [smem:[#allocation67_spill]]  ;;  %v405_v45 = vstv %s3133_s6 }
  0xd5   :  { %s3137_s15 = sld [smem:[#allocation68_spill]]  ;;  %v2119_v57 = vmul.f32 %v405_v45, %v389_v16  ;;  %v521_v45 = vstv %s2001_s13 }
  0xd6   :  { %s2082_s28 = sld [smem:[#allocation2 + $0x75]]  ;;  %v431_v46 = vstv %s3134_s23 }
  0xd7   :  { %s3139_s8 = sld [smem:[#allocation70_spill]]  ;;  %v457_v47 = vstv %s3135_s26  ;;  %v2122_v58 = vmul.f32 %v431_v46, %v2033_v18  ;;  %v524_v46 = vstv %s2005_s29 }
  0xd8   :  { %s2090_s1 = sld [smem:[#allocation2 + $0x76]]  ;;  %v2126_v60 = vmul.f32 %v457_v47, %v2043_v24 }
  0xd9   :  { %s3140_s24 = sld [smem:[#allocation71_spill]] }
  0xda   :  { %s2098_s4 = sld [smem:[#allocation2 + $0x77]]  ;;  %v408_v50 = vstv %s3136_s7 }
  0xdb   :  { %s3142_s2 = sld [smem:[#allocation72_spill]]  ;;  %v411_v51 = vstv %s3137_s15  ;;  %v2130_v61 = vmul.f32 %v408_v50, %v389_v16  ;;  %v527_v50 = vstv %s2009_s16 }
  0xdc   :  { %3138 = sst [smem:[#allocation66_spill]] %s2082_s28  ;;  %v2132_v62 = vmul.f32 %v411_v51, %v389_v16  ;;  %v535_v51 = vstv %s2013_s30 }
  0xdd   :  { %s3143_s28 = sld [smem:[#allocation79_spill]]  ;;  %v434_v54 = vstv %s3139_s8 }
  0xde   :  { %s2105_s22 = sld [smem:[#allocation2 + $0x78]]  ;;  %v2139_v2 = vmul.f32 %v434_v54, %v2033_v18 }
  0xdf   :  { %s3145_s27 = sld [smem:[#allocation74_spill]]  ;;  %v437_v59 = vstv %s3140_s24 }
  0xe0   :  { %3141 = sst [smem:[#allocation69_spill]] %s2098_s4  ;;  %v2147_v6 = vmul.f32 %v437_v59, %v2033_v18 }
  0xe1   :  { %s3146_s6 = sld [smem:[#allocation75_spill]]  ;;  %v440_v63 = vstv %s3142_s2 }
  0xe2   :  { %s3147_s23 = sld [smem:[#allocation38_spill]]  ;;  %v2154_v10 = vmul.f32 %v440_v63, %v2033_v18 }
  0xe3   :  { %s2117_s26 = sld [smem:[#allocation2 + $0x79]]  ;;  %v483_v1 = vstv %s3143_s28 }
  0xe4   :  { %3144 = sst [smem:[#allocation73_spill]] %s2105_s22  ;;  %v2178_v20 = vmul.f32 %v483_v1, %v2060_v32 }
  0xe5   :  { %s3149_s7 = sld [smem:[#allocation76_spill]]  ;;  %v460_v3 = vstv %s3145_s27 }
  0xe6   :  { %s3150_s15 = sld [smem:[#allocation77_spill]]  ;;  %v2162_v14 = vmul.f32 %v460_v3, %v2043_v24 }
  0xe7   :  { %s2128_s8 = sld [smem:[#allocation2 + $0x7a]]  ;;  %v463_v4 = vstv %s3146_s6 }
  0xe8   :  { %s2136_s22 = sld [smem:[#allocation2 + $0x7b]]  ;;  %v503_v5 = vstv %s3147_s23  ;;  %v2165_v15 = vmul.f32 %v463_v4, %v2043_v24 }
  0xe9   :  { %3148 = sst [smem:[#allocation67_spill]] %s2117_s26  ;;  %v504_v9 = vadd.f32 %v503_v5, %v502_v52  ;;  %v538_v52 = vstv %s2016_s18 }
  0xea   :  { %s3152_s26 = sld [smem:[#allocation80_spill]] }
  0xeb   :  { %s3153_s24 = sld [smem:[#allocation81_spill]]  ;;  %v466_v7 = vstv %s3149_s7 }
  0xec   :  { %s3154_s4 = sld [smem:[#allocation82_spill]]  ;;  %v469_v8 = vstv %s3150_s15  ;;  %v2172_v18 = vmul.f32 %v466_v7, %v2043_v24 }
  0xed   :  { %3151 = sst [smem:[#allocation68_spill]] %s2128_s8  ;;  %v2175_v19 = vmul.f32 %v469_v8, %v2043_v24  ;;  %v505_v24 = vmax.f32 %v504_v9, 0.0  ;;  %v541_v9 = vstv %s2020_s0 }
  0xee   :  { %s2144_s8 = sld [smem:[#allocation2 + $0x7c]] }
  0xef   :  { %s3155_s2 = sld [smem:[#allocation11_spill]]  ;;  %v2223_v54 = vmul.f32 %v509_v35, %v505_v24  ;;  %v2231_v3 = vmul.f32 %v518_v44, %v505_v24  ;;  %v2233_v4 = vmul.f32 %v521_v45, %v505_v24  ;;  %v2235_v5 = vmul.f32 %v524_v46, %v505_v24 }
  0xf0   :  { %s2151_s28 = sld [smem:[#allocation2 + $0x7d]]  ;;  %v492_v13 = vstv %s3152_s26  ;;  %v2240_v8 = vmul.f32 %v527_v50, %v505_v24 }
  0xf1   :  { %s2159_s27 = sld [smem:[#allocation2 + $0x7e]]  ;;  %v495_v16 = vstv %s3153_s24  ;;  %v2190_v26 = vmul.f32 %v492_v13, %v2060_v32  ;;  %v547_v13 = vstv %s2026_s9 }
  0xf2   :  { %v498_v17 = vstv %s3154_s4  ;;  %s2169_s6 = sld [smem:[#allocation2 + $0x7f]]  ;;  %v2195_v27 = vmul.f32 %v495_v16, %v2060_v32 }
  0xf3   :  { %s3156_s23 = sld [smem:[#allocation83_spill]]  ;;  %v2198_v28 = vmul.f32 %v498_v17, %v2060_v32  ;;  %v2216_v32 = vmul.f32 %v506_v31, %v505_v24  ;;  %v553_v17 = vstv %s2030_s20 }
  0xf4   :  { %s3157_s25 = sld [smem:[#allocation84_spill]] }
  0xf5   :  { %s3158_s14 = sld [smem:[#allocation39_spill]]  ;;  %v530_v21 = vstv %s3155_s2 }
  0xf6   :  { %s2181_s26 = sld [smem:[#allocation2 + $0x80]]  ;;  %v531_v41 = vmul.f32 %v530_v21, %v1996_v0  ;;  %v556_v21 = vstv %s2035_s11 }
  0xf7   :  { %s3159_s4 = sld [smem:[#allocation12_spill]] }
  0xf8   :  { %s2192_s7 = sld [smem:[#allocation2 + $0x81]] }
  0xf9   :  { %s2202_s15 = sld [smem:[#allocation2 + $0x82]]  ;;  %v512_v36 = vstv %s3156_s23 }
  0xfa   :  { %v515_v38 = vstv %s3157_s25  ;;  %s2208_s24 = sld [smem:[#allocation2 + $0x83]]  ;;  %v2225_v59 = vmul.f32 %v512_v36, %v505_v24 }
  0xfb   :  { %v532_v43 = vstv %s3158_s14  ;;  %s2214_s2 = sld [smem:[#allocation2 + $0x84]]  ;;  %v2227_v63 = vmul.f32 %v515_v38, %v505_v24 }
  0xfc   :  { %s3163_s3 = sld [smem:[#allocation40_spill]]  ;;  %v533_v1 = vadd.f32 %v532_v43, %v531_v41 }
  0xfd   :  { %v559_v47 = vstv %s3159_s4  ;;  %s2221_s17 = sld [smem:[#allocation2 + $0x140]] }
  0xfe   :  { %s3164_s23 = sld [smem:[#allocation85_spill]]  ;;  %v560_v7 = vmul.f32 %v559_v47, %v1996_v0  ;;  %v2253_v24 = vmax.f32 %v533_v1, 0.0 }
  0xff   :  { %3160 = sst [smem:[#allocation70_spill]] %s2202_s15 }
 0x100   :  { %3161 = sst [smem:[#allocation71_spill]] %s2208_s24  ;;  %v2282_v44 = vmul.f32 %v535_v51, %v2253_v24  ;;  %v2285_v47 = vmul.f32 %v538_v52, %v2253_v24  ;;  %v2293_v31 = vmul.f32 %v541_v9, %v2253_v24 }
 0x101   :  { %3162 = sst [smem:[#allocation72_spill]] %s2214_s2 }
 0x102   :  { %s2229_s21 = sld [smem:[#allocation2 + $0x141]]  ;;  %v561_v12 = vstv %s3163_s3 }
 0x103   :  { %s3165_s29 = sld [smem:[#allocation86_spill]]  ;;  %v2260_v38 = vadd.f32 %v561_v12, %v560_v7  ;;  %v377_v45 = vstv %s2221_s17 }
 0x104   :  { %s2238_s30 = sld [smem:[#allocation2 + $0x142]]  ;;  %v550_v16 = vstv %s3164_s23  ;;  %v392_v36 = vadd.f32 %v2047_v25, %v377_v45 }
 0x105   :  { %s3166_s13 = sld [smem:[#allocation78_spill]] }
 0x106   :  { %s3167_s16 = sld [smem:[#allocation66_spill]]  ;;  %v421_v45 = vadd.f32 %v2057_v30, %v392_v36 }
 0x107   :  { %s2245_s18 = sld [smem:[#allocation2 + $0x143]] }
 0x108   :  { %s3168_s25 = sld [smem:[#allocation69_spill]]  ;;  %v378_v1 = vstv %s2229_s21  ;;  %v450_v9 = vadd.f32 %v2080_v40, %v421_v45 }
 0x109   :  { %s3169_s14 = sld [smem:[#allocation13_spill]]  ;;  %v395_v12 = vadd.f32 %v2054_v29, %v378_v1  ;;  %v2301_v1 = vmul.f32 %v544_v11, %v2253_v24 }
 0x10a   :  { %s2251_s4 = sld [smem:[#allocation2 + $0x144]]  ;;  %v379_v7 = vstv %s2238_s30 }
 0x10b   :  { %s3170_s0 = sld [smem:[#allocation41_spill]]  ;;  %v573_v41 = vstv %s3166_s13  ;;  %v398_v25 = vadd.f32 %v2064_v33, %v379_v7  ;;  %v424_v52 = vadd.f32 %v2067_v34, %v395_v12 }
 0x10c   :  { %s3171_s19 = sld [smem:[#allocation73_spill]] }
 0x10d   :  { %s2258_s3 = sld [smem:[#allocation2 + $0x145]]  ;;  %v380_v46 = vstv %s2245_s18  ;;  %v427_v30 = vadd.f32 %v2077_v39, %v398_v25  ;;  %v453_v34 = vadd.f32 %v2086_v42, %v424_v52  ;;  %v479_v42 = vadd.f32 %v2096_v48, %v450_v9 }
 0x10e   :  { %s2265_s2 = sld [smem:[#allocation2 + $0x146]]  ;;  %v401_v51 = vadd.f32 %v2073_v37, %v380_v46  ;;  %v3179_v25 = vstv %s2045_s10  ;;  %v3181_v52 = vstv %s3165_s29  ;;  %v3182_v9 = vstv %s2071_s5 }
 0x10f   :  { %v588_v50 = vstv %s3169_s14  ;;  %s2271_s24 = sld [smem:[#allocation2 + $0x147]]  ;;  %v456_v39 = vadd.f32 %v2112_v55, %v427_v30  ;;  %v548_v55 = vmul.f32 %v547_v13, %v2253_v24 }
 0x110   :  { %s2277_s15 = sld [smem:[#allocation2 + $0x85]]  ;;  %v381_v29 = vstv %s2251_s4  ;;  %v430_v37 = vadd.f32 %v2108_v53, %v401_v51  ;;  %v608_v51 = vstv %s2151_s28 }
 0x111   :  { %v590_v35 = vstv %s3170_s0  ;;  %s2287_s17 = sld [smem:[#allocation2 + $0x86]]  ;;  %v404_v33 = vadd.f32 %v2100_v49, %v381_v29  ;;  %v485_v48 = vadd.f32 %v2178_v20, %v456_v39  ;;  %v508_v20 = vadd.f32 %v2216_v32, %v479_v42 }
 0x112   :  { %s2295_s21 = sld [smem:[#allocation2 + $0x87]]  ;;  %v459_v53 = vadd.f32 %v2126_v60, %v430_v37 }
 0x113   :  { %s2303_s30 = sld [smem:[#allocation2 + $0x88]]  ;;  %v382_v43 = vstv %s2258_s3  ;;  %v433_v49 = vadd.f32 %v2122_v58, %v404_v33 }
 0x114   :  { %s2309_s18 = sld [smem:[#allocation2 + $0x89]]  ;;  %v383_v36 = vstv %s2265_s2  ;;  %v407_v7 = vadd.f32 %v2119_v57, %v382_v43  ;;  %v482_v43 = vadd.f32 %v2115_v56, %v453_v34 }
 0x115   :  { %s2315_s4 = sld [smem:[#allocation2 + $0x8a]]  ;;  %v384_v11 = vstv %s2271_s24  ;;  %v410_v46 = vadd.f32 %v2130_v61, %v383_v36  ;;  %v462_v58 = vadd.f32 %v2162_v14, %v433_v49 }
 0x116   :  { %s2321_s3 = sld [smem:[#allocation2 + $0x8b]]  ;;  %v413_v40 = vadd.f32 %v2132_v62, %v384_v11  ;;  %v436_v57 = vadd.f32 %v2139_v2, %v407_v7  ;;  %v551_v2 = vmul.f32 %v550_v16, %v2253_v24  ;;  %v511_v13 = vadd.f32 %v2223_v54, %v482_v43 }
 0x117   :  { %s2327_s2 = sld [smem:[#allocation2 + $0x8c]]  ;;  %v439_v61 = vadd.f32 %v2147_v6, %v410_v46  ;;  %v488_v6 = vadd.f32 %v2184_v22, %v459_v53  ;;  %v491_v14 = vadd.f32 %v2187_v23, %v462_v58  ;;  %v557_v16 = vmul.f32 %v556_v21, %v2253_v24 }
 0x118   :  { %s2335_s24 = sld [smem:[#allocation2 + $0x8d]]  ;;  %v442_v62 = vadd.f32 %v2154_v10, %v413_v40  ;;  %v465_v60 = vadd.f32 %v2165_v15, %v436_v57  ;;  %v554_v10 = vmul.f32 %v553_v17, %v2253_v24  ;;  %v514_v54 = vadd.f32 %v2225_v59, %v485_v48 }
 0x119   :  { %v468_v56 = vadd.f32 %v2172_v18, %v439_v61  ;;  %s3175_s9 = sld [smem:[#allocation67_spill]]  ;;  %v563_v18 = vmax.f32 %v2260_v38, 0.0  ;;  %v520_v21 = vadd.f32 %v2231_v3, %v491_v14  ;;  %v602_v24 = vstv %s2136_s22 }
 0x11a   :  { %v471_v15 = vadd.f32 %v2175_v19, %v442_v62  ;;  %s2357_s23 = sld [smem:[#allocation2 + $0x90]]  ;;  %v494_v22 = vadd.f32 %v2190_v26, %v465_v60  ;;  %v589_v19 = vmul.f32 %v588_v50, %v1996_v0  ;;  %v605_v38 = vstv %s2144_s8 }
 0x11b   :  { %v497_v23 = vadd.f32 %v2195_v27, %v468_v56  ;;  %s2367_s20 = sld [smem:[#allocation2 + $0x91]]  ;;  %v517_v27 = vadd.f32 %v2227_v63, %v488_v6  ;;  %v540_v59 = vadd.f32 %v2285_v47, %v511_v13  ;;  %v3178_v50 = vstv %s2039_s12 }
 0x11c   :  { %3172 = sst [smem:[#allocation79_spill]] %s2321_s3  ;;  %v500_v32 = vadd.f32 %v2198_v28, %v471_v15  ;;  %v537_v28 = vadd.f32 %v2282_v44, %v508_v20  ;;  %v565_v12 = vmul.f32 %v3178_v50, %v563_v18  ;;  %v568_v45 = vmul.f32 %v3179_v25, %v563_v18 }
 0x11d   :  { %3173 = sst [smem:[#allocation74_spill]] %s2327_s2  ;;  %v523_v63 = vadd.f32 %v2233_v4, %v494_v22  ;;  %v526_v3 = vadd.f32 %v2235_v5, %v497_v23  ;;  %v591_v29 = vadd.f32 %v590_v35, %v589_v19  ;;  %v543_v47 = vadd.f32 %v2293_v31, %v514_v54 }
 0x11e   :  { %3174 = sst [smem:[#allocation75_spill]] %s2335_s24  ;;  %v529_v44 = vadd.f32 %v2240_v8, %v500_v32  ;;  %v571_v33 = vmul.f32 %v3181_v52, %v563_v18  ;;  %v574_v30 = vmul.f32 %v573_v41, %v563_v18  ;;  %v546_v4 = vadd.f32 %v2301_v1, %v517_v27 }
 0x11f   :  { %s2343_s2 = sld [smem:[#allocation2 + $0x8e]]  ;;  %v596_v17 = vstv %s3175_s9  ;;  %v549_v5 = vadd.f32 %v548_v55, %v520_v21  ;;  %v577_v35 = vmul.f32 %v3182_v9, %v563_v18  ;;  %v566_v8 = vadd.f32 %v565_v12, %v537_v28 }
 0x120   :  { %s3176_s24 = sld [smem:[#allocation68_spill]]  ;;  %v569_v7 = vadd.f32 %v568_v45, %v540_v59  ;;  %v3184_v31 = vstv %s3167_s16  ;;  %v592_v34 = vmax.f32 %v591_v29, 0.0  ;;  %v552_v41 = vadd.f32 %v551_v2, %v523_v63 }
 0x121   :  { %s2351_s3 = sld [smem:[#allocation2 + $0x8f]]  ;;  %v580_v37 = vmul.f32 %v3184_v31, %v563_v18  ;;  %v555_v1 = vadd.f32 %v554_v10, %v526_v3  ;;  %v3185_v11 = vstv %s2090_s1  ;;  %v558_v39 = vadd.f32 %v557_v16, %v529_v44 }
 0x122   :  { %3177 = sst [smem:[#allocation38_spill]] %s2357_s23  ;;  %v583_v46 = vmul.f32 %v3185_v11, %v563_v18  ;;  %v572_v40 = vadd.f32 %v571_v33, %v543_v47  ;;  %v3186_v57 = vstv %s3168_s25  ;;  %v575_v61 = vadd.f32 %v574_v30, %v546_v4 }
 0x123   :  { %s2373_s23 = sld [smem:[#allocation2 + $0x92]]  ;;  %v586_v53 = vmul.f32 %v3186_v57, %v563_v18  ;;  %v578_v58 = vadd.f32 %v577_v35, %v549_v5  ;;  %v611_v43 = vstv %s2159_s27  ;;  %v614_v55 = vstv %s2169_s6 }
 0x124   :  { %s2379_s11 = sld [smem:[#allocation2 + $0x93]]  ;;  %v3188_v62 = vstv %s3171_s19  ;;  %v597_v48 = vmul.f32 %v596_v17, %v592_v34  ;;  %v603_v56 = vmul.f32 %v602_v24, %v592_v34  ;;  %v581_v6 = vadd.f32 %v580_v37, %v552_v41 }
 0x125   :  { %s3180_s14 = sld [smem:[#allocation14_spill]]  ;;  %v594_v60 = vmul.f32 %v3188_v62, %v592_v34  ;;  %v584_v14 = vadd.f32 %v583_v46, %v555_v1  ;;  %v606_v10 = vmul.f32 %v605_v38, %v592_v34  ;;  %v587_v20 = vadd.f32 %v586_v53, %v558_v39 }
 0x126   :  { %v599_v26 = vstv %s3176_s24  ;;  %s2387_s24 = sld [smem:[#allocation2 + $0x94]]  ;;  %v622_v13 = vstv %s2181_s26  ;;  %v625_v18 = vstv %s2192_s7  ;;  %v609_v23 = vmul.f32 %v608_v51, %v592_v34 }
 0x127   :  { %s2394_s22 = sld [smem:[#allocation2 + $0x95]]  ;;  %v600_v2 = vmul.f32 %v599_v26, %v592_v34  ;;  %v612_v16 = vmul.f32 %v611_v43, %v592_v34  ;;  %v615_v19 = vmul.f32 %v614_v55, %v592_v34  ;;  %v595_v54 = vadd.f32 %v594_v60, %v566_v8 }
 0x128   :  { %s2402_s10 = sld [smem:[#allocation2 + $0x96]]  ;;  %v598_v17 = vadd.f32 %v597_v48, %v569_v7  ;;  %v604_v27 = vadd.f32 %v603_v56, %v575_v61  ;;  %v607_v21 = vadd.f32 %v606_v10, %v578_v58  ;;  %v637_v50 = vstv %s2277_s15 }
 0x129   :  { %s3183_s12 = sld [smem:[#allocation42_spill]]  ;;  %v601_v26 = vadd.f32 %v600_v2, %v572_v40  ;;  %v640_v12 = vstv %s2287_s17  ;;  %v610_v45 = vadd.f32 %v609_v23, %v581_v6  ;;  %v613_v63 = vadd.f32 %v612_v16, %v584_v14 }
 0x12a   :  { %s2408_s8 = sld [smem:[#allocation2 + $0x97]]  ;;  %v643_v29 = vstv %s2295_s21  ;;  %v616_v51 = vadd.f32 %v615_v19, %v587_v20  ;;  %v651_v35 = vstv %s2303_s30  ;;  %v657_v31 = vstv %s2315_s4 }
 0x12b   :  { %v617_v36 = vstv %s3180_s14  ;;  %s2412_s28 = sld [smem:[#allocation2 + $0x98]]  ;;  %v669_v61 = vstv %s2343_s2  ;;  %v672_v43 = vstv %s2351_s3  ;;  %v683_v62 = vstv %s2367_s20 }
 0x12c   :  { %v618_v49 = vmul.f32 %v617_v36, %v1996_v0  ;;  %s2417_s5 = sld [smem:[#allocation2 + $0x99]]  ;;  %v654_v36 = vstv %s2309_s18  ;;  %v686_v60 = vstv %s2373_s23  ;;  %v692_v19 = vstv %s2387_s24 }
 0x12d   :  { %s2422_s29 = sld [smem:[#allocation2 + $0x9a]] }
 0x12e   :  { %s3187_s13 = sld [smem:[#allocation15_spill]] }
 0x12f   :  { %v619_v42 = vstv %s3183_s12  ;;  %s2426_s1 = sld [smem:[#allocation2 + $0x9b]] }
 0x130   :  { %s2430_s16 = sld [smem:[#allocation2 + $0x9c]]  ;;  %v620_v15 = vadd.f32 %v619_v42, %v618_v49 }
 0x131   :  { %s2432_s25 = sld [smem:[#allocation2 + $0x9d]] }
 0x132   :  { %s3189_s0 = sld [smem:[#allocation70_spill]]  ;;  %v621_v32 = vmax.f32 %v620_v15, 0.0 }
 0x133   :  { %s3190_s27 = sld [smem:[#allocation71_spill]] }
 0x134   :  { %v646_v22 = vstv %s3187_s13  ;;  %s2437_s6 = sld [smem:[#allocation2 + $0x9e]]  ;;  %v623_v3 = vmul.f32 %v622_v13, %v621_v32  ;;  %v626_v44 = vmul.f32 %v625_v18, %v621_v32  ;;  %v638_v30 = vmul.f32 %v637_v50, %v621_v32 }
 0x135   :  { %s3191_s19 = sld [smem:[#allocation72_spill]]  ;;  %v647_v28 = vmul.f32 %v646_v22, %v1996_v0  ;;  %v641_v4 = vmul.f32 %v640_v12, %v621_v32  ;;  %v644_v9 = vmul.f32 %v643_v29, %v621_v32  ;;  %v689_v22 = vstv %s2379_s11 }
 0x136   :  { %s3192_s9 = sld [smem:[#allocation43_spill]]  ;;  %v624_v7 = vadd.f32 %v623_v3, %v595_v54  ;;  %v627_v41 = vadd.f32 %v626_v44, %v598_v17  ;;  %v639_v39 = vadd.f32 %v638_v30, %v610_v45  ;;  %v709_v45 = vstv %s2412_s28 }
 0x137   :  { %s2439_s14 = sld [smem:[#allocation2 + $0x9f]]  ;;  %v642_v40 = vadd.f32 %v641_v4, %v613_v63  ;;  %v645_v53 = vadd.f32 %v644_v9, %v616_v51  ;;  %v712_v3 = vstv %s2417_s5  ;;  %v715_v29 = vstv %s2422_s29 }
 0x138   :  { %s2441_s26 = sld [smem:[#allocation2 + $0xa0]]  ;;  %v628_v24 = vstv %s3189_s0  ;;  %v718_v9 = vstv %s2426_s1 }
 0x139   :  { %v631_v38 = vstv %s3190_s27  ;;  %s2446_s7 = sld [smem:[#allocation2 + $0xa1]]  ;;  %v629_v47 = vmul.f32 %v628_v24, %v621_v32 }
 0x13a   :  { %s2452_s12 = sld [smem:[#allocation2 + $0xa2]]  ;;  %v632_v52 = vmul.f32 %v631_v38, %v621_v32 }
 0x13b   :  { %v634_v59 = vstv %s3191_s19  ;;  %s3194_s13 = sld [smem:[#allocation16_spill]]  ;;  %v630_v1 = vadd.f32 %v629_v47, %v601_v26 }
 0x13c   :  { %v648_v25 = vstv %s3192_s9  ;;  %s3196_s0 = sld [smem:[#allocation79_spill]]  ;;  %v635_v33 = vmul.f32 %v634_v59, %v621_v32  ;;  %v633_v11 = vadd.f32 %v632_v52, %v604_v27  ;;  %v695_v32 = vstv %s2394_s22 }
 0x13d   :  { %s3197_s27 = sld [smem:[#allocation74_spill]]  ;;  %v649_v5 = vadd.f32 %v648_v25, %v647_v28  ;;  %v698_v27 = vstv %s2402_s10 }
 0x13e   :  { %3193 = sst [smem:[#allocation76_spill]] %s2441_s26  ;;  %v636_v49 = vadd.f32 %v635_v33, %v607_v21  ;;  %v701_v21 = vstv %s2408_s8 }
 0x13f   :  { %s2455_s26 = sld [smem:[#allocation2 + $0xa3]]  ;;  %v650_v46 = vmax.f32 %v649_v5, 0.0 }
 0x140   :  { %s2457_s15 = sld [smem:[#allocation2 + $0xa4]] }
 0x141   :  { %s2459_s17 = sld [smem:[#allocation2 + $0xa5]]  ;;  %v675_v8 = vstv %s3194_s13  ;;  %v652_v48 = vmul.f32 %v651_v35, %v650_v46  ;;  %v655_v2 = vmul.f32 %v654_v36, %v650_v46  ;;  %v658_v56 = vmul.f32 %v657_v31, %v650_v46 }
 0x142   :  { %s2464_s21 = sld [smem:[#allocation2 + $0xa6]]  ;;  %v660_v37 = vstv %s3196_s0  ;;  %v676_v57 = vmul.f32 %v675_v8, %v1996_v0  ;;  %v670_v13 = vmul.f32 %v669_v61, %v650_v46  ;;  %v673_v18 = vmul.f32 %v672_v43, %v650_v46 }
 0x143   :  { %s3199_s19 = sld [smem:[#allocation75_spill]]  ;;  %v663_v34 = vstv %s3197_s27  ;;  %v661_v6 = vmul.f32 %v660_v37, %v650_v46  ;;  %v653_v17 = vadd.f32 %v652_v48, %v624_v7  ;;  %v656_v26 = vadd.f32 %v655_v2, %v627_v41 }
 0x144   :  { %s3200_s9 = sld [smem:[#allocation44_spill]]  ;;  %v664_v14 = vmul.f32 %v663_v34, %v650_v46  ;;  %v659_v24 = vadd.f32 %v658_v56, %v630_v1  ;;  %v671_v50 = vadd.f32 %v670_v13, %v642_v40  ;;  %v674_v12 = vadd.f32 %v673_v18, %v645_v53 }
 0x145   :  { %3195 = sst [smem:[#allocation77_spill]] %s2455_s26  ;;  %v662_v38 = vadd.f32 %v661_v6, %v633_v11  ;;  %v721_v36 = vstv %s2430_s16  ;;  %v724_v8 = vstv %s2432_s25  ;;  %v727_v7 = vstv %s2437_s6 }
 0x146   :  { %3198 = sst [smem:[#allocation80_spill]] %s2457_s15  ;;  %v665_v28 = vadd.f32 %v664_v14, %v636_v49  ;;  %v730_v37 = vstv %s2439_s14 }
 0x147   :  { %s2469_s15 = sld [smem:[#allocation2 + $0xa7]] }
 0x148   :  { %s3201_s26 = sld [smem:[#allocation38_spill]] }
 0x149   :  { %s2471_s30 = sld [smem:[#allocation2 + $0xa8]]  ;;  %v666_v42 = vstv %s3199_s19 }
 0x14a   :  { %s2474_s18 = sld [smem:[#allocation2 + $0xa9]]  ;;  %v677_v58 = vstv %s3200_s9  ;;  %v667_v10 = vmul.f32 %v666_v42, %v650_v46 }
 0x14b   :  { %s3202_s4 = sld [smem:[#allocation17_spill]]  ;;  %v678_v15 = vadd.f32 %v677_v58, %v676_v57 }
 0x14c   :  { %s2479_s13 = sld [smem:[#allocation2 + $0xaa]]  ;;  %v668_v59 = vadd.f32 %v667_v10, %v639_v39  ;;  %v741_v10 = vstv %s2446_s7 }
 0x14d   :  { %s2485_s0 = sld [smem:[#allocation2 + $0xab]]  ;;  %v679_v16 = vmax.f32 %v678_v15, 0.0  ;;  %v744_v15 = vstv %s2452_s12 }
 0x14e   :  { %v680_v55 = vstv %s3201_s26  ;;  %s3203_s27 = sld [smem:[#allocation45_spill]] }
 0x14f   :  { %s2487_s19 = sld [smem:[#allocation2 + $0xac]]  ;;  %v681_v63 = vmul.f32 %v680_v55, %v679_v16  ;;  %v684_v44 = vmul.f32 %v683_v62, %v679_v16  ;;  %v687_v47 = vmul.f32 %v686_v60, %v679_v16  ;;  %v690_v52 = vmul.f32 %v689_v22, %v679_v16 }
 0x150   :  { %s2490_s3 = sld [smem:[#allocation2 + $0xad]]  ;;  %v693_v33 = vmul.f32 %v692_v19, %v679_v16  ;;  %v696_v30 = vmul.f32 %v695_v32, %v679_v16  ;;  %v699_v4 = vmul.f32 %v698_v27, %v679_v16  ;;  %v702_v5 = vmul.f32 %v701_v21, %v679_v16 }
 0x151   :  { %v704_v20 = vstv %s3202_s4  ;;  %s2494_s2 = sld [smem:[#allocation2 + $0xae]]  ;;  %v682_v31 = vadd.f32 %v681_v63, %v653_v17  ;;  %v685_v1 = vadd.f32 %v684_v44, %v656_v26  ;;  %v688_v11 = vadd.f32 %v687_v47, %v659_v24 }
 0x152   :  { %v705_v23 = vmul.f32 %v704_v20, %v1996_v0  ;;  %s2499_s23 = sld [smem:[#allocation2 + $0xaf]]  ;;  %v691_v46 = vadd.f32 %v690_v52, %v662_v38  ;;  %v694_v49 = vadd.f32 %v693_v33, %v665_v28  ;;  %v697_v39 = vadd.f32 %v696_v30, %v668_v59 }
 0x153   :  { %s3204_s20 = sld [smem:[#allocation18_spill]]  ;;  %v700_v40 = vadd.f32 %v699_v4, %v671_v50  ;;  %v703_v57 = vadd.f32 %v702_v5, %v674_v12  ;;  %v753_v16 = vstv %s2459_s17  ;;  %v756_v24 = vstv %s2464_s21 }
 0x154   :  { %v706_v54 = vstv %s3203_s27  ;;  %s2503_s26 = sld [smem:[#allocation2 + $0xb0]]  ;;  %v759_v38 = vstv %s2469_s15  ;;  %v767_v28 = vstv %s2471_s30  ;;  %v770_v59 = vstv %s2474_s18 }
 0x155   :  { %s2505_s11 = sld [smem:[#allocation2 + $0xb1]]  ;;  %v707_v25 = vadd.f32 %v706_v54, %v705_v23  ;;  %v773_v50 = vstv %s2479_s13  ;;  %v776_v52 = vstv %s2485_s0  ;;  %v779_v33 = vstv %s2487_s19 }
 0x156   :  { %s2508_s24 = sld [smem:[#allocation2 + $0xb2]]  ;;  %v782_v30 = vstv %s2490_s3 }
 0x157   :  { %s2513_s22 = sld [smem:[#allocation2 + $0xb3]]  ;;  %v708_v35 = vmax.f32 %v707_v25, 0.0  ;;  %v785_v5 = vstv %s2494_s2 }
 0x158   :  { %s3205_s10 = sld [smem:[#allocation46_spill]] }
 0x159   :  { %v733_v51 = vstv %s3204_s20  ;;  %s2515_s8 = sld [smem:[#allocation2 + $0xb4]]  ;;  %v710_v42 = vmul.f32 %v709_v45, %v708_v35  ;;  %v713_v61 = vmul.f32 %v712_v3, %v708_v35  ;;  %v716_v58 = vmul.f32 %v715_v29, %v708_v35 }
 0x15a   :  { %s2518_s28 = sld [smem:[#allocation2 + $0xb5]]  ;;  %v734_v34 = vmul.f32 %v733_v51, %v1996_v0  ;;  %v719_v43 = vmul.f32 %v718_v9, %v708_v35  ;;  %v722_v55 = vmul.f32 %v721_v36, %v708_v35  ;;  %v725_v62 = vmul.f32 %v724_v8, %v708_v35 }
 0x15b   :  { %s3206_s5 = sld [smem:[#allocation76_spill]]  ;;  %v728_v2 = vmul.f32 %v727_v7, %v708_v35  ;;  %v731_v56 = vmul.f32 %v730_v37, %v708_v35  ;;  %v711_v18 = vadd.f32 %v710_v42, %v682_v31  ;;  %v714_v22 = vadd.f32 %v713_v61, %v685_v1 }
 0x15c   :  { %s2523_s29 = sld [smem:[#allocation2 + $0xb6]]  ;;  %v717_v19 = vadd.f32 %v716_v58, %v688_v11  ;;  %v720_v32 = vadd.f32 %v719_v43, %v691_v46  ;;  %v723_v54 = vadd.f32 %v722_v55, %v694_v49  ;;  %v726_v26 = vadd.f32 %v725_v62, %v697_v39 }
 0x15d   :  { %s2528_s9 = sld [smem:[#allocation2 + $0xb7]]  ;;  %v729_v27 = vadd.f32 %v728_v2, %v700_v40  ;;  %v732_v21 = vadd.f32 %v731_v56, %v703_v57  ;;  %v788_v9 = vstv %s2499_s23  ;;  %v796_v58 = vstv %s2503_s26 }
 0x15e   :  { %v735_v41 = vstv %s3205_s10  ;;  %s3207_s1 = sld [smem:[#allocation19_spill]]  ;;  %v799_v62 = vstv %s2505_s11 }
 0x15f   :  { %s2530_s4 = sld [smem:[#allocation2 + $0xb8]]  ;;  %v736_v60 = vadd.f32 %v735_v41, %v734_v34 }
 0x160   :  { %s3208_s16 = sld [smem:[#allocation47_spill]] }
 0x161   :  { %v738_v53 = vstv %s3206_s5  ;;  %s2533_s25 = sld [smem:[#allocation2 + $0xb9]]  ;;  %v737_v23 = vmax.f32 %v736_v60, 0.0  ;;  %v802_v60 = vstv %s2508_s24 }
 0x162   :  { %s3209_s6 = sld [smem:[#allocation77_spill]] }
 0x163   :  { %s3210_s14 = sld [smem:[#allocation80_spill]]  ;;  %v739_v12 = vmul.f32 %v738_v53, %v737_v23  ;;  %v742_v25 = vmul.f32 %v741_v10, %v737_v23  ;;  %v745_v45 = vmul.f32 %v744_v15, %v737_v23  ;;  %v754_v29 = vmul.f32 %v753_v16, %v737_v23 }
 0x164   :  { %s2535_s27 = sld [smem:[#allocation2 + $0xba]]  ;;  %v762_v48 = vstv %s3207_s1  ;;  %v757_v47 = vmul.f32 %v756_v24, %v737_v23  ;;  %v760_v4 = vmul.f32 %v759_v38, %v737_v23  ;;  %v811_v16 = vstv %s2518_s28 }
 0x165   :  { %s2538_s20 = sld [smem:[#allocation2 + $0xbb]]  ;;  %v763_v6 = vmul.f32 %v762_v48, %v1996_v0  ;;  %v740_v36 = vadd.f32 %v739_v12, %v711_v18  ;;  %v743_v8 = vadd.f32 %v742_v25, %v714_v22  ;;  %v746_v7 = vadd.f32 %v745_v45, %v717_v19 }
 0x166   :  { %v764_v14 = vstv %s3208_s16  ;;  %s2542_s10 = sld [smem:[#allocation2 + $0xbc]]  ;;  %v755_v41 = vadd.f32 %v754_v29, %v726_v26  ;;  %v758_v11 = vadd.f32 %v757_v47, %v729_v27  ;;  %v761_v42 = vadd.f32 %v760_v4, %v732_v21 }
 0x167   :  { %s2548_s5 = sld [smem:[#allocation2 + $0xbd]]  ;;  %v765_v17 = vadd.f32 %v764_v14, %v763_v6  ;;  %v805_v48 = vstv %s2513_s22  ;;  %v828_v26 = vstv %s2533_s25 }
 0x168   :  { %v747_v20 = vstv %s3209_s6  ;;  %s2551_s1 = sld [smem:[#allocation2 + $0xbe]] }
 0x169   :  { %v750_v13 = vstv %s3210_s14  ;;  %s2553_s7 = sld [smem:[#allocation2 + $0xbf]]  ;;  %v748_v63 = vmul.f32 %v747_v20, %v737_v23  ;;  %v766_v51 = vmax.f32 %v765_v17, 0.0  ;;  %v825_v17 = vstv %s2530_s4 }
 0x16a   :  { %s3211_s12 = sld [smem:[#allocation20_spill]]  ;;  %v751_v3 = vmul.f32 %v750_v13, %v737_v23  ;;  %v2599_v13 = vld [vmem:[#allocation6] sm:$0xff]  ;;  %v808_v23 = vstv %s2515_s8 }
 0x16b   :  { %s2556_s16 = sld [smem:[#allocation2 + $0xc0]]  ;;  %v749_v37 = vadd.f32 %v748_v63, %v720_v32  ;;  %v768_v1 = vmul.f32 %v767_v28, %v766_v51  ;;  %v771_v46 = vmul.f32 %v770_v59, %v766_v51  ;;  %v777_v49 = vmul.f32 %v776_v52, %v766_v51 }
 0x16c   :  { %s2562_s17 = sld [smem:[#allocation2 + $0xc1]]  ;;  %v752_v34 = vadd.f32 %v751_v3, %v723_v54  ;;  %v780_v39 = vmul.f32 %v779_v33, %v766_v51  ;;  %v783_v40 = vmul.f32 %v782_v30, %v766_v51  ;;  %v786_v57 = vmul.f32 %v785_v5, %v766_v51 }
 0x16d   :  { %s2564_s6 = sld [smem:[#allocation2 + $0xc2]]  ;;  %v789_v61 = vmul.f32 %v788_v9, %v766_v51  ;;  %v769_v55 = vadd.f32 %v768_v1, %v740_v36  ;;  %v772_v2 = vadd.f32 %v771_v46, %v743_v8  ;;  %v778_v6 = vadd.f32 %v777_v49, %v749_v37 }
 0x16e   :  { %s3212_s15 = sld [smem:[#allocation48_spill]]  ;;  %v781_v10 = vadd.f32 %v780_v39, %v752_v34  ;;  %v784_v15 = vadd.f32 %v783_v40, %v755_v41  ;;  %v787_v20 = vadd.f32 %v786_v57, %v758_v11  ;;  %v814_v32 = vstv %s2523_s29 }
 0x16f   :  { %s2567_s21 = sld [smem:[#allocation2 + $0xc3]]  ;;  %v790_v22 = vadd.f32 %v789_v61, %v761_v42  ;;  %v817_v54 = vstv %s2528_s9  ;;  %v837_v47 = vstv %s2542_s10  ;;  %v840_v30 = vstv %s2548_s5 }
 0x170   :  { %v791_v44 = vstv %s3211_s12  ;;  %s2572_s30 = sld [smem:[#allocation2 + $0xc4]]  ;;  %v843_v4 = vstv %s2551_s1  ;;  %v846_v37 = vstv %s2553_s7 }
 0x171   :  { %v792_v35 = vmul.f32 %v791_v44, %v1996_v0  ;;  %s2577_s18 = sld [smem:[#allocation2 + $0xc5]]  ;;  %v774_v0 = vmul.f32 %v773_v50, %v766_v51  ;;  %v831_v51 = vstv %s2535_s27  ;;  %v834_v44 = vstv %s2538_s20 }
 0x172   :  { %s2580_s13 = sld [smem:[#allocation2 + $0xc6]]  ;;  %v854_v41 = vstv %s2556_s16  ;;  %v857_v1 = vstv %s2562_s17 }
 0x173   :  { %s3213_s0 = sld [smem:[#allocation21_spill]]  ;;  %v775_v56 = vadd.f32 %v774_v0, %v746_v7  ;;  %v860_v11 = vstv %s2564_s6 }
 0x174   :  { %v793_v31 = vstv %s3212_s15  ;;  %s2582_s19 = sld [smem:[#allocation2 + $0xc7]] }
 0x175   :  { %s2584_s3 = sld [smem:[#allocation2 + $0xc8]]  ;;  %v794_v53 = vadd.f32 %v793_v31, %v792_v35 }
 0x176   :  { %s2586_s2 = sld [smem:[#allocation2 + $0xc9]] }
 0x177   :  { %s2590_s23 = sld [smem:[#allocation2 + $0xca]]  ;;  %v795_v14 = vmax.f32 %v794_v53, 0.0 }
 0x178   :  { %s3214_s14 = sld [smem:[#allocation49_spill]] }
 0x179   :  { %v820_v43 = vstv %s3213_s0  ;;  %s2595_s12 = sld [smem:[#allocation2 + $0xcb]]  ;;  %v797_v27 = vmul.f32 %v796_v58, %v795_v14  ;;  %v800_v21 = vmul.f32 %v799_v62, %v795_v14  ;;  %v803_v24 = vmul.f32 %v802_v60, %v795_v14 }
 0x17a   :  { %s2597_s26 = sld [smem:[#allocation2 + $0xcc]]  ;;  %v821_v18 = vmul.f32 %v2599_v13, %v820_v43  ;;  %v806_v38 = vmul.f32 %v805_v48, %v795_v14  ;;  %v809_v28 = vmul.f32 %v808_v23, %v795_v14  ;;  %v812_v59 = vmul.f32 %v811_v16, %v795_v14 }
 0x17b   :  { %s2602_s11 = sld [smem:[#allocation2 + $0xcd]]  ;;  %v815_v25 = vmul.f32 %v814_v32, %v795_v14  ;;  %v818_v45 = vmul.f32 %v817_v54, %v795_v14  ;;  %v798_v52 = vadd.f32 %v797_v27, %v769_v55  ;;  %v801_v33 = vadd.f32 %v800_v21, %v772_v2 }
 0x17c   :  { %s3215_s24 = sld [smem:[#allocation22_spill]]  ;;  %v804_v5 = vadd.f32 %v803_v24, %v775_v56  ;;  %v807_v9 = vadd.f32 %v806_v38, %v778_v6  ;;  %v810_v35 = vadd.f32 %v809_v28, %v781_v10  ;;  %v813_v8 = vadd.f32 %v812_v59, %v784_v15 }
 0x17d   :  { %s2607_s22 = sld [smem:[#allocation2 + $0xce]]  ;;  %v816_v7 = vadd.f32 %v815_v25, %v787_v20  ;;  %v819_v31 = vadd.f32 %v818_v45, %v790_v22  ;;  %v863_v58 = vstv %s2567_s21  ;;  %v866_v43 = vstv %s2572_s30 }
 0x17e   :  { %v822_v19 = vstv %s3214_s14  ;;  %s3216_s15 = sld [smem:[#allocation50_spill]]  ;;  %v869_v55 = vstv %s2577_s18  ;;  %v872_v60 = vstv %s2580_s13  ;;  %v875_v48 = vstv %s2582_s19 }
 0x17f   :  { %s2613_s0 = sld [smem:[#allocation2 + $0xcf]]  ;;  %v823_v50 = vadd.f32 %v822_v19, %v821_v18  ;;  %v883_v24 = vstv %s2584_s3  ;;  %v886_v38 = vstv %s2586_s2 }
 0x180   :  { %s2615_s8 = sld [smem:[#allocation2 + $0xd0]]  ;;  %v895_v25 = vstv %s2597_s26 }
 0x181   :  { %s2618_s28 = sld [smem:[#allocation2 + $0xd1]]  ;;  %v824_v29 = vmax.f32 %v823_v50, 0.0  ;;  %v889_v50 = vstv %s2590_s23 }
 0x182   :  { %v849_v12 = vstv %s3215_s24  ;;  %s2622_s29 = sld [smem:[#allocation2 + $0xd2]] }
 0x183   :  { %v850_v63 = vmul.f32 %v2599_v13, %v849_v12  ;;  %s2627_s9 = sld [smem:[#allocation2 + $0xd3]]  ;;  %v826_v34 = vmul.f32 %v825_v17, %v824_v29  ;;  %v829_v46 = vmul.f32 %v828_v26, %v824_v29  ;;  %v832_v0 = vmul.f32 %v831_v51, %v824_v29 }
 0x184   :  { %v851_v3 = vstv %s3216_s15  ;;  %s2631_s4 = sld [smem:[#allocation2 + $0xd4]]  ;;  %v835_v49 = vmul.f32 %v834_v44, %v824_v29  ;;  %v838_v40 = vmul.f32 %v837_v47, %v824_v29  ;;  %v841_v57 = vmul.f32 %v840_v30, %v824_v29 }
 0x185   :  { %s3217_s25 = sld [smem:[#allocation23_spill]]  ;;  %v852_v36 = vadd.f32 %v851_v3, %v850_v63  ;;  %v844_v53 = vmul.f32 %v843_v4, %v824_v29  ;;  %v847_v61 = vmul.f32 %v846_v37, %v824_v29  ;;  %v827_v62 = vadd.f32 %v826_v34, %v798_v52 }
 0x186   :  { %s2633_s27 = sld [smem:[#allocation2 + $0xd5]]  ;;  %v830_v56 = vadd.f32 %v829_v46, %v801_v33  ;;  %v833_v6 = vadd.f32 %v832_v0, %v804_v5  ;;  %v836_v14 = vadd.f32 %v835_v49, %v807_v9  ;;  %v839_v15 = vadd.f32 %v838_v40, %v810_v35 }
 0x187   :  { %s2636_s20 = sld [smem:[#allocation2 + $0xd6]]  ;;  %v853_v42 = vmax.f32 %v852_v36, 0.0  ;;  %v842_v20 = vadd.f32 %v841_v57, %v813_v8  ;;  %v845_v18 = vadd.f32 %v844_v53, %v816_v7  ;;  %v848_v23 = vadd.f32 %v847_v61, %v819_v31 }
 0x188   :  { %s2641_s10 = sld [smem:[#allocation2 + $0xd7]]  ;;  %v892_v12 = vstv %s2595_s12  ;;  %v898_v30 = vstv %s2602_s11  ;;  %v901_v4 = vstv %s2607_s22  ;;  %v904_v9 = vstv %s2613_s0 }
 0x189   :  { %s2644_s5 = sld [smem:[#allocation2 + $0xd8]]  ;;  %v855_v22 = vmul.f32 %v854_v41, %v853_v42  ;;  %v858_v16 = vmul.f32 %v857_v1, %v853_v42  ;;  %v861_v19 = vmul.f32 %v860_v11, %v853_v42  ;;  %v864_v32 = vmul.f32 %v863_v58, %v853_v42 }
 0x18a   :  { %s3218_s1 = sld [smem:[#allocation51_spill]]  ;;  %v867_v54 = vmul.f32 %v866_v43, %v853_v42  ;;  %v870_v17 = vmul.f32 %v869_v55, %v853_v42  ;;  %v873_v26 = vmul.f32 %v872_v60, %v853_v42  ;;  %v876_v21 = vmul.f32 %v875_v48, %v853_v42 }
 0x18b   :  { %v878_v39 = vstv %s3217_s25  ;;  %s2646_s7 = sld [smem:[#allocation2 + $0xd9]]  ;;  %v856_v59 = vadd.f32 %v855_v22, %v827_v62  ;;  %v859_v45 = vadd.f32 %v858_v16, %v830_v56  ;;  %v862_v63 = vadd.f32 %v861_v19, %v833_v6 }
 0x18c   :  { %s2651_s16 = sld [smem:[#allocation2 + $0xda]]  ;;  %v879_v2 = vmul.f32 %v2599_v13, %v878_v39  ;;  %v865_v3 = vadd.f32 %v864_v32, %v836_v14  ;;  %v868_v51 = vadd.f32 %v867_v54, %v839_v15  ;;  %v871_v44 = vadd.f32 %v870_v17, %v842_v20 }
 0x18d   :  { %s2656_s17 = sld [smem:[#allocation2 + $0xdb]]  ;;  %v874_v47 = vadd.f32 %v873_v26, %v845_v18  ;;  %v877_v33 = vadd.f32 %v876_v21, %v848_v23  ;;  %v912_v35 = vstv %s2615_s8  ;;  %v915_v36 = vstv %s2618_s28 }
 0x18e   :  { %s2659_s6 = sld [smem:[#allocation2 + $0xdc]]  ;;  %v918_v8 = vstv %s2622_s29  ;;  %v921_v39 = vstv %s2627_s9  ;;  %v924_v53 = vstv %s2631_s4  ;;  %v927_v42 = vstv %s2633_s27 }
 0x18f   :  { %s3219_s21 = sld [smem:[#allocation24_spill]]  ;;  %v930_v55 = vstv %s2636_s20  ;;  %v933_v62 = vstv %s2641_s10  ;;  %v941_v15 = vstv %s2644_s5 }
 0x190   :  { %v880_v10 = vstv %s3218_s1  ;;  %s2661_s30 = sld [smem:[#allocation2 + $0xdd]] }
 0x191   :  { %s2663_s18 = sld [smem:[#allocation2 + $0xde]]  ;;  %v881_v27 = vadd.f32 %v880_v10, %v879_v2  ;;  %v944_v18 = vstv %s2646_s7 }
 0x192   :  { %s2665_s13 = sld [smem:[#allocation2 + $0xdf]]  ;;  %v947_v22 = vstv %s2651_s16 }
 0x193   :  { %s2670_s19 = sld [smem:[#allocation2 + $0xe0]]  ;;  %v882_v29 = vmax.f32 %v881_v27, 0.0  ;;  %v950_v21 = vstv %s2656_s17 }
 0x194   :  { %s3220_s14 = sld [smem:[#allocation52_spill]] }
 0x195   :  { %v907_v28 = vstv %s3219_s21  ;;  %s2675_s24 = sld [smem:[#allocation2 + $0xe1]]  ;;  %v884_v7 = vmul.f32 %v883_v24, %v882_v29  ;;  %v887_v31 = vmul.f32 %v886_v38, %v882_v29  ;;  %v890_v37 = vmul.f32 %v889_v50, %v882_v29 }
 0x196   :  { %s2677_s3 = sld [smem:[#allocation2 + $0xe2]]  ;;  %v908_v52 = vmul.f32 %v2599_v13, %v907_v28  ;;  %v893_v34 = vmul.f32 %v892_v12, %v882_v29  ;;  %v896_v41 = vmul.f32 %v895_v25, %v882_v29  ;;  %v899_v1 = vmul.f32 %v898_v30, %v882_v29 }
 0x197   :  { %s2680_s2 = sld [smem:[#allocation2 + $0xe3]]  ;;  %v902_v0 = vmul.f32 %v901_v4, %v882_v29  ;;  %v905_v49 = vmul.f32 %v904_v9, %v882_v29  ;;  %v885_v58 = vadd.f32 %v884_v7, %v856_v59  ;;  %v888_v43 = vadd.f32 %v887_v31, %v859_v45 }
 0x198   :  { %s3221_s23 = sld [smem:[#allocation25_spill]]  ;;  %v891_v60 = vadd.f32 %v890_v37, %v862_v63  ;;  %v894_v48 = vadd.f32 %v893_v34, %v865_v3  ;;  %v897_v2 = vadd.f32 %v896_v41, %v868_v51  ;;  %v900_v56 = vadd.f32 %v899_v1, %v871_v44 }
 0x199   :  { %s2685_s12 = sld [smem:[#allocation2 + $0xe4]]  ;;  %v903_v6 = vadd.f32 %v902_v0, %v874_v47  ;;  %v906_v14 = vadd.f32 %v905_v49, %v877_v33  ;;  %v953_v38 = vstv %s2659_s6  ;;  %v956_v28 = vstv %s2661_s30 }
 0x19a   :  { %v909_v5 = vstv %s3220_s14  ;;  %s2691_s26 = sld [smem:[#allocation2 + $0xe5]]  ;;  %v959_v59 = vstv %s2663_s18  ;;  %v962_v12 = vstv %s2665_s13  ;;  %v970_v33 = vstv %s2670_s19 }
 0x19b   :  { %s3222_s15 = sld [smem:[#allocation53_spill]]  ;;  %v910_v11 = vadd.f32 %v909_v5, %v908_v52  ;;  %v973_v1 = vstv %s2675_s24 }
 0x19c   :  { %s2693_s11 = sld [smem:[#allocation2 + $0xe6]] }
 0x19d   :  { %s2696_s22 = sld [smem:[#allocation2 + $0xe7]]  ;;  %v911_v57 = vmax.f32 %v910_v11, 0.0  ;;  %v976_v11 = vstv %s2677_s3 }
 0x19e   :  { %v936_v46 = vstv %s3221_s23  ;;  %s2700_s0 = sld [smem:[#allocation2 + $0xe8]] }
 0x19f   :  { %v937_v40 = vmul.f32 %v2599_v13, %v936_v46  ;;  %s2705_s8 = sld [smem:[#allocation2 + $0xe9]]  ;;  %v913_v20 = vmul.f32 %v912_v35, %v911_v57  ;;  %v916_v16 = vmul.f32 %v915_v36, %v911_v57  ;;  %v919_v19 = vmul.f32 %v918_v8, %v911_v57 }
 0x1a0   :  { %s3223_s28 = sld [smem:[#allocation26_spill]]  ;;  %v922_v32 = vmul.f32 %v921_v39, %v911_v57  ;;  %v925_v54 = vmul.f32 %v924_v53, %v911_v57  ;;  %v928_v17 = vmul.f32 %v927_v42, %v911_v57  ;;  %v931_v26 = vmul.f32 %v930_v55, %v911_v57 }
 0x1a1   :  { %v938_v61 = vstv %s3222_s15  ;;  %s2709_s29 = sld [smem:[#allocation2 + $0xea]]  ;;  %v934_v27 = vmul.f32 %v933_v62, %v911_v57  ;;  %v914_v50 = vadd.f32 %v913_v20, %v885_v58  ;;  %v917_v63 = vadd.f32 %v916_v16, %v888_v43 }
 0x1a2   :  { %s2711_s9 = sld [smem:[#allocation2 + $0xeb]]  ;;  %v939_v10 = vadd.f32 %v938_v61, %v937_v40  ;;  %v920_v3 = vadd.f32 %v919_v19, %v891_v60  ;;  %v923_v29 = vadd.f32 %v922_v32, %v894_v48  ;;  %v926_v51 = vadd.f32 %v925_v54, %v897_v2 }
 0x1a3   :  { %s2714_s4 = sld [smem:[#allocation2 + $0xec]]  ;;  %v929_v44 = vadd.f32 %v928_v17, %v900_v56  ;;  %v932_v47 = vadd.f32 %v931_v26, %v903_v6  ;;  %v935_v52 = vadd.f32 %v934_v27, %v906_v14  ;;  %v979_v46 = vstv %s2680_s2 }
 0x1a4   :  { %s2719_s25 = sld [smem:[#allocation2 + $0xed]]  ;;  %v940_v24 = vmax.f32 %v939_v10, 0.0  ;;  %v982_v0 = vstv %s2685_s12  ;;  %v985_v57 = vstv %s2691_s26  ;;  %v988_v60 = vstv %s2693_s11 }
 0x1a5   :  { %s3224_s27 = sld [smem:[#allocation54_spill]]  ;;  %v991_v48 = vstv %s2696_s22  ;;  %v999_v2 = vstv %s2700_s0  ;;  %v1002_v56 = vstv %s2705_s8 }
 0x1a6   :  { %v965_v23 = vstv %s3223_s28  ;;  %s2721_s20 = sld [smem:[#allocation2 + $0xee]]  ;;  %v942_v30 = vmul.f32 %v941_v15, %v940_v24  ;;  %v945_v4 = vmul.f32 %v944_v18, %v940_v24  ;;  %v948_v5 = vmul.f32 %v947_v22, %v940_v24 }
 0x1a7   :  { %s2724_s10 = sld [smem:[#allocation2 + $0xef]]  ;;  %v966_v25 = vmul.f32 %v2599_v13, %v965_v23  ;;  %v951_v9 = vmul.f32 %v950_v21, %v940_v24  ;;  %v954_v35 = vmul.f32 %v953_v38, %v940_v24  ;;  %v957_v36 = vmul.f32 %v956_v28, %v940_v24 }
 0x1a8   :  { %s2729_s5 = sld [smem:[#allocation2 + $0xf0]]  ;;  %v960_v31 = vmul.f32 %v959_v59, %v940_v24  ;;  %v963_v37 = vmul.f32 %v962_v12, %v940_v24  ;;  %v943_v49 = vadd.f32 %v942_v30, %v914_v50  ;;  %v946_v39 = vadd.f32 %v945_v4, %v917_v63 }
 0x1a9   :  { %s2734_s1 = sld [smem:[#allocation2 + $0xf1]]  ;;  %v949_v53 = vadd.f32 %v948_v5, %v920_v3  ;;  %v952_v42 = vadd.f32 %v951_v9, %v923_v29  ;;  %v955_v61 = vadd.f32 %v954_v35, %v926_v51  ;;  %v958_v43 = vadd.f32 %v957_v36, %v929_v44 }
 0x1aa   :  { %s3225_s7 = sld [smem:[#allocation27_spill]]  ;;  %v961_v55 = vadd.f32 %v960_v31, %v932_v47  ;;  %v964_v62 = vadd.f32 %v963_v37, %v935_v52  ;;  %v1005_v6 = vstv %s2709_s29  ;;  %v1008_v32 = vstv %s2711_s9 }
 0x1ab   :  { %v967_v45 = vstv %s3224_s27  ;;  %s2736_s16 = sld [smem:[#allocation2 + $0xf2]]  ;;  %v1011_v54 = vstv %s2714_s4  ;;  %v1014_v17 = vstv %s2719_s25 }
 0x1ac   :  { %s3226_s17 = sld [smem:[#allocation55_spill]]  ;;  %v968_v8 = vadd.f32 %v967_v45, %v966_v25  ;;  %v1017_v27 = vstv %s2721_s20 }
 0x1ad   :  { %s2739_s6 = sld [smem:[#allocation2 + $0xf3]]  ;;  %v1020_v21 = vstv %s2724_s10 }
 0x1ae   :  { %s2741_s21 = sld [smem:[#allocation2 + $0xf4]]  ;;  %v969_v40 = vmax.f32 %v968_v8, 0.0  ;;  %v1028_v9 = vstv %s2729_s5 }
 0x1af   :  { %s2744_s30 = sld [smem:[#allocation2 + $0xf5]]  ;;  %v1031_v8 = vstv %s2734_s1 }
 0x1b0   :  { %v994_v7 = vstv %s3225_s7  ;;  %s2748_s18 = sld [smem:[#allocation2 + $0xf6]]  ;;  %v971_v14 = vmul.f32 %v970_v33, %v969_v40  ;;  %v974_v10 = vmul.f32 %v973_v1, %v969_v40  ;;  %v977_v15 = vmul.f32 %v976_v11, %v969_v40 }
 0x1b1   :  { %v995_v34 = vmul.f32 %v2599_v13, %v994_v7  ;;  %s2754_s13 = sld [smem:[#allocation2 + $0xf7]]  ;;  %v980_v20 = vmul.f32 %v979_v46, %v969_v40  ;;  %v983_v18 = vmul.f32 %v982_v0, %v969_v40  ;;  %v986_v22 = vmul.f32 %v985_v57, %v969_v40 }
 0x1b2   :  { %v996_v41 = vstv %s3226_s17  ;;  %s2757_s19 = sld [smem:[#allocation2 + $0xf8]]  ;;  %v989_v19 = vmul.f32 %v988_v60, %v969_v40  ;;  %v992_v26 = vmul.f32 %v991_v48, %v969_v40  ;;  %v972_v38 = vadd.f32 %v971_v14, %v943_v49 }
 0x1b3   :  { %v997_v58 = vadd.f32 %v996_v41, %v995_v34  ;;  %s2759_s14 = sld [smem:[#allocation2 + $0xf9]]  ;;  %v975_v28 = vadd.f32 %v974_v10, %v946_v39  ;;  %v978_v59 = vadd.f32 %v977_v15, %v949_v53  ;;  %v981_v12 = vadd.f32 %v980_v20, %v952_v42 }
 0x1b4   :  { %s3227_s24 = sld [smem:[#allocation28_spill]]  ;;  %v984_v25 = vadd.f32 %v983_v18, %v955_v61  ;;  %v987_v45 = vadd.f32 %v986_v22, %v958_v43  ;;  %v990_v3 = vadd.f32 %v989_v19, %v961_v55  ;;  %v993_v4 = vadd.f32 %v992_v26, %v964_v62 }
 0x1b5   :  { %s2762_s3 = sld [smem:[#allocation2 + $0xfa]]  ;;  %v998_v23 = vmax.f32 %v997_v58, 0.0  ;;  %v1034_v7 = vstv %s2736_s16  ;;  %v1037_v31 = vstv %s2739_s6  ;;  %v1040_v40 = vstv %s2741_s21 }
 0x1b6   :  { %s2768_s2 = sld [smem:[#allocation2 + $0xfb]]  ;;  %v1043_v57 = vstv %s2744_s30  ;;  %v1046_v42 = vstv %s2748_s18 }
 0x1b7   :  { %s2770_s23 = sld [smem:[#allocation2 + $0xfc]]  ;;  %v1000_v63 = vmul.f32 %v999_v2, %v998_v23  ;;  %v1003_v29 = vmul.f32 %v1002_v56, %v998_v23  ;;  %v1006_v51 = vmul.f32 %v1005_v6, %v998_v23  ;;  %v1009_v44 = vmul.f32 %v1008_v32, %v998_v23 }
 0x1b8   :  { %s3228_s12 = sld [smem:[#allocation56_spill]]  ;;  %v1012_v47 = vmul.f32 %v1011_v54, %v998_v23  ;;  %v1015_v52 = vmul.f32 %v1014_v17, %v998_v23  ;;  %v1018_v33 = vmul.f32 %v1017_v27, %v998_v23  ;;  %v1021_v5 = vmul.f32 %v1020_v21, %v998_v23 }
 0x1b9   :  { %s2773_s26 = sld [smem:[#allocation2 + $0xfd]]  ;;  %v1001_v36 = vadd.f32 %v1000_v63, %v972_v38  ;;  %v1004_v37 = vadd.f32 %v1003_v29, %v975_v28  ;;  %v1007_v34 = vadd.f32 %v1006_v51, %v978_v59  ;;  %v1010_v41 = vadd.f32 %v1009_v44, %v981_v12 }
 0x1ba   :  { %v1023_v16 = vstv %s3227_s24  ;;  %s2778_s15 = sld [smem:[#allocation2 + $0xfe]]  ;;  %v1013_v11 = vadd.f32 %v1012_v47, %v984_v25  ;;  %v1016_v46 = vadd.f32 %v1015_v52, %v987_v45  ;;  %v1019_v0 = vadd.f32 %v1018_v33, %v990_v3 }
 0x1bb   :  { %v1024_v24 = vmul.f32 %v2599_v13, %v1023_v16  ;;  %s2783_s11 = sld [smem:[#allocation2 + $0xff]]  ;;  %v1022_v39 = vadd.f32 %v1021_v5, %v993_v4  ;;  %v1049_v61 = vstv %s2754_s13  ;;  %v1057_v58 = vstv %s2757_s19 }
 0x1bc   :  { %s2786_s22 = sld [smem:[#allocation2 + $0x100]]  ;;  %v1060_v43 = vstv %s2759_s14  ;;  %v1063_v23 = vstv %s2762_s3  ;;  %v1066_v16 = vstv %s2768_s2 }
 0x1bd   :  { %s3229_s0 = sld [smem:[#allocation29_spill]]  ;;  %v1069_v19 = vstv %s2770_s23 }
 0x1be   :  { %v1025_v50 = vstv %s3228_s12  ;;  %s2788_s8 = sld [smem:[#allocation2 + $0x101]] }
 0x1bf   :  { %s2790_s28 = sld [smem:[#allocation2 + $0x102]]  ;;  %v1026_v30 = vadd.f32 %v1025_v50, %v1024_v24  ;;  %v1072_v17 = vstv %s2773_s26 }
 0x1c0   :  { %s2792_s29 = sld [smem:[#allocation2 + $0x103]]  ;;  %v1075_v26 = vstv %s2778_s15 }
 0x1c1   :  { %s2796_s9 = sld [smem:[#allocation2 + $0x104]]  ;;  %v1027_v1 = vmax.f32 %v1026_v30, 0.0  ;;  %v1078_v12 = vstv %s2783_s11 }
 0x1c2   :  { %s3230_s4 = sld [smem:[#allocation57_spill]]  ;;  %v1086_v45 = vstv %s2786_s22 }
 0x1c3   :  { %v1052_v35 = vstv %s3229_s0  ;;  %s2801_s25 = sld [smem:[#allocation2 + $0x105]]  ;;  %v1029_v55 = vmul.f32 %v1028_v9, %v1027_v1  ;;  %v1032_v62 = vmul.f32 %v1031_v8, %v1027_v1  ;;  %v1035_v60 = vmul.f32 %v1034_v7, %v1027_v1 }
 0x1c4   :  { %s2803_s27 = sld [smem:[#allocation2 + $0x106]]  ;;  %v1053_v49 = vmul.f32 %v2599_v13, %v1052_v35  ;;  %v1038_v48 = vmul.f32 %v1037_v31, %v1027_v1  ;;  %v1041_v2 = vmul.f32 %v1040_v40, %v1027_v1  ;;  %v1044_v56 = vmul.f32 %v1043_v57, %v1027_v1 }
 0x1c5   :  { %s2806_s20 = sld [smem:[#allocation2 + $0x107]]  ;;  %v1047_v10 = vmul.f32 %v1046_v42, %v1027_v1  ;;  %v1050_v15 = vmul.f32 %v1049_v61, %v1027_v1  ;;  %v1030_v32 = vadd.f32 %v1029_v55, %v1001_v36  ;;  %v1033_v54 = vadd.f32 %v1032_v62, %v1004_v37 }
 0x1c6   :  { %s3231_s10 = sld [smem:[#allocation30_spill]]  ;;  %v1036_v27 = vadd.f32 %v1035_v60, %v1007_v34  ;;  %v1039_v21 = vadd.f32 %v1038_v48, %v1010_v41  ;;  %v1042_v24 = vadd.f32 %v1041_v2, %v1013_v11  ;;  %v1045_v28 = vadd.f32 %v1044_v56, %v1016_v46 }
 0x1c7   :  { %s2811_s5 = sld [smem:[#allocation2 + $0x108]]  ;;  %v1048_v59 = vadd.f32 %v1047_v10, %v1019_v0  ;;  %v1051_v50 = vadd.f32 %v1050_v15, %v1022_v39  ;;  %v1089_v63 = vstv %s2788_s8  ;;  %v1092_v3 = vstv %s2790_s28 }
 0x1c8   :  { %v1054_v53 = vstv %s3230_s4  ;;  %s3232_s1 = sld [smem:[#allocation58_spill]]  ;;  %v1095_v9 = vstv %s2792_s29  ;;  %v1098_v35 = vstv %s2796_s9 }
 0x1c9   :  { %s2817_s7 = sld [smem:[#allocation2 + $0x109]]  ;;  %v1055_v6 = vadd.f32 %v1054_v53, %v1053_v49  ;;  %v1101_v36 = vstv %s2801_s25 }
 0x1ca   :  { %s2819_s16 = sld [smem:[#allocation2 + $0x10a]]  ;;  %v1104_v7 = vstv %s2803_s27 }
 0x1cb   :  { %s2822_s17 = sld [smem:[#allocation2 + $0x10b]]  ;;  %v1056_v22 = vmax.f32 %v1055_v6, 0.0  ;;  %v1107_v31 = vstv %s2806_s20 }
 0x1cc   :  { %v1081_v14 = vstv %s3231_s10  ;;  %s2826_s6 = sld [smem:[#allocation2 + $0x10c]] }
 0x1cd   :  { %v1082_v20 = vmul.f32 %v2599_v13, %v1081_v14  ;;  %s2831_s21 = sld [smem:[#allocation2 + $0x10d]]  ;;  %v1058_v25 = vmul.f32 %v1057_v58, %v1056_v22  ;;  %v1061_v29 = vmul.f32 %v1060_v43, %v1056_v22  ;;  %v1064_v51 = vmul.f32 %v1063_v23, %v1056_v22 }
 0x1ce   :  { %v1083_v18 = vstv %s3232_s1  ;;  %s2835_s30 = sld [smem:[#allocation2 + $0x10e]]  ;;  %v1067_v44 = vmul.f32 %v1066_v16, %v1056_v22  ;;  %v1070_v52 = vmul.f32 %v1069_v19, %v1056_v22  ;;  %v1073_v33 = vmul.f32 %v1072_v17, %v1056_v22 }
 0x1cf   :  { %s3233_s18 = sld [smem:[#allocation31_spill]]  ;;  %v1084_v38 = vadd.f32 %v1083_v18, %v1082_v20  ;;  %v1076_v30 = vmul.f32 %v1075_v26, %v1056_v22  ;;  %v1079_v5 = vmul.f32 %v1078_v12, %v1056_v22  ;;  %v1059_v8 = vadd.f32 %v1058_v25, %v1030_v32 }
 0x1d0   :  { %s2837_s13 = sld [smem:[#allocation2 + $0x10f]]  ;;  %v1062_v34 = vadd.f32 %v1061_v29, %v1033_v54  ;;  %v1065_v41 = vadd.f32 %v1064_v51, %v1036_v27  ;;  %v1068_v1 = vadd.f32 %v1067_v44, %v1039_v21  ;;  %v1071_v46 = vadd.f32 %v1070_v52, %v1042_v24 }
 0x1d1   :  { %s2840_s19 = sld [smem:[#allocation2 + $0x110]]  ;;  %v1085_v4 = vmax.f32 %v1084_v38, 0.0  ;;  %v1074_v0 = vadd.f32 %v1073_v33, %v1045_v28  ;;  %v1077_v49 = vadd.f32 %v1076_v30, %v1048_v59  ;;  %v1080_v40 = vadd.f32 %v1079_v5, %v1051_v50 }
 0x1d2   :  { %s2845_s14 = sld [smem:[#allocation2 + $0x111]]  ;;  %v1115_v60 = vstv %s2811_s5  ;;  %v1118_v48 = vstv %s2817_s7  ;;  %v1121_v6 = vstv %s2819_s16  ;;  %v1124_v14 = vstv %s2822_s17 }
 0x1d3   :  { %s2848_s24 = sld [smem:[#allocation2 + $0x112]]  ;;  %v1087_v39 = vmul.f32 %v1086_v45, %v1085_v4  ;;  %v1090_v57 = vmul.f32 %v1089_v63, %v1085_v4  ;;  %v1093_v53 = vmul.f32 %v1092_v3, %v1085_v4  ;;  %v1096_v42 = vmul.f32 %v1095_v9, %v1085_v4 }
 0x1d4   :  { %s3234_s3 = sld [smem:[#allocation59_spill]]  ;;  %v1099_v61 = vmul.f32 %v1098_v35, %v1085_v4  ;;  %v1102_v58 = vmul.f32 %v1101_v36, %v1085_v4  ;;  %v1105_v43 = vmul.f32 %v1104_v7, %v1085_v4  ;;  %v1108_v62 = vmul.f32 %v1107_v31, %v1085_v4 }
 0x1d5   :  { %v1110_v47 = vstv %s3233_s18  ;;  %s2850_s2 = sld [smem:[#allocation2 + $0x113]]  ;;  %v1088_v56 = vadd.f32 %v1087_v39, %v1059_v8  ;;  %v1127_v10 = vstv %s2826_s6  ;;  %v1091_v15 = vadd.f32 %v1090_v57, %v1062_v34 }
 0x1d6   :  { %s2855_s23 = sld [smem:[#allocation2 + $0x114]]  ;;  %v1111_v37 = vmul.f32 %v2599_v13, %v1110_v47  ;;  %v1094_v20 = vadd.f32 %v1093_v53, %v1065_v41  ;;  %v1097_v18 = vadd.f32 %v1096_v42, %v1068_v1  ;;  %v1100_v23 = vadd.f32 %v1099_v61, %v1071_v46 }
 0x1d7   :  { %s2860_s12 = sld [smem:[#allocation2 + $0x115]]  ;;  %v1103_v16 = vadd.f32 %v1102_v58, %v1074_v0  ;;  %v1106_v19 = vadd.f32 %v1105_v43, %v1077_v49  ;;  %v1109_v54 = vadd.f32 %v1108_v62, %v1080_v40  ;;  %v1130_v17 = vstv %s2831_s21 }
 0x1d8   :  { %s2863_s26 = sld [smem:[#allocation2 + $0x116]]  ;;  %v1133_v26 = vstv %s2835_s30  ;;  %v1136_v21 = vstv %s2837_s13  ;;  %v1144_v24 = vstv %s2840_s19  ;;  %v1147_v38 = vstv %s2845_s14 }
 0x1d9   :  { %s3235_s15 = sld [smem:[#allocation32_spill]]  ;;  %v1150_v28 = vstv %s2848_s24 }
 0x1da   :  { %v1112_v11 = vstv %s3234_s3  ;;  %s2865_s11 = sld [smem:[#allocation2 + $0x117]] }
 0x1db   :  { %s2867_s22 = sld [smem:[#allocation2 + $0x118]]  ;;  %v1113_v55 = vadd.f32 %v1112_v11, %v1111_v37  ;;  %v1153_v47 = vstv %s2850_s2 }
 0x1dc   :  { %s2869_s0 = sld [smem:[#allocation2 + $0x119]]  ;;  %v1156_v30 = vstv %s2855_s23 }
 0x1dd   :  { %s2874_s8 = sld [smem:[#allocation2 + $0x11a]]  ;;  %v1114_v22 = vmax.f32 %v1113_v55, 0.0  ;;  %v1159_v4 = vstv %s2860_s12 }
 0x1de   :  { %s3236_s28 = sld [smem:[#allocation60_spill]]  ;;  %v1162_v36 = vstv %s2863_s26 }
 0x1df   :  { %v1139_v2 = vstv %s3235_s15  ;;  %s2879_s29 = sld [smem:[#allocation2 + $0x11b]]  ;;  %v1116_v59 = vmul.f32 %v1115_v60, %v1114_v22  ;;  %v1119_v50 = vmul.f32 %v1118_v48, %v1114_v22  ;;  %v1122_v12 = vmul.f32 %v1121_v6, %v1114_v22 }
 0x1e0   :  { %s2881_s9 = sld [smem:[#allocation2 + $0x11c]]  ;;  %v1140_v32 = vmul.f32 %v2599_v13, %v1139_v2  ;;  %v1125_v25 = vmul.f32 %v1124_v14, %v1114_v22  ;;  %v1128_v45 = vmul.f32 %v1127_v10, %v1114_v22  ;;  %v1131_v63 = vmul.f32 %v1130_v17, %v1114_v22 }
 0x1e1   :  { %s2884_s4 = sld [smem:[#allocation2 + $0x11d]]  ;;  %v1134_v51 = vmul.f32 %v1133_v26, %v1114_v22  ;;  %v1137_v44 = vmul.f32 %v1136_v21, %v1114_v22  ;;  %v1117_v9 = vadd.f32 %v1116_v59, %v1088_v56  ;;  %v1120_v35 = vadd.f32 %v1119_v50, %v1091_v15 }
 0x1e2   :  { %s3237_s25 = sld [smem:[#allocation33_spill]]  ;;  %v1165_v8 = vstv %s2865_s11  ;;  %v1123_v7 = vadd.f32 %v1122_v12, %v1094_v20  ;;  %v1126_v31 = vadd.f32 %v1125_v25, %v1097_v18  ;;  %v1129_v37 = vadd.f32 %v1128_v45, %v1100_v23 }
 0x1e3   :  { %s2889_s27 = sld [smem:[#allocation2 + $0x11e]]  ;;  %v1132_v34 = vadd.f32 %v1131_v63, %v1103_v16  ;;  %v1135_v41 = vadd.f32 %v1134_v51, %v1106_v19  ;;  %v1138_v1 = vadd.f32 %v1137_v44, %v1109_v54  ;;  %v1173_v46 = vstv %s2867_s22 }
 0x1e4   :  { %v1141_v27 = vstv %s3236_s28  ;;  %s2895_s20 = sld [smem:[#allocation2 + $0x11f]]  ;;  %v1176_v49 = vstv %s2869_s0  ;;  %v1179_v39 = vstv %s2874_s8 }
 0x1e5   :  { %s3238_s10 = sld [smem:[#allocation61_spill]]  ;;  %v1142_v3 = vadd.f32 %v1141_v27, %v1140_v32  ;;  %v1182_v62 = vstv %s2879_s29 }
 0x1e6   :  { %s2897_s5 = sld [smem:[#allocation2 + $0x120]]  ;;  %v1185_v48 = vstv %s2881_s9 }
 0x1e7   :  { %s2900_s1 = sld [smem:[#allocation2 + $0x121]]  ;;  %v1143_v33 = vmax.f32 %v1142_v3, 0.0  ;;  %v1188_v2 = vstv %s2884_s4 }
 0x1e8   :  { %v1168_v29 = vstv %s3237_s25  ;;  %s2904_s7 = sld [smem:[#allocation2 + $0x122]] }
 0x1e9   :  { %v1169_v52 = vmul.f32 %v2599_v13, %v1168_v29  ;;  %s2909_s16 = sld [smem:[#allocation2 + $0x123]]  ;;  %v1145_v0 = vmul.f32 %v1144_v24, %v1143_v33  ;;  %v1148_v57 = vmul.f32 %v1147_v38, %v1143_v33  ;;  %v1151_v53 = vmul.f32 %v1150_v28, %v1143_v33 }
 0x1ea   :  { %s3239_s17 = sld [smem:[#allocation34_spill]]  ;;  %v1154_v42 = vmul.f32 %v1153_v47, %v1143_v33  ;;  %v1157_v61 = vmul.f32 %v1156_v30, %v1143_v33  ;;  %v1160_v58 = vmul.f32 %v1159_v4, %v1143_v33  ;;  %v1163_v43 = vmul.f32 %v1162_v36, %v1143_v33 }
 0x1eb   :  { %v1170_v5 = vstv %s3238_s10  ;;  %s2913_s6 = sld [smem:[#allocation2 + $0x124]]  ;;  %v1166_v55 = vmul.f32 %v1165_v8, %v1143_v33  ;;  %v1191_v56 = vstv %s2889_s27  ;;  %v1146_v6 = vadd.f32 %v1145_v0, %v1117_v9 }
 0x1ec   :  { %s2915_s21 = sld [smem:[#allocation2 + $0x125]]  ;;  %v1171_v11 = vadd.f32 %v1170_v5, %v1169_v52  ;;  %v1194_v14 = vstv %s2895_s20  ;;  %v1149_v20 = vadd.f32 %v1148_v57, %v1120_v35  ;;  %v1152_v18 = vadd.f32 %v1151_v53, %v1123_v7 }
 0x1ed   :  { %s2918_s30 = sld [smem:[#allocation2 + $0x126]]  ;;  %v1155_v22 = vadd.f32 %v1154_v42, %v1126_v31  ;;  %v1158_v23 = vadd.f32 %v1157_v61, %v1129_v37  ;;  %v1161_v16 = vadd.f32 %v1160_v58, %v1132_v34  ;;  %v1164_v19 = vadd.f32 %v1163_v43, %v1135_v41 }
 0x1ee   :  { %s2923_s18 = sld [smem:[#allocation2 + $0x127]]  ;;  %v1172_v60 = vmax.f32 %v1171_v11, 0.0  ;;  %v1167_v32 = vadd.f32 %v1166_v55, %v1138_v1  ;;  %v1202_v54 = vstv %s2897_s5  ;;  %v1205_v25 = vstv %s2900_s1 }
 0x1ef   :  { %s3240_s13 = sld [smem:[#allocation62_spill]]  ;;  %v1208_v63 = vstv %s2904_s7  ;;  %v1211_v3 = vstv %s2909_s16 }
 0x1f0   :  { %v1197_v40 = vstv %s3239_s17  ;;  %s2925_s19 = sld [smem:[#allocation2 + $0x128]]  ;;  %v1174_v17 = vmul.f32 %v1173_v46, %v1172_v60  ;;  %v1177_v26 = vmul.f32 %v1176_v49, %v1172_v60  ;;  %v1180_v27 = vmul.f32 %v1179_v39, %v1172_v60 }
 0x1f1   :  { %s2928_s14 = sld [smem:[#allocation2 + $0x129]]  ;;  %v1198_v10 = vmul.f32 %v2599_v13, %v1197_v40  ;;  %v1183_v21 = vmul.f32 %v1182_v62, %v1172_v60  ;;  %v1186_v24 = vmul.f32 %v1185_v48, %v1172_v60  ;;  %v1189_v38 = vmul.f32 %v1188_v2, %v1172_v60  ;;  %v1705_v62 = vld [vmem:[#allocation6] sm:$0xff] }
 0x1f2   :  { %s2933_s24 = sld [smem:[#allocation2 + $0x12a]]  ;;  %v1192_v50 = vmul.f32 %v1191_v56, %v1172_v60  ;;  %v1195_v12 = vmul.f32 %v1194_v14, %v1172_v60  ;;  %v1214_v29 = vstv %s2913_s6  ;;  %v1175_v44 = vadd.f32 %v1174_v17, %v1146_v6 }
 0x1f3   :  { %s2938_s3 = sld [smem:[#allocation2 + $0x12b]]  ;;  %v1178_v47 = vadd.f32 %v1177_v26, %v1149_v20  ;;  %v1217_v33 = vstv %s2915_s21  ;;  %v1184_v30 = vadd.f32 %v1183_v21, %v1155_v22  ;;  %v1187_v4 = vadd.f32 %v1186_v24, %v1158_v23 }
 0x1f4   :  { %s3241_s2 = sld [smem:[#allocation35_spill]]  ;;  %v1190_v5 = vadd.f32 %v1189_v38, %v1161_v16  ;;  %v1193_v9 = vadd.f32 %v1192_v50, %v1164_v19  ;;  %v1196_v35 = vadd.f32 %v1195_v12, %v1167_v32  ;;  %v1220_v36 = vstv %s2918_s30 }
 0x1f5   :  { %v1199_v15 = vstv %s3240_s13  ;;  %s2940_s23 = sld [smem:[#allocation2 + $0x12c]]  ;;  %v1223_v7 = vstv %s2923_s18 }
 0x1f6   :  { %s2943_s12 = sld [smem:[#allocation2 + $0x12d]]  ;;  %v1200_v28 = vadd.f32 %v1199_v15, %v1198_v10  ;;  %v1231_v31 = vstv %s2925_s19 }
 0x1f7   :  { %s3242_s26 = sld [smem:[#allocation63_spill]]  ;;  %v1234_v37 = vstv %s2928_s14 }
 0x1f8   :  { %s2945_s15 = sld [smem:[#allocation2 + $0x12e]]  ;;  %v1201_v52 = vmax.f32 %v1200_v28, 0.0  ;;  %v1237_v34 = vstv %s2933_s24 }
 0x1f9   :  { %s2948_s11 = sld [smem:[#allocation2 + $0x12f]]  ;;  %v1240_v53 = vstv %s2938_s3 }
 0x1fa   :  { %v1226_v59 = vstv %s3241_s2  ;;  %s2952_s22 = sld [smem:[#allocation2 + $0x130]]  ;;  %v1203_v41 = vmul.f32 %v1202_v54, %v1201_v52  ;;  %v1206_v1 = vmul.f32 %v1205_v25, %v1201_v52  ;;  %v1209_v11 = vmul.f32 %v1208_v63, %v1201_v52 }
 0x1fb   :  { %v1227_v45 = vmul.f32 %v2599_v13, %v1226_v59  ;;  %s2958_s0 = sld [smem:[#allocation2 + $0x131]]  ;;  %v1181_v13 = vadd.f32 %v1180_v27, %v1152_v18  ;;  %v1212_v46 = vmul.f32 %v1211_v3, %v1201_v52  ;;  %v1215_v0 = vmul.f32 %v1214_v29, %v1201_v52 }
 0x1fc   :  { %s2961_s8 = sld [smem:[#allocation2 + $0x132]]  ;;  %v1218_v49 = vmul.f32 %v1217_v33, %v1201_v52  ;;  %v1221_v39 = vmul.f32 %v1220_v36, %v1201_v52  ;;  %v1243_v42 = vstv %s2940_s23  ;;  %v1246_v61 = vstv %s2943_s12 }
 0x1fd   :  { %v1228_v51 = vstv %s3242_s26  ;;  %s2963_s28 = sld [smem:[#allocation2 + $0x133]]  ;;  %v1224_v58 = vmul.f32 %v1223_v7, %v1201_v52  ;;  %v1204_v48 = vadd.f32 %v1203_v41, %v1175_v44  ;;  %v1207_v2 = vadd.f32 %v1206_v1, %v1178_v47 }
 0x1fe   :  { %s3243_s29 = sld [smem:[#allocation36_spill]]  ;;  %v1229_v8 = vadd.f32 %v1228_v51, %v1227_v45  ;;  %v1249_v43 = vstv %s2945_s15  ;;  %v1210_v56 = vadd.f32 %v1209_v11, %v1181_v13  ;;  %v1213_v14 = vadd.f32 %v1212_v46, %v1184_v30  ;;  %s1774_s15 = smov [#allocation7]  }
 0x1ff   :  { %s2966_s9 = sld [smem:[#allocation2 + $0x134]]  ;;  %v1252_v55 = vstv %s2948_s11  ;;  %v1216_v10 = vadd.f32 %v1215_v0, %v1187_v4  ;;  %v1219_v15 = vadd.f32 %v1218_v49, %v1190_v5  ;;  %v1222_v20 = vadd.f32 %v1221_v39, %v1193_v9  ;;  %s1352_s11 = sshll.u32 %s1774_s15, 4  ;;  %s1353_s11 = int_to_ptr.vmem [resolvable:$true] %s1352_s11 }
 0x200   :  { %s2972_s4 = sld [smem:[#allocation2 + $0x135]]  ;;  %v1230_v57 = vmax.f32 %v1229_v8, 0.0  ;;  %v1225_v19 = vadd.f32 %v1224_v58, %v1196_v35  ;;  %v1260_v21 = vstv %s2952_s22 }
 0x201   :  { %s2974_s25 = sld [smem:[#allocation2 + $0x136]]  ;;  %v1263_v28 = vstv %s2958_s0 }
 0x202   :  { %s3244_s27 = sld [smem:[#allocation64_spill]]  ;;  %v1232_v18 = vmul.f32 %v1231_v31, %v1230_v57  ;;  %v1235_v22 = vmul.f32 %v1234_v37, %v1230_v57  ;;  %v1238_v23 = vmul.f32 %v1237_v34, %v1230_v57  ;;  %v1241_v16 = vmul.f32 %v1240_v53, %v1230_v57 }
 0x203   :  { %s2977_s20 = sld [smem:[#allocation2 + $0x137]]  ;;  %v1244_v32 = vmul.f32 %v1243_v42, %v1230_v57  ;;  %v1247_v54 = vmul.f32 %v1246_v61, %v1230_v57  ;;  %v1250_v26 = vmul.f32 %v1249_v43, %v1230_v57  ;;  %v1253_v27 = vmul.f32 %v1252_v55, %v1230_v57 }
 0x204   :  { %v1255_v40 = vstv %s3243_s29  ;;  %s2982_s10 = sld [smem:[#allocation2 + $0x138]]  ;;  %v1266_v59 = vstv %s2961_s8  ;;  %v1269_v50 = vstv %s2963_s28  ;;  %v1233_v12 = vadd.f32 %v1232_v18, %v1204_v48 }
 0x205   :  { %v1256_v60 = vmul.f32 %v1705_v62, %v1255_v40  ;;  %s2986_s5 = sld [smem:[#allocation2 + $0x139]]  ;;  %v1236_v25 = vadd.f32 %v1235_v22, %v1207_v2  ;;  %v1239_v45 = vadd.f32 %v1238_v23, %v1210_v56  ;;  %v1242_v63 = vadd.f32 %v1241_v16, %v1213_v14 }
 0x206   :  { %s2989_s1 = sld [smem:[#allocation2 + $0x13a]]  ;;  %v1245_v3 = vadd.f32 %v1244_v32, %v1216_v10  ;;  %v1248_v29 = vadd.f32 %v1247_v54, %v1219_v15  ;;  %v1272_v51 = vstv %s2966_s9  ;;  %v1251_v47 = vadd.f32 %v1250_v26, %v1222_v20 }
 0x207   :  { %s3245_s7 = sld [smem:[#allocation37_spill]]  ;;  %v1254_v52 = vadd.f32 %v1253_v27, %v1225_v19  ;;  %v1275_v9 = vstv %s2972_s4  ;;  %v1278_v36 = vstv %s2974_s25 }
 0x208   :  { %v1257_v6 = vstv %s3244_s27  ;;  %s2991_s16 = sld [smem:[#allocation2 + $0x13b]] }
 0x209   :  { %s2993_s17 = sld [smem:[#allocation2 + $0x13c]]  ;;  %v1258_v17 = vadd.f32 %v1257_v6, %v1256_v60  ;;  %v1281_v8 = vstv %s2977_s20 }
 0x20a   :  { %s2995_s6 = sld [smem:[#allocation2 + $0x13d]]  ;;  %v1289_v7 = vstv %s2982_s10 }
 0x20b   :  { %v1259_v38 = vmax.f32 %v1258_v17, 0.0  ;;  %s3246_s21 = sld [smem:[#allocation65_spill]]  ;;  %v1292_v37 = vstv %s2986_s5 }
 0x20c   :  { %s3002_s30 = sld [smem:[#allocation2 + $0x13e]]  ;;  %v1295_v34 = vstv %s2989_s1 }
 0x20d   :  { %v1284_v24 = vstv %s3245_s7  ;;  %s3005_s18 = sld [smem:[#allocation2 + $0x13f]]  ;;  %v1261_v33 = vmul.f32 %v1260_v21, %v1259_v38  ;;  %v1264_v30 = vmul.f32 %v1263_v28, %v1259_v38  ;;  %v1267_v4 = vmul.f32 %v1266_v59, %v1259_v38 }
 0x20e   :  { %v1285_v44 = vmul.f32 %v1705_v62, %v1284_v24  ;;  %s3008_s13 = sld [smem:[#allocation2 + $0x148]]  ;;  %v1270_v5 = vmul.f32 %v1269_v50, %v1259_v38  ;;  %v1273_v35 = vmul.f32 %v1272_v51, %v1259_v38  ;;  %v1298_v41 = vstv %s2991_s16 }
 0x20f   :  { %s3011_s19 = sld [smem:[#allocation2 + $0x149]]  ;;  %v1262_v1 = vadd.f32 %v1261_v33, %v1233_v12  ;;  %v1276_v11 = vmul.f32 %v1275_v9, %v1259_v38  ;;  %v1301_v46 = vstv %s2993_s17  ;;  %v1265_v49 = vadd.f32 %v1264_v30, %v1236_v25 }
 0x210   :  { %s3016_s14 = sld [smem:[#allocation2 + $0x14a]]  ;;  %v1304_v0 = vstv %s2995_s6  ;;  %v1268_v39 = vadd.f32 %v1267_v4, %v1239_v45  ;;  %v1271_v40 = vadd.f32 %v1270_v5, %v1242_v63  ;;  %v1274_v53 = vadd.f32 %v1273_v35, %v1245_v3 }
 0x211   :  { %v1286_v13 = vstv %s3246_s21  ;;  %s3021_s24 = sld [smem:[#allocation2 + $0x150]]  ;;  %v1279_v42 = vmul.f32 %v1278_v36, %v1259_v38  ;;  %v1282_v61 = vmul.f32 %v1281_v8, %v1259_v38  ;;  %v1277_v48 = vadd.f32 %v1276_v11, %v1248_v29 }
 0x212   :  { %v1287_v31 = vadd.f32 %v1286_v13, %v1285_v44  ;;  %s3025_s3 = sld [smem:[#allocation2 + $0x14b]]  ;;  %v1307_v58 = vstv %s3002_s30 }
 0x213   :  { %s3028_s2 = sld [smem:[#allocation2 + $0x14c]]  ;;  %v1310_v6 = vstv %s3005_s18  ;;  %v1280_v18 = vadd.f32 %v1279_v42, %v1251_v47  ;;  %v1283_v26 = vadd.f32 %v1282_v61, %v1254_v52 }
 0x214   :  { %v1288_v57 = vmax.f32 %v1287_v31, 0.0  ;;  %s3031_s23 = sld [smem:[#allocation2 + $0x14d]]  ;;  %v1315_v23 = vstv %s3008_s13 }
 0x215   :  { %v1319_v16 = vstv %s3011_s19  ;;  %s1698_s12 = sld [smem:[#allocation2 + $0x14e]] }
 0x216   :  { %v1290_v43 = vmul.f32 %v1289_v7, %v1288_v57  ;;  %v1293_v55 = vmul.f32 %v1292_v37, %v1288_v57  ;;  %v1296_v62 = vmul.f32 %v1295_v34, %v1288_v57  ;;  %v1299_v60 = vmul.f32 %v1298_v41, %v1288_v57  ;;  %s1699_s26 = sld [smem:[#allocation2 + $0x14f]] }
 0x217   :  { %v1302_v2 = vmul.f32 %v1301_v46, %v1288_v57  ;;  %v1305_v56 = vmul.f32 %v1304_v0, %v1288_v57  ;;  %v1308_v22 = vmul.f32 %v1307_v58, %v1288_v57  ;;  %v1311_v27 = vmul.f32 %v1310_v6, %v1288_v57  ;;  %s3247_s8 = sld [smem:[#allocation87_spill]] }
 0x218   :  { %v1291_v14 = vadd.f32 %v1290_v43, %v1262_v1  ;;  %v1294_v10 = vadd.f32 %v1293_v55, %v1265_v49  ;;  %v1297_v15 = vadd.f32 %v1296_v62, %v1268_v39  ;;  %v1300_v20 = vadd.f32 %v1299_v60, %v1271_v40 }
 0x219   :  { %v1303_v19 = vadd.f32 %v1302_v2, %v1274_v53  ;;  %v1313_v21 = vstv %s3021_s24  ;;  %v1323_v24 = vstv %s3016_s14  ;;  %v1306_v38 = vadd.f32 %v1305_v56, %v1277_v48 }
 0x21a   :  { %v1314_v32 = vmax.f32 %v1291_v14, 0.0  ;;  %v1318_v54 = vmax.f32 %v1294_v10, 0.0  ;;  %v1322_v17 = vmax.f32 %v1297_v15, 0.0  ;;  %v1326_v50 = vmax.f32 %v1300_v20, 0.0 }
 0x21b   :  { %v1327_v12 = vstv %s3025_s3  ;;  %v1309_v25 = vadd.f32 %v1308_v22, %v1280_v18  ;;  %v1330_v3 = vmax.f32 %v1303_v19, 0.0  ;;  %v1331_v29 = vstv %s3028_s2 }
 0x21c   :  { %v1316_v28 = vmul.f32 %v1315_v23, %v1314_v32  ;;  %v1320_v59 = vmul.f32 %v1319_v16, %v1318_v54  ;;  %v1324_v63 = vmul.f32 %v1323_v24, %v1322_v17  ;;  %v1312_v51 = vadd.f32 %v1311_v27, %v1283_v26 }
 0x21d   :  { %v1328_v47 = vmul.f32 %v1327_v12, %v1326_v50  ;;  %v1334_v33 = vmax.f32 %v1306_v38, 0.0  ;;  %v1335_v52 = vstv %s3031_s23  ;;  %v1332_v30 = vmul.f32 %v1331_v29, %v1330_v3  ;;  %s1354_s28 = sshll.u32 %s3247_s8, 4  ;;  %s1355_s28 = int_to_ptr.hbm [resolvable:$true] %s1354_s28 }
 0x21e   :  { %v1317_v45 = vadd.f32 %v1316_v28, %v1313_v21  ;;  %v1338_v4 = vmax.f32 %v1309_v25, 0.0  ;;  %v1339_v5 = vstv %s1698_s12  ;;  %v1342_v36 = vmax.f32 %v1312_v51, 0.0 }
 0x21f   :  { %v1336_v35 = vmul.f32 %v1335_v52, %v1334_v33  ;;  %v1343_v8 = vstv %s1699_s26 }
 0x220   :  { %v1321_v44 = vadd.f32 %v1320_v59, %v1317_v45  ;;  %v1340_v31 = vmul.f32 %v1339_v5, %v1338_v4  ;;  %v1344_v34 = vmul.f32 %v1343_v8, %v1342_v36 }
 0x222   :  { %v1325_v13 = vadd.f32 %v1324_v63, %v1321_v44 }
 0x224   :  { %v1329_v9 = vadd.f32 %v1328_v47, %v1325_v13 }
 0x226   :  { %v1333_v7 = vadd.f32 %v1332_v30, %v1329_v9 }
 0x228   :  { %v1337_v37 = vadd.f32 %v1336_v35, %v1333_v7 }
 0x22a   :  { %v1341_v41 = vadd.f32 %v1340_v31, %v1337_v37 }
 0x22c   :  { %v1345_v1 = vadd.f32 %v1344_v34, %v1341_v41 }
 0x22e   :  { %1346 = vst [vmem:[#allocation7] sm:$0xff] %v1345_v1 }
 0x22f   :  { %1357 = dma.vmem_to_hbm [thread:$0]  %s1353_s11, 128, %s1355_s28, [#allocation4]  }
 0x230   :  { %1770 = dma.done.wait [#allocation4], 128  }
 0x231   :  { %1771 = vsyncadd [#allocation4], 4294967168 }
 0x232   :  { %1362 = vsyncpa [#allocation3], 1 }
 0x233   :  { %1363 = vsyncpa [#allocation4], 1 }
 0x234   :  { %1364 = vsyncpa [#allocation5], 1 }

</bundles_post_ra>
